<compile_context>
chip_gen: v7x
topology: tpu7x:2x2x1
jax: 0.10.0
libtpu: 0.0.40
codegen_flags: <defaults>
</compile_context>

<pallas_src>
import functools

import jax
import jax.numpy as jnp
from jax.experimental import pallas as pl
from jax.experimental.pallas import tpu as pltpu


def _round_up(x, m):
    return (x + m - 1) // m * m


def _pick_tile(padded_dim, candidates):
    for c in candidates:
        if padded_dim % c == 0:
            return c
    return padded_dim


_VMEM_LIMIT = 48 * 1024 * 1024  # stays inside v7x's 64 MiB physical VMEM


# ------- Pallas batched (per-parity) matmul + fused stats / activation ------
def _bmm_kernel(a_ref, b_ref, *refs, act, with_stats):
    if with_stats:
        o_ref, sum_ref, sq_ref, acc_ref = refs
    else:
        o_ref, acc_ref = refs

    k = pl.program_id(3)

    @pl.when(k == 0)
    def _():
        acc_ref[...] = jnp.zeros_like(acc_ref)

    # bf16 x bf16 -> f32 accumulation on the MXU.
    acc_ref[...] += jnp.dot(a_ref[...], b_ref[...],
                            preferred_element_type=jnp.float32)

    @pl.when(k == pl.num_programs(3) - 1)
    def _():
        out = acc_ref[...]
        if act == "tanh":
            out = jnp.tanh(out)            # EUP slot -> effectively free
        o_ref[...] = out.astype(o_ref.dtype)
        if with_stats:
            # per-(parity, row-block, col-tile) partials; reduced in JAX.
            sum_ref[...] = jnp.sum(out, axis=0)[None, None, :]
            sq_ref[...] = jnp.sum(out * out, axis=0)[None, None, :]


def pallas_batched_matmul(a, b, *, act=None, with_stats=False):
    """out[p] = act(a[p] @ b[p]).

    a: (P, M, K), b: (P, K, N).  Operands go to the MXU in bf16; accumulator
    and outputs are f32.  Returns out (P, M, N) or (out, csum, csq) with the
    per-column stats already reduced over parities and rows (shape (N,)).
    """
    P, M, K = a.shape
    P2, K2, N = b.shape
    assert P == P2 and K == K2

    tm = 256 if M >= 256 else _round_up(M, 8)
    Mp = _round_up(M, tm)
    Kp = _round_up(K, 128)
    Np = _round_up(N, 128)
    tk = _pick_tile(Kp, (512, 256, 128))
    tn = _pick_tile(Np, (256, 128))

    a_bf = a.astype(jnp.bfloat16)
    b_bf = b.astype(jnp.bfloat16)
    # pad only when a dimension is actually ragged (most layers are aligned)
    if (Mp, Kp) != (M, K):
        a_bf = jnp.pad(a_bf, ((0, 0), (0, Mp - M), (0, Kp - K)))
    if (Kp, Np) != (K, N):
        b_bf = jnp.pad(b_bf, ((0, 0), (0, Kp - K), (0, Np - N)))

    gm, gn, gk = Mp // tm, Np // tn, Kp // tk

    out_shapes = [jax.ShapeDtypeStruct((P, Mp, Np), jnp.float32)]
    out_specs = [pl.BlockSpec((None, tm, tn), lambda p, i, j, k: (p, i, j))]
    if with_stats:
        st_shape = jax.ShapeDtypeStruct((P, gm, 1, Np), jnp.float32)
        st_spec = pl.BlockSpec((None, 1, 1, tn),
                               lambda p, i, j, k: (p, i, 0, j))
        out_shapes += [st_shape, st_shape]
        out_specs += [st_spec, st_spec]

    res = pl.pallas_call(
        functools.partial(_bmm_kernel, act=act, with_stats=with_stats),
        out_shape=tuple(out_shapes),
        grid_spec=pltpu.PrefetchScalarGridSpec(
            num_scalar_prefetch=0,
            grid=(P, gm, gn, gk),
            in_specs=[pl.BlockSpec((None, tm, tk),
                                   lambda p, i, j, k: (p, i, k)),
                      pl.BlockSpec((None, tk, tn),
                                   lambda p, i, j, k: (p, k, j))],
            out_specs=tuple(out_specs),
            scratch_shapes=[pltpu.VMEM((tm, tn), jnp.float32)]),
        compiler_params=pltpu.CompilerParams(
            dimension_semantics=("parallel", "parallel", "parallel",
                                 "arbitrary"),
            vmem_limit_bytes=_VMEM_LIMIT),
    )(a_bf, b_bf)

    out = res[0][:, :M, :N]
    if not with_stats:
        return out
    csum = jnp.sum(res[1], axis=(0, 1, 2))[:N]
    csq = jnp.sum(res[2], axis=(0, 1, 2))[:N]
    return out, csum, csq


# --------------- Pallas fused affine (BN) + activation kernel ---------------
def _bn_act_kernel(x_ref, scale_ref, shift_ref, o_ref, *, act):
    y = x_ref[...] * scale_ref[...] + shift_ref[...]   # f32 VPU math (v5e-safe)
    if act == "relu":
        y = jnp.maximum(y, 0.0)
    elif act == "tanh":
        y = jnp.tanh(y)
    o_ref[...] = y.astype(o_ref.dtype)


def _pallas_bn_act_2d(x2d, scale_row, shift_row, act,
                      out_dtype=jnp.bfloat16):
    R, C = x2d.shape
    if R >= 1024:
        tr = 512
    elif R >= 256:
        tr = 256
    else:
        tr = _round_up(R, 8)
    Rp = _round_up(R, tr)
    x_p = x2d if Rp == R else jnp.pad(x2d, ((0, Rp - R), (0, 0)))

    out = pl.pallas_call(
        functools.partial(_bn_act_kernel, act=act),
        out_shape=jax.ShapeDtypeStruct((Rp, C), out_dtype),
        grid_spec=pltpu.PrefetchScalarGridSpec(
            num_scalar_prefetch=0,
            grid=(Rp // tr,),
            in_specs=[pl.BlockSpec((tr, C), lambda i: (i, 0)),
                      pl.BlockSpec((1, C), lambda i: (0, 0)),
                      pl.BlockSpec((1, C), lambda i: (0, 0))],
            out_specs=pl.BlockSpec((tr, C), lambda i: (i, 0))),
        compiler_params=pltpu.CompilerParams(
            dimension_semantics=("parallel",),
            vmem_limit_bytes=_VMEM_LIMIT),
    )(x_p,
      scale_row.reshape(1, C).astype(jnp.float32),
      shift_row.reshape(1, C).astype(jnp.float32))
    return out[:R] if Rp != R else out


def bn_act_planes(y, scale, shift, act, meta):
    """Per-channel affine + act on parity-planar activations y: (P, M, C).

    Output is bf16 (feeds the next layer's bf16 MXU matmul), so the parity
    interleave and the next im2col only move half the bytes.
    """
    P, M, C = y.shape
    N, H, W, _ = meta
    if C % 128 == 0:
        out = _pallas_bn_act_2d(y.reshape(P * M, C), scale, shift, act)
    else:
        # lane-dense layout for small C: fold W into the channel axis so the
        # output last dim is a big multiple of 128 (unmasked vst).
        out = _pallas_bn_act_2d(y.reshape(P * N * H, W * C),
                                jnp.tile(scale, W), jnp.tile(shift, W), act)
    return out.reshape(P, M, C)


# --------------------------- layer-level helpers ---------------------------
def _bn_scale_shift(col_sum, col_sq, count, gamma, beta, eps=1e-5):
    # PyTorch nn.BatchNorm2d forward (training mode): batch stats, biased var.
    # Single-pass E[x^2]-E[x]^2 in f32 (stats accumulated in f32 inside the
    # matmul epilogue); clamp guards against tiny negative round-off.
    mean = col_sum / count
    var = jnp.maximum(col_sq / count - mean * mean, 0.0)
    scale = gamma * jax.lax.rsqrt(var + eps)
    shift = beta - mean * scale
    return scale, shift


def conv_transpose_s2(x_nhwc, w_t, *, act=None, with_stats=True):
    """ConvTranspose2d(k=4, s=2, p=1, bias=False) via sub-pixel decomposition.

    The transposed conv splits into 4 independent 2x2 convolutions, one per
    output-pixel parity (py, px):
        y[:, 2m+py, 2n+px, :] = sum_{dy,dx in 0..1}
            xpad[:, m+py+dy, n+px+dx, :] @ w[:, :, 3-py-2*dy, 3-px-2*dx]
    so K = 4*C_in (no zero dilation).  All 4 parities are stacked along a
    leading axis and run as one batched Pallas MXU matmul with optional
    fused activation / per-channel stats.

    Returns (out (4, N*H*W, C_out), col_sum, col_sq, meta).
    """
    N, H, W, C_in = x_nhwc.shape
    C_out = w_t.shape[1]
    x_bf = x_nhwc.astype(jnp.bfloat16)
    xp = jnp.pad(x_bf, ((0, 0), (1, 1), (1, 1), (0, 0)))

    # TODO(synk): the shifted-window tap gather is still an XLA copy in HBM;
    # pulling it into the matmul kernel's own DMA (pl.ANY + manual async
    # copies over a tap axis) would remove that pass entirely.
    patch_list, w_list = [], []
    for py in range(2):
        for px in range(2):
            taps = [xp[:, py + dy:py + dy + H, px + dx:px + dx + W, :]
                    for dy in range(2) for dx in range(2)]
            patch_list.append(
                jnp.concatenate(taps, axis=-1).reshape(N * H * W, 4 * C_in))
            w_sel = w_t[:, :, (3 - py, 1 - py), :][:, :, :, (3 - px, 1 - px)]
            w_list.append(
                jnp.transpose(w_sel, (2, 3, 0, 1)).reshape(4 * C_in, C_out))

    a = jnp.stack(patch_list, axis=0)        # (4, M, 4*C_in) bf16
    b = jnp.stack(w_list, axis=0)            # (4, 4*C_in, C_out) f32

    meta = (N, H, W, C_out)
    if with_stats:
        out, s, q = pallas_batched_matmul(a, b, act=act, with_stats=True)
        return out, s, q, meta
    out = pallas_batched_matmul(a, b, act=act, with_stats=False)
    return out, None, None, meta


def _interleave_parities(y, meta):
    """Scatter the 4 parity planes (4, N*H*W, C) into (N, 2H, 2W, C)."""
    N, H, W, C = meta
    y = y.reshape(2, 2, N, H, W, C)
    return jnp.transpose(y, (2, 3, 0, 4, 1, 5)).reshape(N, 2 * H, 2 * W, C)


# ------------------------------ full forward -------------------------------
def generator_forward(params, noise, attributes, eps=1e-5):
    # torch.cat([noise, attributes], dim=1).view(-1, C, 1, 1)
    gen_in = jnp.concatenate([noise, attributes], axis=1).astype(jnp.float32)
    B, C0 = gen_in.shape

    # layer 1: ConvTranspose2d(C0, 512, k=4, s=1, p=0) on a 1x1 input is a
    # tiny matmul; plain jnp.dot beats a Pallas launch + pad copies here.
    w1 = params["w1"]                                   # (C0, 512, 4, 4)
    w1_mat = jnp.transpose(w1, (0, 2, 3, 1)).reshape(C0, 16 * 512)
    x2d = jnp.dot(gen_in, w1_mat,
                  preferred_element_type=jnp.float32)   # (B, 16*512)
    x2d = x2d.reshape(B * 16, 512)                      # rows = (n, h, w)
    s1 = jnp.sum(x2d, axis=0)
    q1 = jnp.sum(x2d * x2d, axis=0)
    scale, shift = _bn_scale_shift(s1, q1, x2d.shape[0],
                                   params["g1"], params["b1"], eps)
    x = _pallas_bn_act_2d(x2d, scale, shift, "relu").reshape(B, 4, 4, 512)

    # layers 2-4: ConvT(k=4, s=2, p=1) + BatchNorm(batch stats) + ReLU.
    # BN+ReLU runs on the parity-planar layout (lane-dense) BEFORE the
    # interleave, so the interleave transpose moves bf16 data.
    for wk, gk, bk in (("w2", "g2", "b2"), ("w3", "g3", "b3"),
                       ("w4", "g4", "b4")):
        out, s, q, meta = conv_transpose_s2(x, params[wk], with_stats=True)
        n, h, w, _ = meta
        scale, shift = _bn_scale_shift(s, q, 4 * n * h * w,
                                       params[gk], params[bk], eps)
        y = bn_act_planes(out, scale, shift, "relu", meta)
        x = _interleave_parities(y, meta)

    # layer 5: ConvT(64, 3, k=4, s=2, p=1) + Tanh fused into matmul epilogue
    out, _, _, meta = conv_transpose_s2(x, params["w5"], act="tanh",
                                        with_stats=False)
    img_nhwc = _interleave_parities(out, meta)
    return jnp.transpose(img_nhwc, (0, 3, 1, 2)).astype(jnp.float32)  # NCHW


# ----------------------------- parameter init ------------------------------
def init_params(key, latent_dim, num_attributes):
    c0 = latent_dim + num_attributes
    ks = jax.random.split(key, 5)

    def w(k, cin, cout):
        # ConvTranspose2d weight shape in PyTorch: (C_in, C_out, kH, kW)
        return 0.05 * jax.random.normal(k, (cin, cout, 4, 4), jnp.float32)

    return {
        "w1": w(ks[0], c0, 512),
        "g1": jnp.ones((512,), jnp.float32), "b1": jnp.zeros((512,), jnp.float32),
        "w2": w(ks[1], 512, 256),
        "g2": jnp.ones((256,), jnp.float32), "b2": jnp.zeros((256,), jnp.float32),
        "w3": w(ks[2], 256, 128),
        "g3": jnp.ones((128,), jnp.float32), "b3": jnp.zeros((128,), jnp.float32),
        "w4": w(ks[3], 128, 64),
        "g4": jnp.ones((64,), jnp.float32), "b4": jnp.zeros((64,), jnp.float32),
        "w5": w(ks[4], 64, 3),
    }


if __name__ == "__main__":
    # small test shapes: batch=2, latent_dim=32, num_attributes=8
    latent_dim = 32
    num_attributes = 8
    batch = 2

    key = jax.random.PRNGKey(0)
    kp, kn, ka = jax.random.split(key, 3)
    params = init_params(kp, latent_dim, num_attributes)
    noise = jax.random.normal(kn, (batch, latent_dim), jnp.float32)
    attrs = jax.random.bernoulli(ka, 0.5, (batch, num_attributes)).astype(
        jnp.float32)

    fwd = jax.jit(generator_forward)
    img = fwd(params, noise, attrs)
    img = jax.block_until_ready(img)
    assert img.shape == (batch, 3, 64, 64), img.shape
    assert bool(jnp.all(jnp.isfinite(img)))
    print("KERNEL_OK")
</pallas_src>

<mosaic_0001>
module attributes {stable_mosaic.version = 11 : i64} {
  func.func @_bn_act_kernel(%arg0: i32, %arg1: memref<32x512xf32, #tpu.memory_space<vmem>>, %arg2: memref<1x512xf32, #tpu.memory_space<vmem>>, %arg3: memref<1x512xf32, #tpu.memory_space<vmem>>, %arg4: memref<32x512xbf16, #tpu.memory_space<vmem>>) attributes {dimension_semantics = [#tpu.dimension_semantics<parallel>], iteration_bounds = array<i64: 1>, scalar_prefetch = 0 : i64, scratch_operands = 0 : i64, tpu.core_type = #tpu.core_type<tc>, window_params = [{transform_indices = @transform_0, window_bounds = array<i64: 32, 512>}, {pipeline_mode = #tpu.pipeline_mode<synchronous>, transform_indices = @transform_1, window_bounds = array<i64: 1, 512>}, {pipeline_mode = #tpu.pipeline_mode<synchronous>, transform_indices = @transform_2, window_bounds = array<i64: 1, 512>}, {transform_indices = @transform_3, window_bounds = array<i64: 32, 512>}]} {
    %c0 = arith.constant 0 : index
    %c0_0 = arith.constant 0 : index
    %0 = vector.load %arg1[%c0, %c0_0] : memref<32x512xf32, #tpu.memory_space<vmem>>, vector<32x512xf32>
    %c0_1 = arith.constant 0 : index
    %c0_2 = arith.constant 0 : index
    %1 = vector.load %arg2[%c0_1, %c0_2] : memref<1x512xf32, #tpu.memory_space<vmem>>, vector<1x512xf32>
    %2 = vector.broadcast %1 : vector<1x512xf32> to vector<32x512xf32>
    %3 = arith.mulf %0, %2 : vector<32x512xf32>
    %c0_3 = arith.constant 0 : index
    %c0_4 = arith.constant 0 : index
    %4 = vector.load %arg3[%c0_3, %c0_4] : memref<1x512xf32, #tpu.memory_space<vmem>>, vector<1x512xf32>
    %5 = vector.broadcast %4 : vector<1x512xf32> to vector<32x512xf32>
    %6 = arith.addf %3, %5 : vector<32x512xf32>
    %cst = arith.constant 0.000000e+00 : f32
    %7 = vector.broadcast %cst : f32 to vector<32x512xf32>
    %8 = arith.maximumf %6, %7 : vector<32x512xf32>
    %9 = arith.truncf %8 : vector<32x512xf32> to vector<32x512xbf16>
    %c0_5 = arith.constant 0 : index
    %c0_6 = arith.constant 0 : index
    %10 = vector.load %arg4[%c0_5, %c0_6] : memref<32x512xbf16, #tpu.memory_space<vmem>>, vector<32x512xbf16>
    tpu.vector_store %arg4[%c0_5, %c0_6], %9 {strides = array<i32>} : memref<32x512xbf16, #tpu.memory_space<vmem>>, vector<32x512xbf16>,
    return
  }
  func.func @transform_0(%arg0: i32) -> (i32, i32) {
    %c0_i32 = arith.constant 0 : i32
    %c0_i32_0 = arith.constant 0 : i32
    return %arg0, %c0_i32 : i32, i32
  }
  func.func @transform_1(%arg0: i32) -> (i32, i32) {
    %c0_i32 = arith.constant 0 : i32
    %c0_i32_0 = arith.constant 0 : i32
    %c0_i32_1 = arith.constant 0 : i32
    return %c0_i32, %c0_i32_0 : i32, i32
  }
  func.func @transform_2(%arg0: i32) -> (i32, i32) {
    %c0_i32 = arith.constant 0 : i32
    %c0_i32_0 = arith.constant 0 : i32
    %c0_i32_1 = arith.constant 0 : i32
    return %c0_i32, %c0_i32_0 : i32, i32
  }
  func.func @transform_3(%arg0: i32) -> (i32, i32) {
    %c0_i32 = arith.constant 0 : i32
    %c0_i32_0 = arith.constant 0 : i32
    return %arg0, %c0_i32 : i32, i32
  }
}

module attributes {stable_mosaic.version = 11 : i64} {
  func.func @_bmm_kernel(%arg0: i32, %arg1: i32, %arg2: i32, %arg3: i32, %arg4: memref<1x32x512xbf16, #tpu.memory_space<vmem>>, %arg5: memref<1x512x256xbf16, #tpu.memory_space<vmem>>, %arg6: memref<1x32x256xf32, #tpu.memory_space<vmem>>, %arg7: memref<1x1x1x256xf32, #tpu.memory_space<vmem>>, %arg8: memref<1x1x1x256xf32, #tpu.memory_space<vmem>>, %arg9: memref<32x256xf32, #tpu.memory_space<vmem>>) attributes {dimension_semantics = [#tpu.dimension_semantics<parallel>, #tpu.dimension_semantics<parallel>, #tpu.dimension_semantics<parallel>, #tpu.dimension_semantics<arbitrary>], iteration_bounds = array<i64: 4, 1, 1, 4>, scalar_prefetch = 0 : i64, scratch_operands = 1 : i64, tpu.core_type = #tpu.core_type<tc>, window_params = [{transform_indices = @transform_0, window_bounds = array<i64: 1, 32, 512>}, {transform_indices = @transform_1, window_bounds = array<i64: 1, 512, 256>}, {transform_indices = @transform_2, window_bounds = array<i64: 1, 32, 256>}, {transform_indices = @transform_3, window_bounds = array<i64: 1, 1, 1, 256>}, {transform_indices = @transform_4, window_bounds = array<i64: 1, 1, 1, 256>}]} {
    %c0_i32 = arith.constant 0 : i32
    %0 = arith.cmpi eq, %arg3, %c0_i32 : i32
    %1 = arith.extui %0 : i1 to i32
    %c0_i32_0 = arith.constant 0 : i32
    %2 = arith.cmpi ne, %1, %c0_i32_0 : i32
    scf.if %2 {
      %cst_11 = arith.constant 0.000000e+00 : f32
      %14 = vector.broadcast %cst_11 : f32 to vector<32x256xf32>
      %c0_12 = arith.constant 0 : index
      %c0_13 = arith.constant 0 : index
      %15 = vector.load %arg9[%c0_12, %c0_13] : memref<32x256xf32, #tpu.memory_space<vmem>>, vector<32x256xf32>
      tpu.vector_store %arg9[%c0_12, %c0_13], %14 {strides = array<i32>} : memref<32x256xf32, #tpu.memory_space<vmem>>, vector<32x256xf32>,
    } else {
    }
    %c0 = arith.constant 0 : index
    %c0_1 = arith.constant 0 : index
    %3 = vector.load %arg9[%c0, %c0_1] : memref<32x256xf32, #tpu.memory_space<vmem>>, vector<32x256xf32>
    %c0_2 = arith.constant 0 : index
    %c0_3 = arith.constant 0 : index
    %c0_4 = arith.constant 0 : index
    %4 = vector.load %arg4[%c0_2, %c0_3, %c0_4] : memref<1x32x512xbf16, #tpu.memory_space<vmem>>, vector<1x32x512xbf16>
    %5 = vector.shape_cast %4 : vector<1x32x512xbf16> to vector<32x512xbf16>
    %c0_5 = arith.constant 0 : index
    %c0_6 = arith.constant 0 : index
    %c0_7 = arith.constant 0 : index
    %6 = vector.load %arg5[%c0_5, %c0_6, %c0_7] : memref<1x512x256xbf16, #tpu.memory_space<vmem>>, vector<1x512x256xbf16>
    %7 = vector.shape_cast %6 : vector<1x512x256xbf16> to vector<512x256xbf16>
    %cst = arith.constant dense<0.000000e+00> : vector<32x256xf32>
    %8 = tpu.matmul %5, %7, %cst {dimension_numbers = #tpu.dot_dimension_numbers<[1], [0], [0], [1], [0, 0, 1, 1], [], []>} : vector<32x512xbf16>, vector<512x256xbf16>, vector<32x256xf32> -> vector<32x256xf32>
    %9 = arith.addf %3, %8 : vector<32x256xf32>
    %c0_8 = arith.constant 0 : index
    %c0_9 = arith.constant 0 : index
    %10 = vector.load %arg9[%c0_8, %c0_9] : memref<32x256xf32, #tpu.memory_space<vmem>>, vector<32x256xf32>
    tpu.vector_store %arg9[%c0_8, %c0_9], %9 {strides = array<i32>} : memref<32x256xf32, #tpu.memory_space<vmem>>, vector<32x256xf32>,
    %c3_i32 = arith.constant 3 : i32
    %11 = arith.cmpi eq, %arg3, %c3_i32 : i32
    %12 = arith.extui %11 : i1 to i32
    %c0_i32_10 = arith.constant 0 : i32
    %13 = arith.cmpi ne, %12, %c0_i32_10 : i32
    scf.if %13 {
      %c0_11 = arith.constant 0 : index
      %c0_12 = arith.constant 0 : index
      %14 = vector.load %arg9[%c0_11, %c0_12] : memref<32x256xf32, #tpu.memory_space<vmem>>, vector<32x256xf32>
      %c0_13 = arith.constant 0 : index
      %c0_14 = arith.constant 0 : index
      %c0_15 = arith.constant 0 : index
      %15 = vector.load %arg6[%c0_13, %c0_14, %c0_15] : memref<1x32x256xf32, #tpu.memory_space<vmem>>, vector<1x32x256xf32>
      %16 = vector.shape_cast %15 : vector<1x32x256xf32> to vector<32x256xf32>
      %17 = vector.shape_cast %14 : vector<32x256xf32> to vector<1x32x256xf32>
      tpu.vector_store %arg6[%c0_13, %c0_14, %c0_15], %17 {strides = array<i32>} : memref<1x32x256xf32, #tpu.memory_space<vmem>>, vector<1x32x256xf32>,
      %cst_16 = arith.constant dense<0.000000e+00> : vector<256xf32>
      %18 = vector.multi_reduction <add>, %14, %cst_16 [0] : vector<32x256xf32> to vector<256xf32>
      %19 = vector.shape_cast %18 : vector<256xf32> to vector<1x1x256xf32>
      %c0_17 = arith.constant 0 : index
      %c0_18 = arith.constant 0 : index
      %c0_19 = arith.constant 0 : index
      %c0_20 = arith.constant 0 : index
      %20 = vector.load %arg7[%c0_17, %c0_18, %c0_19, %c0_20] : memref<1x1x1x256xf32, #tpu.memory_space<vmem>>, vector<1x1x1x256xf32>
      %21 = vector.shape_cast %20 : vector<1x1x1x256xf32> to vector<1x1x256xf32>
      %22 = vector.shape_cast %19 : vector<1x1x256xf32> to vector<1x1x1x256xf32>
      tpu.vector_store %arg7[%c0_17, %c0_18, %c0_19, %c0_20], %22 {strides = array<i32>} : memref<1x1x1x256xf32, #tpu.memory_space<vmem>>, vector<1x1x1x256xf32>,
      %23 = arith.mulf %14, %14 : vector<32x256xf32>
      %cst_21 = arith.constant dense<0.000000e+00> : vector<256xf32>
      %24 = vector.multi_reduction <add>, %23, %cst_21 [0] : vector<32x256xf32> to vector<256xf32>
      %25 = vector.shape_cast %24 : vector<256xf32> to vector<1x1x256xf32>
      %c0_22 = arith.constant 0 : index
      %c0_23 = arith.constant 0 : index
      %c0_24 = arith.constant 0 : index
      %c0_25 = arith.constant 0 : index
      %26 = vector.load %arg8[%c0_22, %c0_23, %c0_24, %c0_25] : memref<1x1x1x256xf32, #tpu.memory_space<vmem>>, vector<1x1x1x256xf32>
      %27 = vector.shape_cast %26 : vector<1x1x1x256xf32> to vector<1x1x256xf32>
      %28 = vector.shape_cast %25 : vector<1x1x256xf32> to vector<1x1x1x256xf32>
      tpu.vector_store %arg8[%c0_22, %c0_23, %c0_24, %c0_25], %28 {strides = array<i32>} : memref<1x1x1x256xf32, #tpu.memory_space<vmem>>, vector<1x1x1x256xf32>,
    } else {
    }
    return
  }
  func.func @transform_0(%arg0: i32, %arg1: i32, %arg2: i32, %arg3: i32) -> (i32, i32, i32) {
    %c0_i32 = arith.constant 0 : i32
    return %arg0, %arg1, %arg3 : i32, i32, i32
  }
  func.func @transform_1(%arg0: i32, %arg1: i32, %arg2: i32, %arg3: i32) -> (i32, i32, i32) {
    %c0_i32 = arith.constant 0 : i32
    return %arg0, %arg3, %arg2 : i32, i32, i32
  }
  func.func @transform_2(%arg0: i32, %arg1: i32, %arg2: i32, %arg3: i32) -> (i32, i32, i32) {
    %c0_i32 = arith.constant 0 : i32
    return %arg0, %arg1, %arg2 : i32, i32, i32
  }
  func.func @transform_3(%arg0: i32, %arg1: i32, %arg2: i32, %arg3: i32) -> (i32, i32, i32, i32) {
    %c0_i32 = arith.constant 0 : i32
    %c0_i32_0 = arith.constant 0 : i32
    return %arg0, %arg1, %c0_i32, %arg2 : i32, i32, i32, i32
  }
  func.func @transform_4(%arg0: i32, %arg1: i32, %arg2: i32, %arg3: i32) -> (i32, i32, i32, i32) {
    %c0_i32 = arith.constant 0 : i32
    %c0_i32_0 = arith.constant 0 : i32
    return %arg0, %arg1, %c0_i32, %arg2 : i32, i32, i32, i32
  }
}

module attributes {stable_mosaic.version = 11 : i64} {
  func.func @_bn_act_kernel(%arg0: i32, %arg1: memref<128x256xf32, #tpu.memory_space<vmem>>, %arg2: memref<1x256xf32, #tpu.memory_space<vmem>>, %arg3: memref<1x256xf32, #tpu.memory_space<vmem>>, %arg4: memref<128x256xbf16, #tpu.memory_space<vmem>>) attributes {dimension_semantics = [#tpu.dimension_semantics<parallel>], iteration_bounds = array<i64: 1>, scalar_prefetch = 0 : i64, scratch_operands = 0 : i64, tpu.core_type = #tpu.core_type<tc>, window_params = [{transform_indices = @transform_0, window_bounds = array<i64: 128, 256>}, {pipeline_mode = #tpu.pipeline_mode<synchronous>, transform_indices = @transform_1, window_bounds = array<i64: 1, 256>}, {pipeline_mode = #tpu.pipeline_mode<synchronous>, transform_indices = @transform_2, window_bounds = array<i64: 1, 256>}, {transform_indices = @transform_3, window_bounds = array<i64: 128, 256>}]} {
    %c0 = arith.constant 0 : index
    %c0_0 = arith.constant 0 : index
    %0 = vector.load %arg1[%c0, %c0_0] : memref<128x256xf32, #tpu.memory_space<vmem>>, vector<128x256xf32>
    %c0_1 = arith.constant 0 : index
    %c0_2 = arith.constant 0 : index
    %1 = vector.load %arg2[%c0_1, %c0_2] : memref<1x256xf32, #tpu.memory_space<vmem>>, vector<1x256xf32>
    %2 = vector.broadcast %1 : vector<1x256xf32> to vector<128x256xf32>
    %3 = arith.mulf %0, %2 : vector<128x256xf32>
    %c0_3 = arith.constant 0 : index
    %c0_4 = arith.constant 0 : index
    %4 = vector.load %arg3[%c0_3, %c0_4] : memref<1x256xf32, #tpu.memory_space<vmem>>, vector<1x256xf32>
    %5 = vector.broadcast %4 : vector<1x256xf32> to vector<128x256xf32>
    %6 = arith.addf %3, %5 : vector<128x256xf32>
    %cst = arith.constant 0.000000e+00 : f32
    %7 = vector.broadcast %cst : f32 to vector<128x256xf32>
    %8 = arith.maximumf %6, %7 : vector<128x256xf32>
    %9 = arith.truncf %8 : vector<128x256xf32> to vector<128x256xbf16>
    %c0_5 = arith.constant 0 : index
    %c0_6 = arith.constant 0 : index
    %10 = vector.load %arg4[%c0_5, %c0_6] : memref<128x256xbf16, #tpu.memory_space<vmem>>, vector<128x256xbf16>
    tpu.vector_store %arg4[%c0_5, %c0_6], %9 {strides = array<i32>} : memref<128x256xbf16, #tpu.memory_space<vmem>>, vector<128x256xbf16>,
    return
  }
  func.func @transform_0(%arg0: i32) -> (i32, i32) {
    %c0_i32 = arith.constant 0 : i32
    %c0_i32_0 = arith.constant 0 : i32
    return %arg0, %c0_i32 : i32, i32
  }
  func.func @transform_1(%arg0: i32) -> (i32, i32) {
    %c0_i32 = arith.constant 0 : i32
    %c0_i32_0 = arith.constant 0 : i32
    %c0_i32_1 = arith.constant 0 : i32
    return %c0_i32, %c0_i32_0 : i32, i32
  }
  func.func @transform_2(%arg0: i32) -> (i32, i32) {
    %c0_i32 = arith.constant 0 : i32
    %c0_i32_0 = arith.constant 0 : i32
    %c0_i32_1 = arith.constant 0 : i32
    return %c0_i32, %c0_i32_0 : i32, i32
  }
  func.func @transform_3(%arg0: i32) -> (i32, i32) {
    %c0_i32 = arith.constant 0 : i32
    %c0_i32_0 = arith.constant 0 : i32
    return %arg0, %c0_i32 : i32, i32
  }
}

module attributes {stable_mosaic.version = 11 : i64} {
  func.func @_bmm_kernel(%arg0: i32, %arg1: i32, %arg2: i32, %arg3: i32, %arg4: memref<1x128x512xbf16, #tpu.memory_space<vmem>>, %arg5: memref<1x512x128xbf16, #tpu.memory_space<vmem>>, %arg6: memref<1x128x128xf32, #tpu.memory_space<vmem>>, %arg7: memref<1x1x1x128xf32, #tpu.memory_space<vmem>>, %arg8: memref<1x1x1x128xf32, #tpu.memory_space<vmem>>, %arg9: memref<128x128xf32, #tpu.memory_space<vmem>>) attributes {dimension_semantics = [#tpu.dimension_semantics<parallel>, #tpu.dimension_semantics<parallel>, #tpu.dimension_semantics<parallel>, #tpu.dimension_semantics<arbitrary>], iteration_bounds = array<i64: 4, 1, 1, 2>, scalar_prefetch = 0 : i64, scratch_operands = 1 : i64, tpu.core_type = #tpu.core_type<tc>, window_params = [{transform_indices = @transform_0, window_bounds = array<i64: 1, 128, 512>}, {transform_indices = @transform_1, window_bounds = array<i64: 1, 512, 128>}, {transform_indices = @transform_2, window_bounds = array<i64: 1, 128, 128>}, {transform_indices = @transform_3, window_bounds = array<i64: 1, 1, 1, 128>}, {transform_indices = @transform_4, window_bounds = array<i64: 1, 1, 1, 128>}]} {
    %c0_i32 = arith.constant 0 : i32
    %0 = arith.cmpi eq, %arg3, %c0_i32 : i32
    %1 = arith.extui %0 : i1 to i32
    %c0_i32_0 = arith.constant 0 : i32
    %2 = arith.cmpi ne, %1, %c0_i32_0 : i32
    scf.if %2 {
      %cst_11 = arith.constant 0.000000e+00 : f32
      %14 = vector.broadcast %cst_11 : f32 to vector<128x128xf32>
      %c0_12 = arith.constant 0 : index
      %c0_13 = arith.constant 0 : index
      %15 = vector.load %arg9[%c0_12, %c0_13] : memref<128x128xf32, #tpu.memory_space<vmem>>, vector<128x128xf32>
      tpu.vector_store %arg9[%c0_12, %c0_13], %14 {strides = array<i32>} : memref<128x128xf32, #tpu.memory_space<vmem>>, vector<128x128xf32>,
    } else {
    }
    %c0 = arith.constant 0 : index
    %c0_1 = arith.constant 0 : index
    %3 = vector.load %arg9[%c0, %c0_1] : memref<128x128xf32, #tpu.memory_space<vmem>>, vector<128x128xf32>
    %c0_2 = arith.constant 0 : index
    %c0_3 = arith.constant 0 : index
    %c0_4 = arith.constant 0 : index
    %4 = vector.load %arg4[%c0_2, %c0_3, %c0_4] : memref<1x128x512xbf16, #tpu.memory_space<vmem>>, vector<1x128x512xbf16>
    %5 = vector.shape_cast %4 : vector<1x128x512xbf16> to vector<128x512xbf16>
    %c0_5 = arith.constant 0 : index
    %c0_6 = arith.constant 0 : index
    %c0_7 = arith.constant 0 : index
    %6 = vector.load %arg5[%c0_5, %c0_6, %c0_7] : memref<1x512x128xbf16, #tpu.memory_space<vmem>>, vector<1x512x128xbf16>
    %7 = vector.shape_cast %6 : vector<1x512x128xbf16> to vector<512x128xbf16>
    %cst = arith.constant dense<0.000000e+00> : vector<128x128xf32>
    %8 = tpu.matmul %5, %7, %cst {dimension_numbers = #tpu.dot_dimension_numbers<[1], [0], [0], [1], [0, 0, 1, 1], [], []>} : vector<128x512xbf16>, vector<512x128xbf16>, vector<128x128xf32> -> vector<128x128xf32>
    %9 = arith.addf %3, %8 : vector<128x128xf32>
    %c0_8 = arith.constant 0 : index
    %c0_9 = arith.constant 0 : index
    %10 = vector.load %arg9[%c0_8, %c0_9] : memref<128x128xf32, #tpu.memory_space<vmem>>, vector<128x128xf32>
    tpu.vector_store %arg9[%c0_8, %c0_9], %9 {strides = array<i32>} : memref<128x128xf32, #tpu.memory_space<vmem>>, vector<128x128xf32>,
    %c1_i32 = arith.constant 1 : i32
    %11 = arith.cmpi eq, %arg3, %c1_i32 : i32
    %12 = arith.extui %11 : i1 to i32
    %c0_i32_10 = arith.constant 0 : i32
    %13 = arith.cmpi ne, %12, %c0_i32_10 : i32
    scf.if %13 {
      %c0_11 = arith.constant 0 : index
      %c0_12 = arith.constant 0 : index
      %14 = vector.load %arg9[%c0_11, %c0_12] : memref<128x128xf32, #tpu.memory_space<vmem>>, vector<128x128xf32>
      %c0_13 = arith.constant 0 : index
      %c0_14 = arith.constant 0 : index
      %c0_15 = arith.constant 0 : index
      %15 = vector.load %arg6[%c0_13, %c0_14, %c0_15] : memref<1x128x128xf32, #tpu.memory_space<vmem>>, vector<1x128x128xf32>
      %16 = vector.shape_cast %15 : vector<1x128x128xf32> to vector<128x128xf32>
      %17 = vector.shape_cast %14 : vector<128x128xf32> to vector<1x128x128xf32>
      tpu.vector_store %arg6[%c0_13, %c0_14, %c0_15], %17 {strides = array<i32>} : memref<1x128x128xf32, #tpu.memory_space<vmem>>, vector<1x128x128xf32>,
      %cst_16 = arith.constant dense<0.000000e+00> : vector<128xf32>
      %18 = vector.multi_reduction <add>, %14, %cst_16 [0] : vector<128x128xf32> to vector<128xf32>
      %19 = vector.shape_cast %18 : vector<128xf32> to vector<1x1x128xf32>
      %c0_17 = arith.constant 0 : index
      %c0_18 = arith.constant 0 : index
      %c0_19 = arith.constant 0 : index
      %c0_20 = arith.constant 0 : index
      %20 = vector.load %arg7[%c0_17, %c0_18, %c0_19, %c0_20] : memref<1x1x1x128xf32, #tpu.memory_space<vmem>>, vector<1x1x1x128xf32>
      %21 = vector.shape_cast %20 : vector<1x1x1x128xf32> to vector<1x1x128xf32>
      %22 = vector.shape_cast %19 : vector<1x1x128xf32> to vector<1x1x1x128xf32>
      tpu.vector_store %arg7[%c0_17, %c0_18, %c0_19, %c0_20], %22 {strides = array<i32>} : memref<1x1x1x128xf32, #tpu.memory_space<vmem>>, vector<1x1x1x128xf32>,
      %23 = arith.mulf %14, %14 : vector<128x128xf32>
      %cst_21 = arith.constant dense<0.000000e+00> : vector<128xf32>
      %24 = vector.multi_reduction <add>, %23, %cst_21 [0] : vector<128x128xf32> to vector<128xf32>
      %25 = vector.shape_cast %24 : vector<128xf32> to vector<1x1x128xf32>
      %c0_22 = arith.constant 0 : index
      %c0_23 = arith.constant 0 : index
      %c0_24 = arith.constant 0 : index
      %c0_25 = arith.constant 0 : index
      %26 = vector.load %arg8[%c0_22, %c0_23, %c0_24, %c0_25] : memref<1x1x1x128xf32, #tpu.memory_space<vmem>>, vector<1x1x1x128xf32>
      %27 = vector.shape_cast %26 : vector<1x1x1x128xf32> to vector<1x1x128xf32>
      %28 = vector.shape_cast %25 : vector<1x1x128xf32> to vector<1x1x1x128xf32>
      tpu.vector_store %arg8[%c0_22, %c0_23, %c0_24, %c0_25], %28 {strides = array<i32>} : memref<1x1x1x128xf32, #tpu.memory_space<vmem>>, vector<1x1x1x128xf32>,
    } else {
    }
    return
  }
  func.func @transform_0(%arg0: i32, %arg1: i32, %arg2: i32, %arg3: i32) -> (i32, i32, i32) {
    %c0_i32 = arith.constant 0 : i32
    return %arg0, %arg1, %arg3 : i32, i32, i32
  }
  func.func @transform_1(%arg0: i32, %arg1: i32, %arg2: i32, %arg3: i32) -> (i32, i32, i32) {
    %c0_i32 = arith.constant 0 : i32
    return %arg0, %arg3, %arg2 : i32, i32, i32
  }
  func.func @transform_2(%arg0: i32, %arg1: i32, %arg2: i32, %arg3: i32) -> (i32, i32, i32) {
    %c0_i32 = arith.constant 0 : i32
    return %arg0, %arg1, %arg2 : i32, i32, i32
  }
  func.func @transform_3(%arg0: i32, %arg1: i32, %arg2: i32, %arg3: i32) -> (i32, i32, i32, i32) {
    %c0_i32 = arith.constant 0 : i32
    %c0_i32_0 = arith.constant 0 : i32
    return %arg0, %arg1, %c0_i32, %arg2 : i32, i32, i32, i32
  }
  func.func @transform_4(%arg0: i32, %arg1: i32, %arg2: i32, %arg3: i32) -> (i32, i32, i32, i32) {
    %c0_i32 = arith.constant 0 : i32
    %c0_i32_0 = arith.constant 0 : i32
    return %arg0, %arg1, %c0_i32, %arg2 : i32, i32, i32, i32
  }
}

module attributes {stable_mosaic.version = 11 : i64} {
  func.func @_bn_act_kernel(%arg0: i32, %arg1: memref<256x128xf32, #tpu.memory_space<vmem>>, %arg2: memref<1x128xf32, #tpu.memory_space<vmem>>, %arg3: memref<1x128xf32, #tpu.memory_space<vmem>>, %arg4: memref<256x128xbf16, #tpu.memory_space<vmem>>) attributes {dimension_semantics = [#tpu.dimension_semantics<parallel>], iteration_bounds = array<i64: 2>, scalar_prefetch = 0 : i64, scratch_operands = 0 : i64, tpu.core_type = #tpu.core_type<tc>, window_params = [{transform_indices = @transform_0, window_bounds = array<i64: 256, 128>}, {pipeline_mode = #tpu.pipeline_mode<synchronous>, transform_indices = @transform_1, window_bounds = array<i64: 1, 128>}, {pipeline_mode = #tpu.pipeline_mode<synchronous>, transform_indices = @transform_2, window_bounds = array<i64: 1, 128>}, {transform_indices = @transform_3, window_bounds = array<i64: 256, 128>}]} {
    %c0 = arith.constant 0 : index
    %c0_0 = arith.constant 0 : index
    %0 = vector.load %arg1[%c0, %c0_0] : memref<256x128xf32, #tpu.memory_space<vmem>>, vector<256x128xf32>
    %c0_1 = arith.constant 0 : index
    %c0_2 = arith.constant 0 : index
    %1 = vector.load %arg2[%c0_1, %c0_2] : memref<1x128xf32, #tpu.memory_space<vmem>>, vector<1x128xf32>
    %2 = vector.broadcast %1 : vector<1x128xf32> to vector<256x128xf32>
    %3 = arith.mulf %0, %2 : vector<256x128xf32>
    %c0_3 = arith.constant 0 : index
    %c0_4 = arith.constant 0 : index
    %4 = vector.load %arg3[%c0_3, %c0_4] : memref<1x128xf32, #tpu.memory_space<vmem>>, vector<1x128xf32>
    %5 = vector.broadcast %4 : vector<1x128xf32> to vector<256x128xf32>
    %6 = arith.addf %3, %5 : vector<256x128xf32>
    %cst = arith.constant 0.000000e+00 : f32
    %7 = vector.broadcast %cst : f32 to vector<256x128xf32>
    %8 = arith.maximumf %6, %7 : vector<256x128xf32>
    %9 = arith.truncf %8 : vector<256x128xf32> to vector<256x128xbf16>
    %c0_5 = arith.constant 0 : index
    %c0_6 = arith.constant 0 : index
    %10 = vector.load %arg4[%c0_5, %c0_6] : memref<256x128xbf16, #tpu.memory_space<vmem>>, vector<256x128xbf16>
    tpu.vector_store %arg4[%c0_5, %c0_6], %9 {strides = array<i32>} : memref<256x128xbf16, #tpu.memory_space<vmem>>, vector<256x128xbf16>,
    return
  }
  func.func @transform_0(%arg0: i32) -> (i32, i32) {
    %c0_i32 = arith.constant 0 : i32
    %c0_i32_0 = arith.constant 0 : i32
    return %arg0, %c0_i32 : i32, i32
  }
  func.func @transform_1(%arg0: i32) -> (i32, i32) {
    %c0_i32 = arith.constant 0 : i32
    %c0_i32_0 = arith.constant 0 : i32
    %c0_i32_1 = arith.constant 0 : i32
    return %c0_i32, %c0_i32_0 : i32, i32
  }
  func.func @transform_2(%arg0: i32) -> (i32, i32) {
    %c0_i32 = arith.constant 0 : i32
    %c0_i32_0 = arith.constant 0 : i32
    %c0_i32_1 = arith.constant 0 : i32
    return %c0_i32, %c0_i32_0 : i32, i32
  }
  func.func @transform_3(%arg0: i32) -> (i32, i32) {
    %c0_i32 = arith.constant 0 : i32
    %c0_i32_0 = arith.constant 0 : i32
    return %arg0, %c0_i32 : i32, i32
  }
}

module attributes {stable_mosaic.version = 11 : i64} {
  func.func @_bmm_kernel(%arg0: i32, %arg1: i32, %arg2: i32, %arg3: i32, %arg4: memref<1x256x512xbf16, #tpu.memory_space<vmem>>, %arg5: memref<1x512x128xbf16, #tpu.memory_space<vmem>>, %arg6: memref<1x256x128xf32, #tpu.memory_space<vmem>>, %arg7: memref<1x1x1x128xf32, #tpu.memory_space<vmem>>, %arg8: memref<1x1x1x128xf32, #tpu.memory_space<vmem>>, %arg9: memref<256x128xf32, #tpu.memory_space<vmem>>) attributes {dimension_semantics = [#tpu.dimension_semantics<parallel>, #tpu.dimension_semantics<parallel>, #tpu.dimension_semantics<parallel>, #tpu.dimension_semantics<arbitrary>], iteration_bounds = array<i64: 4, 2, 1, 1>, scalar_prefetch = 0 : i64, scratch_operands = 1 : i64, tpu.core_type = #tpu.core_type<tc>, window_params = [{transform_indices = @transform_0, window_bounds = array<i64: 1, 256, 512>}, {transform_indices = @transform_1, window_bounds = array<i64: 1, 512, 128>}, {transform_indices = @transform_2, window_bounds = array<i64: 1, 256, 128>}, {transform_indices = @transform_3, window_bounds = array<i64: 1, 1, 1, 128>}, {transform_indices = @transform_4, window_bounds = array<i64: 1, 1, 1, 128>}]} {
    %c0_i32 = arith.constant 0 : i32
    %0 = arith.cmpi eq, %arg3, %c0_i32 : i32
    %1 = arith.extui %0 : i1 to i32
    %c0_i32_0 = arith.constant 0 : i32
    %2 = arith.cmpi ne, %1, %c0_i32_0 : i32
    scf.if %2 {
      %cst_12 = arith.constant 0.000000e+00 : f32
      %14 = vector.broadcast %cst_12 : f32 to vector<256x128xf32>
      %c0_13 = arith.constant 0 : index
      %c0_14 = arith.constant 0 : index
      %15 = vector.load %arg9[%c0_13, %c0_14] : memref<256x128xf32, #tpu.memory_space<vmem>>, vector<256x128xf32>
      tpu.vector_store %arg9[%c0_13, %c0_14], %14 {strides = array<i32>} : memref<256x128xf32, #tpu.memory_space<vmem>>, vector<256x128xf32>,
    } else {
    }
    %c0 = arith.constant 0 : index
    %c0_1 = arith.constant 0 : index
    %3 = vector.load %arg9[%c0, %c0_1] : memref<256x128xf32, #tpu.memory_space<vmem>>, vector<256x128xf32>
    %c0_2 = arith.constant 0 : index
    %c0_3 = arith.constant 0 : index
    %c0_4 = arith.constant 0 : index
    %4 = vector.load %arg4[%c0_2, %c0_3, %c0_4] : memref<1x256x512xbf16, #tpu.memory_space<vmem>>, vector<1x256x512xbf16>
    %5 = vector.shape_cast %4 : vector<1x256x512xbf16> to vector<256x512xbf16>
    %c0_5 = arith.constant 0 : index
    %c0_6 = arith.constant 0 : index
    %c0_7 = arith.constant 0 : index
    %6 = vector.load %arg5[%c0_5, %c0_6, %c0_7] : memref<1x512x128xbf16, #tpu.memory_space<vmem>>, vector<1x512x128xbf16>
    %7 = vector.shape_cast %6 : vector<1x512x128xbf16> to vector<512x128xbf16>
    %cst = arith.constant dense<0.000000e+00> : vector<256x128xf32>
    %8 = tpu.matmul %5, %7, %cst {dimension_numbers = #tpu.dot_dimension_numbers<[1], [0], [0], [1], [0, 0, 1, 1], [], []>} : vector<256x512xbf16>, vector<512x128xbf16>, vector<256x128xf32> -> vector<256x128xf32>
    %9 = arith.addf %3, %8 : vector<256x128xf32>
    %c0_8 = arith.constant 0 : index
    %c0_9 = arith.constant 0 : index
    %10 = vector.load %arg9[%c0_8, %c0_9] : memref<256x128xf32, #tpu.memory_space<vmem>>, vector<256x128xf32>
    tpu.vector_store %arg9[%c0_8, %c0_9], %9 {strides = array<i32>} : memref<256x128xf32, #tpu.memory_space<vmem>>, vector<256x128xf32>,
    %c0_i32_10 = arith.constant 0 : i32
    %11 = arith.cmpi eq, %arg3, %c0_i32_10 : i32
    %12 = arith.extui %11 : i1 to i32
    %c0_i32_11 = arith.constant 0 : i32
    %13 = arith.cmpi ne, %12, %c0_i32_11 : i32
    scf.if %13 {
      %c0_12 = arith.constant 0 : index
      %c0_13 = arith.constant 0 : index
      %14 = vector.load %arg9[%c0_12, %c0_13] : memref<256x128xf32, #tpu.memory_space<vmem>>, vector<256x128xf32>
      %c0_14 = arith.constant 0 : index
      %c0_15 = arith.constant 0 : index
      %c0_16 = arith.constant 0 : index
      %15 = vector.load %arg6[%c0_14, %c0_15, %c0_16] : memref<1x256x128xf32, #tpu.memory_space<vmem>>, vector<1x256x128xf32>
      %16 = vector.shape_cast %15 : vector<1x256x128xf32> to vector<256x128xf32>
      %17 = vector.shape_cast %14 : vector<256x128xf32> to vector<1x256x128xf32>
      tpu.vector_store %arg6[%c0_14, %c0_15, %c0_16], %17 {strides = array<i32>} : memref<1x256x128xf32, #tpu.memory_space<vmem>>, vector<1x256x128xf32>,
      %cst_17 = arith.constant dense<0.000000e+00> : vector<128xf32>
      %18 = vector.multi_reduction <add>, %14, %cst_17 [0] : vector<256x128xf32> to vector<128xf32>
      %19 = vector.shape_cast %18 : vector<128xf32> to vector<1x1x128xf32>
      %c0_18 = arith.constant 0 : index
      %c0_19 = arith.constant 0 : index
      %c0_20 = arith.constant 0 : index
      %c0_21 = arith.constant 0 : index
      %20 = vector.load %arg7[%c0_18, %c0_19, %c0_20, %c0_21] : memref<1x1x1x128xf32, #tpu.memory_space<vmem>>, vector<1x1x1x128xf32>
      %21 = vector.shape_cast %20 : vector<1x1x1x128xf32> to vector<1x1x128xf32>
      %22 = vector.shape_cast %19 : vector<1x1x128xf32> to vector<1x1x1x128xf32>
      tpu.vector_store %arg7[%c0_18, %c0_19, %c0_20, %c0_21], %22 {strides = array<i32>} : memref<1x1x1x128xf32, #tpu.memory_space<vmem>>, vector<1x1x1x128xf32>,
      %23 = arith.mulf %14, %14 : vector<256x128xf32>
      %cst_22 = arith.constant dense<0.000000e+00> : vector<128xf32>
      %24 = vector.multi_reduction <add>, %23, %cst_22 [0] : vector<256x128xf32> to vector<128xf32>
      %25 = vector.shape_cast %24 : vector<128xf32> to vector<1x1x128xf32>
      %c0_23 = arith.constant 0 : index
      %c0_24 = arith.constant 0 : index
      %c0_25 = arith.constant 0 : index
      %c0_26 = arith.constant 0 : index
      %26 = vector.load %arg8[%c0_23, %c0_24, %c0_25, %c0_26] : memref<1x1x1x128xf32, #tpu.memory_space<vmem>>, vector<1x1x1x128xf32>
      %27 = vector.shape_cast %26 : vector<1x1x1x128xf32> to vector<1x1x128xf32>
      %28 = vector.shape_cast %25 : vector<1x1x128xf32> to vector<1x1x1x128xf32>
      tpu.vector_store %arg8[%c0_23, %c0_24, %c0_25, %c0_26], %28 {strides = array<i32>} : memref<1x1x1x128xf32, #tpu.memory_space<vmem>>, vector<1x1x1x128xf32>,
    } else {
    }
    return
  }
  func.func @transform_0(%arg0: i32, %arg1: i32, %arg2: i32, %arg3: i32) -> (i32, i32, i32) {
    %c0_i32 = arith.constant 0 : i32
    return %arg0, %arg1, %arg3 : i32, i32, i32
  }
  func.func @transform_1(%arg0: i32, %arg1: i32, %arg2: i32, %arg3: i32) -> (i32, i32, i32) {
    %c0_i32 = arith.constant 0 : i32
    return %arg0, %arg3, %arg2 : i32, i32, i32
  }
  func.func @transform_2(%arg0: i32, %arg1: i32, %arg2: i32, %arg3: i32) -> (i32, i32, i32) {
    %c0_i32 = arith.constant 0 : i32
    return %arg0, %arg1, %arg2 : i32, i32, i32
  }
  func.func @transform_3(%arg0: i32, %arg1: i32, %arg2: i32, %arg3: i32) -> (i32, i32, i32, i32) {
    %c0_i32 = arith.constant 0 : i32
    %c0_i32_0 = arith.constant 0 : i32
    return %arg0, %arg1, %c0_i32, %arg2 : i32, i32, i32, i32
  }
  func.func @transform_4(%arg0: i32, %arg1: i32, %arg2: i32, %arg3: i32) -> (i32, i32, i32, i32) {
    %c0_i32 = arith.constant 0 : i32
    %c0_i32_0 = arith.constant 0 : i32
    return %arg0, %arg1, %c0_i32, %arg2 : i32, i32, i32, i32
  }
}

module attributes {stable_mosaic.version = 11 : i64} {
  func.func @_bn_act_kernel(%arg0: i32, %arg1: memref<128x1024xf32, #tpu.memory_space<vmem>>, %arg2: memref<1x1024xf32, #tpu.memory_space<vmem>>, %arg3: memref<1x1024xf32, #tpu.memory_space<vmem>>, %arg4: memref<128x1024xbf16, #tpu.memory_space<vmem>>) attributes {dimension_semantics = [#tpu.dimension_semantics<parallel>], iteration_bounds = array<i64: 1>, scalar_prefetch = 0 : i64, scratch_operands = 0 : i64, tpu.core_type = #tpu.core_type<tc>, window_params = [{transform_indices = @transform_0, window_bounds = array<i64: 128, 1024>}, {pipeline_mode = #tpu.pipeline_mode<synchronous>, transform_indices = @transform_1, window_bounds = array<i64: 1, 1024>}, {pipeline_mode = #tpu.pipeline_mode<synchronous>, transform_indices = @transform_2, window_bounds = array<i64: 1, 1024>}, {transform_indices = @transform_3, window_bounds = array<i64: 128, 1024>}]} {
    %c0 = arith.constant 0 : index
    %c0_0 = arith.constant 0 : index
    %0 = vector.load %arg1[%c0, %c0_0] : memref<128x1024xf32, #tpu.memory_space<vmem>>, vector<128x1024xf32>
    %c0_1 = arith.constant 0 : index
    %c0_2 = arith.constant 0 : index
    %1 = vector.load %arg2[%c0_1, %c0_2] : memref<1x1024xf32, #tpu.memory_space<vmem>>, vector<1x1024xf32>
    %2 = vector.broadcast %1 : vector<1x1024xf32> to vector<128x1024xf32>
    %3 = arith.mulf %0, %2 : vector<128x1024xf32>
    %c0_3 = arith.constant 0 : index
    %c0_4 = arith.constant 0 : index
    %4 = vector.load %arg3[%c0_3, %c0_4] : memref<1x1024xf32, #tpu.memory_space<vmem>>, vector<1x1024xf32>
    %5 = vector.broadcast %4 : vector<1x1024xf32> to vector<128x1024xf32>
    %6 = arith.addf %3, %5 : vector<128x1024xf32>
    %cst = arith.constant 0.000000e+00 : f32
    %7 = vector.broadcast %cst : f32 to vector<128x1024xf32>
    %8 = arith.maximumf %6, %7 : vector<128x1024xf32>
    %9 = arith.truncf %8 : vector<128x1024xf32> to vector<128x1024xbf16>
    %c0_5 = arith.constant 0 : index
    %c0_6 = arith.constant 0 : index
    %10 = vector.load %arg4[%c0_5, %c0_6] : memref<128x1024xbf16, #tpu.memory_space<vmem>>, vector<128x1024xbf16>
    tpu.vector_store %arg4[%c0_5, %c0_6], %9 {strides = array<i32>} : memref<128x1024xbf16, #tpu.memory_space<vmem>>, vector<128x1024xbf16>,
    return
  }
  func.func @transform_0(%arg0: i32) -> (i32, i32) {
    %c0_i32 = arith.constant 0 : i32
    %c0_i32_0 = arith.constant 0 : i32
    return %arg0, %c0_i32 : i32, i32
  }
  func.func @transform_1(%arg0: i32) -> (i32, i32) {
    %c0_i32 = arith.constant 0 : i32
    %c0_i32_0 = arith.constant 0 : i32
    %c0_i32_1 = arith.constant 0 : i32
    return %c0_i32, %c0_i32_0 : i32, i32
  }
  func.func @transform_2(%arg0: i32) -> (i32, i32) {
    %c0_i32 = arith.constant 0 : i32
    %c0_i32_0 = arith.constant 0 : i32
    %c0_i32_1 = arith.constant 0 : i32
    return %c0_i32, %c0_i32_0 : i32, i32
  }
  func.func @transform_3(%arg0: i32) -> (i32, i32) {
    %c0_i32 = arith.constant 0 : i32
    %c0_i32_0 = arith.constant 0 : i32
    return %arg0, %c0_i32 : i32, i32
  }
}

module attributes {stable_mosaic.version = 11 : i64} {
  func.func @_bmm_kernel(%arg0: i32, %arg1: i32, %arg2: i32, %arg3: i32, %arg4: memref<1x256x256xbf16, #tpu.memory_space<vmem>>, %arg5: memref<1x256x128xbf16, #tpu.memory_space<vmem>>, %arg6: memref<1x256x128xf32, #tpu.memory_space<vmem>>, %arg7: memref<256x128xf32, #tpu.memory_space<vmem>>) attributes {dimension_semantics = [#tpu.dimension_semantics<parallel>, #tpu.dimension_semantics<parallel>, #tpu.dimension_semantics<parallel>, #tpu.dimension_semantics<arbitrary>], iteration_bounds = array<i64: 4, 8, 1, 1>, scalar_prefetch = 0 : i64, scratch_operands = 1 : i64, tpu.core_type = #tpu.core_type<tc>, window_params = [{transform_indices = @transform_0, window_bounds = array<i64: 1, 256, 256>}, {transform_indices = @transform_1, window_bounds = array<i64: 1, 256, 128>}, {transform_indices = @transform_2, window_bounds = array<i64: 1, 256, 128>}]} {
    %c0_i32 = arith.constant 0 : i32
    %0 = arith.cmpi eq, %arg3, %c0_i32 : i32
    %1 = arith.extui %0 : i1 to i32
    %c0_i32_0 = arith.constant 0 : i32
    %2 = arith.cmpi ne, %1, %c0_i32_0 : i32
    scf.if %2 {
      %cst_12 = arith.constant 0.000000e+00 : f32
      %14 = vector.broadcast %cst_12 : f32 to vector<256x128xf32>
      %c0_13 = arith.constant 0 : index
      %c0_14 = arith.constant 0 : index
      %15 = vector.load %arg7[%c0_13, %c0_14] : memref<256x128xf32, #tpu.memory_space<vmem>>, vector<256x128xf32>
      tpu.vector_store %arg7[%c0_13, %c0_14], %14 {strides = array<i32>} : memref<256x128xf32, #tpu.memory_space<vmem>>, vector<256x128xf32>,
    } else {
    }
    %c0 = arith.constant 0 : index
    %c0_1 = arith.constant 0 : index
    %3 = vector.load %arg7[%c0, %c0_1] : memref<256x128xf32, #tpu.memory_space<vmem>>, vector<256x128xf32>
    %c0_2 = arith.constant 0 : index
    %c0_3 = arith.constant 0 : index
    %c0_4 = arith.constant 0 : index
    %4 = vector.load %arg4[%c0_2, %c0_3, %c0_4] : memref<1x256x256xbf16, #tpu.memory_space<vmem>>, vector<1x256x256xbf16>
    %5 = vector.shape_cast %4 : vector<1x256x256xbf16> to vector<256x256xbf16>
    %c0_5 = arith.constant 0 : index
    %c0_6 = arith.constant 0 : index
    %c0_7 = arith.constant 0 : index
    %6 = vector.load %arg5[%c0_5, %c0_6, %c0_7] : memref<1x256x128xbf16, #tpu.memory_space<vmem>>, vector<1x256x128xbf16>
    %7 = vector.shape_cast %6 : vector<1x256x128xbf16> to vector<256x128xbf16>
    %cst = arith.constant dense<0.000000e+00> : vector<256x128xf32>
    %8 = tpu.matmul %5, %7, %cst {dimension_numbers = #tpu.dot_dimension_numbers<[1], [0], [0], [1], [0, 0, 1, 1], [], []>} : vector<256x256xbf16>, vector<256x128xbf16>, vector<256x128xf32> -> vector<256x128xf32>
    %9 = arith.addf %3, %8 : vector<256x128xf32>
    %c0_8 = arith.constant 0 : index
    %c0_9 = arith.constant 0 : index
    %10 = vector.load %arg7[%c0_8, %c0_9] : memref<256x128xf32, #tpu.memory_space<vmem>>, vector<256x128xf32>
    tpu.vector_store %arg7[%c0_8, %c0_9], %9 {strides = array<i32>} : memref<256x128xf32, #tpu.memory_space<vmem>>, vector<256x128xf32>,
    %c0_i32_10 = arith.constant 0 : i32
    %11 = arith.cmpi eq, %arg3, %c0_i32_10 : i32
    %12 = arith.extui %11 : i1 to i32
    %c0_i32_11 = arith.constant 0 : i32
    %13 = arith.cmpi ne, %12, %c0_i32_11 : i32
    scf.if %13 {
      %c0_12 = arith.constant 0 : index
      %c0_13 = arith.constant 0 : index
      %14 = vector.load %arg7[%c0_12, %c0_13] : memref<256x128xf32, #tpu.memory_space<vmem>>, vector<256x128xf32>
      %15 = math.tanh %14 : vector<256x128xf32>
      %c0_14 = arith.constant 0 : index
      %c0_15 = arith.constant 0 : index
      %c0_16 = arith.constant 0 : index
      %16 = vector.load %arg6[%c0_14, %c0_15, %c0_16] : memref<1x256x128xf32, #tpu.memory_space<vmem>>, vector<1x256x128xf32>
      %17 = vector.shape_cast %16 : vector<1x256x128xf32> to vector<256x128xf32>
      %18 = vector.shape_cast %15 : vector<256x128xf32> to vector<1x256x128xf32>
      tpu.vector_store %arg6[%c0_14, %c0_15, %c0_16], %18 {strides = array<i32>} : memref<1x256x128xf32, #tpu.memory_space<vmem>>, vector<1x256x128xf32>,
    } else {
    }
    return
  }
  func.func @transform_0(%arg0: i32, %arg1: i32, %arg2: i32, %arg3: i32) -> (i32, i32, i32) {
    %c0_i32 = arith.constant 0 : i32
    return %arg0, %arg1, %arg3 : i32, i32, i32
  }
  func.func @transform_1(%arg0: i32, %arg1: i32, %arg2: i32, %arg3: i32) -> (i32, i32, i32) {
    %c0_i32 = arith.constant 0 : i32
    return %arg0, %arg3, %arg2 : i32, i32, i32
  }
  func.func @transform_2(%arg0: i32, %arg1: i32, %arg2: i32, %arg3: i32) -> (i32, i32, i32) {
    %c0_i32 = arith.constant 0 : i32
    return %arg0, %arg1, %arg2 : i32, i32, i32
  }
}

</mosaic_0001>

<bundles_post_ra>
// kernel: generator_forward.8
= control target key start
LH: loop header
LB: loop body
LE: loop exit
PB: predicated region body
PF: predicated region fallthrough
CT: control target
= control target key end

     0   :  { %v32_v0 = vlaneseq  ;;  %s308_s1 = inlined_call_operand.vmem [shape: f32[1,512], index: 1, kind: input, shape index: {}]   ;;  %s309_s2 = inlined_call_operand.vmem [shape: f32[1,512], index: 2, kind: input, shape index: {}]   ;;  %s310_s0 = inlined_call_operand.vmem [shape: f32[32,512], index: 0, kind: input, shape index: {}]   ;;  %s311_s3 = inlined_call_operand.vmem [shape: bf16[32,512], index: 3, kind: output, shape index: {}]  }
   0x1   :  { %v30_v2 = vld [vmem:[%s308_s1] sm:$0xf]  ;;  %v15_v5 = vld [vmem:[%s310_s0 + $0x8] sm:$0xff]  ;;  %v16_v10 = vld [vmem:[%s310_s0 + $0x10] sm:$0xff] }
   0x2   :  { %v33_v1 = vshrl.u32 %v32_v0, 7  ;;  %v68_v3 = vld [vmem:[%s309_s2] sm:$0xf]  ;;  %v19_v12 = vld [vmem:[%s310_s0 + $0x28] sm:$0xff]  ;;  %v17_v17 = vld [vmem:[%s310_s0 + $0x18] sm:$0xff] }
   0x3   :  { %v14_v4 = vld [vmem:[%s310_s0] sm:$0xff]  ;;  %v20_v18 = vld [vmem:[%s310_s0 + $0x30] sm:$0xff]  ;;  %v21_v19 = vld [vmem:[%s310_s0 + $0x38] sm:$0xff] }
   0x4   :  { %v34_v6 = vsub.s32 0, %v33_v1  ;;  %v38_v7 = vsub.s32 1, %v33_v1  ;;  %v42_v8 = vsub.s32 2, %v33_v1  ;;  %v46_v9 = vsub.s32 3, %v33_v1  ;;  %v18_v11 = vld [vmem:[%s310_s0 + $0x20] sm:$0xff]  ;;  %v23_v41 = vld [vmem:[%s310_s0 + $0x48] sm:$0xff] }
   0x5   :  { %v22_v40 = vld [vmem:[%s310_s0 + $0x40] sm:$0xff]  ;;  %v24_v46 = vld [vmem:[%s310_s0 + $0x50] sm:$0xff]  ;;  %v25_v47 = vld [vmem:[%s310_s0 + $0x58] sm:$0xff] }
   0x6   :  { %v35_v13 = vrot.slane %v30_v2, %v34_v6  ;;  %v39_v14 = vrot.slane %v30_v2, %v38_v7  ;;  %v239_v15 = vrot.slane %v68_v3, %v34_v6  ;;  %v241_v16 = vrot.slane %v68_v3, %v38_v7  ;;  %v26_v52 = vld [vmem:[%s310_s0 + $0x60] sm:$0xff]  ;;  %v27_v53 = vld [vmem:[%s310_s0 + $0x68] sm:$0xff]  ;;  %v28_v58 = vld [vmem:[%s310_s0 + $0x70] sm:$0xff] }
   0x7   :  { %v43_v20 = vrot.slane %v30_v2, %v42_v8  ;;  %v47_v21 = vrot.slane %v30_v2, %v46_v9  ;;  %v81_v22 = vrot.slane %v68_v3, %v42_v8  ;;  %v85_v23 = vrot.slane %v68_v3, %v46_v9  ;;  %v29_v59 = vld [vmem:[%s310_s0 + $0x78] sm:$0xff] }
   0x8   :  { %v52_v24 = vmul.f32 %v35_v13, %v14_v4  ;;  %v53_v25 = vmul.f32 %v39_v14, %v15_v5  ;;  %v56_v26 = vmul.f32 %v35_v13, %v18_v11  ;;  %v57_v27 = vmul.f32 %v39_v14, %v19_v12 }
   0x9   :  { %v54_v28 = vmul.f32 %v43_v20, %v16_v10  ;;  %v55_v29 = vmul.f32 %v47_v21, %v17_v17  ;;  %v58_v30 = vmul.f32 %v43_v20, %v20_v18  ;;  %v59_v31 = vmul.f32 %v47_v21, %v21_v19 }
   0xa   :  { %v90_v32 = vadd.f32 %v239_v15, %v52_v24  ;;  %v91_v33 = vadd.f32 %v241_v16, %v53_v25  ;;  %v94_v34 = vadd.f32 %v239_v15, %v56_v26  ;;  %v95_v35 = vadd.f32 %v241_v16, %v57_v27 }
   0xb   :  { %v92_v36 = vadd.f32 %v81_v22, %v54_v28  ;;  %v93_v37 = vadd.f32 %v85_v23, %v55_v29  ;;  %v96_v38 = vadd.f32 %v81_v22, %v58_v30  ;;  %v97_v39 = vadd.f32 %v85_v23, %v59_v31 }
   0xc   :  { %v106_v42 = vmax.f32 %v90_v32, 0.0  ;;  %v107_v43 = vmax.f32 %v91_v33, 0.0  ;;  %v110_v44 = vmax.f32 %v94_v34, 0.0  ;;  %v111_v45 = vmax.f32 %v95_v35, 0.0 }
   0xd   :  { %v108_v48 = vmax.f32 %v92_v36, 0.0  ;;  %v109_v49 = vmax.f32 %v93_v37, 0.0  ;;  %v112_v50 = vmax.f32 %v96_v38, 0.0  ;;  %v113_v51 = vmax.f32 %v97_v39, 0.0 }
   0xe   :  { %v190_v54 = vpack.c.bf16 %v107_v43, %v106_v42  ;;  %v192_v55 = vpack.c.bf16 %v111_v45, %v110_v44  ;;  %v60_v56 = vmul.f32 %v35_v13, %v22_v40  ;;  %v61_v57 = vmul.f32 %v39_v14, %v23_v41 }
   0xf   :  { %v191_v60 = vpack.c.bf16 %v109_v49, %v108_v48  ;;  %v193_v61 = vpack.c.bf16 %v113_v51, %v112_v50  ;;  %v62_v62 = vmul.f32 %v43_v20, %v24_v46  ;;  %v63_v63 = vmul.f32 %v47_v21, %v25_v47 }
  0x10   :  { %170 = vst [vmem:[%s311_s3] sm:$0xff] %v190_v54  ;;  %172 = vst [vmem:[%s311_s3 + $0x10] sm:$0xff] %v192_v55  ;;  %v98_v0 = vadd.f32 %v239_v15, %v60_v56  ;;  %v99_v1 = vadd.f32 %v241_v16, %v61_v57  ;;  %v64_v2 = vmul.f32 %v35_v13, %v26_v52 }
  0x11   :  { %v65_v3 = vmul.f32 %v39_v14, %v27_v53  ;;  %171 = vst [vmem:[%s311_s3 + $0x8] sm:$0xff] %v191_v60  ;;  %173 = vst [vmem:[%s311_s3 + $0x18] sm:$0xff] %v193_v61  ;;  %v100_v4 = vadd.f32 %v81_v22, %v62_v62  ;;  %v101_v5 = vadd.f32 %v85_v23, %v63_v63 }
  0x12   :  { %v66_v6 = vmul.f32 %v43_v20, %v28_v58  ;;  %v67_v7 = vmul.f32 %v47_v21, %v29_v59  ;;  %v114_v8 = vmax.f32 %v98_v0, 0.0  ;;  %v115_v9 = vmax.f32 %v99_v1, 0.0 }
  0x13   :  { %v102_v10 = vadd.f32 %v239_v15, %v64_v2  ;;  %v103_v11 = vadd.f32 %v241_v16, %v65_v3  ;;  %v116_v12 = vmax.f32 %v100_v4, 0.0  ;;  %v117_v13 = vmax.f32 %v101_v5, 0.0 }
  0x14   :  { %v104_v14 = vadd.f32 %v81_v22, %v66_v6  ;;  %v105_v17 = vadd.f32 %v85_v23, %v67_v7  ;;  %v194_v18 = vpack.c.bf16 %v115_v9, %v114_v8 }
  0x15   :  { %v118_v19 = vmax.f32 %v102_v10, 0.0  ;;  %v119_v24 = vmax.f32 %v103_v11, 0.0  ;;  %v195_v25 = vpack.c.bf16 %v117_v13, %v116_v12 }
  0x16   :  { %v120_v26 = vmax.f32 %v104_v14, 0.0  ;;  %v121_v27 = vmax.f32 %v105_v17, 0.0  ;;  %174 = vst [vmem:[%s311_s3 + $0x20] sm:$0xff] %v194_v18 }
  0x17   :  { %v196_v20 = vpack.c.bf16 %v119_v24, %v118_v19  ;;  %175 = vst [vmem:[%s311_s3 + $0x28] sm:$0xff] %v195_v25 }
  0x18   :  { %v197_v15 = vpack.c.bf16 %v121_v27, %v120_v26 }
  0x19   :  { %176 = vst [vmem:[%s311_s3 + $0x30] sm:$0xff] %v196_v20 }
  0x1a   :  { %177 = vst [vmem:[%s311_s3 + $0x38] sm:$0xff] %v197_v15 }

// kernel: generator_forward.9
= control target key start
LH: loop header
LB: loop body
LE: loop exit
PB: predicated region body
PF: predicated region fallthrough
CT: control target
= control target key end

     0   :  { %s1900_s0 = inlined_call_operand.vmem [shape: bf16[4,32,2048], index: 0, kind: input, shape index: {}]   ;;  %s1901_s1 = inlined_call_operand.vmem [shape: bf16[4,2048,256], index: 1, kind: input, shape index: {}]   ;;  %s1902_s2 = inlined_call_operand.vmem [shape: f32[4,32,256], index: 2, kind: output, shape index: {0}]   ;;  %s1903_s3 = inlined_call_operand.vmem [shape: f32[4,1,1,256], index: 3, kind: output, shape index: {1}]   ;;  %s1904_s4 = inlined_call_operand.vmem [shape: f32[4,1,1,256], index: 4, kind: output, shape index: {2}]  }
   0x1   :  { %1906 = sst [smem:[#allocation5_spill]] %s1900_s0 }
   0x2   :  { %s1707_s15 = smov 0   ;;  %s1709_s16 = smov 0  }
   0x3   :  { %s1711_s17 = smov 0   ;;  %s1713_s18 = smov 0  }
   0x4   :  { %s1715_s19 = smov 0   ;;  %s1717_s20 = smov 0  }
   0x5   :  { %s1719_s21 = smov 0  }
   0x6 LB: > { %s30_s22 = sadd.s32 1, %s1670_s19  ;;  %s41_s23 = sadd.s32 1, %s1674_s20  ;;  %s1678_s21 = sphi %s1719_s21, %s15_s21   ;;  %s1674_s20 = sphi %s1717_s20, %s1915_s20   ;;  %s1670_s19 = sphi %s1715_s19, %s1914_s19   ;;  %s1666_s18 = sphi %s1713_s18, %s1913_s18   ;;  %s1662_s17 = sphi %s1711_s17, %s1912_s17   ;;  %s1658_s16 = sphi %s1709_s16, %s1911_s16   ;;  %s1654_s15 = sphi %s1707_s15, %s1910_s15  }
   0x7   : > { %p31_p0 = scmp.ge.s32.totalorder %s30_s22, 4  ;;  %p59_p1 = scmp.ne.s32.totalorder %s1658_s16, %s1654_s15 }
   0x8   : > { %p60_p2 = scmp.eq.s32.totalorder %s1678_s21, 0  ;;  %s52_s27 = sadd.s32 1, %s1658_s16 }
   0x9   : > { %s1917_s22 = smov (%p31_p0, %s30_s22), 0  ;;  %s1919_s23 = smov (!%p31_p0, %s41_s23), %s1674_s20 }
   0xa   : > { %p61_p3 = por %p60_p2, %p59_p1  ;;  %p43_p4 = scmp.ge.s32.totalorder %s1919_s23, 4 }
   0xb   : > { %s48_s24 = ssub.s32 %s1670_s19, %s1917_s22  ;;  %p1358_p6 = scmp.ge.s32.totalorder %s1678_s21, 16 }
   0xc   : > { %s1921_s23 = smov (%p43_p4, %s1919_s23), 0 }
   0xd   : > { %1907 = sst [smem:[#allocation4_spill]] %s1921_s23  ;;  %s45_s25 = ssub.s32 %s1674_s20, %s1921_s23 }
   0xe   : > { %s49_s26 = sor.u32 %s48_s24, %s45_s25  ;;  %205 = sbr.rel (%p1358_p6) target bundleno = 35 (0x23), region = 16 }
   0xf   : > { %p50_p5 = scmp.eq.s32.totalorder %s49_s26, 0 }
  0x11   : > { %s1758_s28 = scalar_select %p50_p5, %s1658_s16, %s52_s27  }
  0x15   : > { %208 = sbr.rel (!%p61_p3) target bundleno = 35 (0x23), region = 20  ;;  %s210_s29 = sand.u32 (%p61_p3), 1, %s1658_s16  }
  0x16   : > { %s1360_s30 = sshll.u32 (%p61_p3), %s1670_s19, 2  ;;  %s1359_s5 = sshll.u32 (%p61_p3), %s210_s29, 6 }
  0x17   : > { %s1361_s6 = sshll.u32 (%p61_p3), %s1674_s20, 6  ;;  %s1908_s0 = sld [smem:[#allocation5_spill]] (%p61_p3) }
  0x18   : > { %s218_s7 = sadd.s32 (%p61_p3), %s1361_s6, %s1360_s30  ;;  %s212_s12 = scalar_lea.vmem (%p61_p3), [#allocation3], %s1359_s5 }
  0x19   : > { %s1362_s8 = sshll.u32 (%p61_p3), %s218_s7, 2 }
  0x1d   : > { %s220_s11 = scalar_lea.vmem %s1908_s0, %s1362_s8 }
  0x1e   : > { %v233_v0 = vld [vmem:[%s220_s11] sm:$0xff]  ;;  %v235_v1 = vld [vmem:[%s220_s11 + $0x8] sm:$0xff] }
  0x1f   : > { %v237_v2 = vld [vmem:[%s220_s11 + $0x40] sm:$0xff]  ;;  %234 = vst [vmem:[%s212_s12] sm:$0xff] %v233_v0  ;;  %236 = vst [vmem:[%s212_s12 + $0x8] sm:$0xff] %v235_v1  ;;  %v239_v3 = vld [vmem:[%s220_s11 + $0x48] sm:$0xff] }
  0x20   : > { %238 = vst [vmem:[%s212_s12 + $0x10] sm:$0xff] %v237_v2  ;;  %v241_v4 = vld [vmem:[%s220_s11 + $0x80] sm:$0xff]  ;;  %v243_v5 = vld [vmem:[%s220_s11 + $0x88] sm:$0xff]  ;;  %240 = vst [vmem:[%s212_s12 + $0x18] sm:$0xff] %v239_v3 }
  0x21   : > { %242 = vst [vmem:[%s212_s12 + $0x20] sm:$0xff] %v241_v4  ;;  %244 = vst [vmem:[%s212_s12 + $0x28] sm:$0xff] %v243_v5  ;;  %v245_v6 = vld [vmem:[%s220_s11 + $0xc0] sm:$0xff]  ;;  %v247_v7 = vld [vmem:[%s220_s11 + $0xc8] sm:$0xff] }
  0x22   : > { %246 = vst [vmem:[%s212_s12 + $0x30] sm:$0xff] %v245_v6  ;;  %248 = vst [vmem:[%s212_s12 + $0x38] sm:$0xff] %v247_v7 }
  0x23 PF: > { %p1363_p7 = scmp.ge.s32.totalorder %s1678_s21, 1  ;;  %p272_p8 = scmp.lt.s32.totalorder %s1678_s21, 17 }
  0x25   : > { %p273_p9 = pnand %p1363_p7, %p272_p8 }
  0x26   : > { %s279_s13 = sand.u32 (!%p273_p9), 1, %s1654_s15   ;;  %s1365_s14 = sshll.u32 (!%p273_p9), %s1662_s17, 6 }
  0x27   : > { %276 = sbr.rel (%p273_p9) target bundleno = 383 (0x17f), region = 47  ;;  %s1364_s24 = sshll.u32 (!%p273_p9), %s279_s13, 6 }
  0x28   : > { %p355_p10 = scmp.lt.s32.totalorder (!%p273_p9), %s1666_s18, 3  ;;  %p357_p11 = scmp.lt.s32.totalorder (!%p273_p9), %s1365_s14, 255 }
  0x29   : > { %p1373_p12 = scmp.ne.s32.totalorder (!%p273_p9), %s1662_s17, 0 }
  0x2e   : > { %s1923_s18 = smov (!%p355_p10, %s1666_s18), 3  ;;  %s1925_s14 = smov (!%p357_p11, %s1365_s14), 255 }
  0x2f   : > { %s1367_s25 = sshll.u32 %s1923_s18, 9  ;;  %s1449_s26 = sshll.u32 %s1923_s18, 6  ;;  %v1680_v8 = vmov (!%p1373_p12), 0.0  }
  0x30   : > { %s1366_s27 = sshll.u32 %s1925_s14, 1  ;;  %s1776_s5 = scalar_lea.vmem %s1902_s2, %s1449_s26  ;;  %415 = vst [vmem:[#allocation2] sm:$0xff] (!%p1373_p12), %v1680_v8  ;;  %416 = vst [vmem:[#allocation2 + $0x8] sm:$0xff] (!%p1373_p12), %v1680_v8 }
  0x31   : > { %s364_s6 = sadd.s32 %s1367_s25, %s1366_s27  ;;  %s1371_s7 = sshll.u32 %s1923_s18, 1  ;;  %417 = vst [vmem:[#allocation2 + $0x10] sm:$0xff] (!%p1373_p12), %v1680_v8  ;;  %418 = vst [vmem:[#allocation2 + $0x18] sm:$0xff] (!%p1373_p12), %v1680_v8 }
  0x32   : > { %s1368_s8 = sshll.u32 %s364_s6, 2  ;;  %s1781_s15 = scalar_lea.vmem %s1903_s3, %s1371_s7  ;;  %419 = vst [vmem:[#allocation2 + $0x20] sm:$0xff] (!%p1373_p12), %v1680_v8  ;;  %420 = vst [vmem:[#allocation2 + $0x28] sm:$0xff] (!%p1373_p12), %v1680_v8 }
  0x33   : > { %s1786_s13 = scalar_lea.vmem %s1901_s1, %s1368_s8  ;;  %s1791_s23 = scalar_lea.vmem %s1904_s4, %s1371_s7  ;;  %421 = vst [vmem:[#allocation2 + $0x30] sm:$0xff] (!%p1373_p12), %v1680_v8  ;;  %422 = vst [vmem:[#allocation2 + $0x38] sm:$0xff] (!%p1373_p12), %v1680_v8 }
  0x34   : > { %s1793_s26 = scalar_lea.vmem [#allocation3], %s1364_s24  ;;  %414 = sbr.rel (%p1373_p12) target bundleno = 59 (0x3b), region = 55 }
  0x3b PF: > { %v1516_v9 = vld [vmem:[%s1786_s13 + $0x4] ss:$8 sps:$4 sm:$0xff]   ;;  %v1520_v11 = vld [vmem:[%s1786_s13] ss:$8 sps:$4 sm:$0xff]   ;;  %v1522_v13 = vld [vmem:[%s1786_s13 + $0x14] ss:$8 sps:$4 sm:$0xff]  }
  0x3c   : > { %v1518_v10 = vld [vmem:[%s1786_s13 + $0x104] ss:$8 sps:$4 sm:$0xff]   ;;  %863 = vmatprep.subr.bf16.mxu1 %v1516_v9  ;;  %v1521_v12 = vld [vmem:[%s1786_s13 + $0x100] ss:$8 sps:$4 sm:$0xff]   ;;  %v1524_v14 = vld [vmem:[%s1786_s13 + $0x114] ss:$8 sps:$4 sm:$0xff]  }
  0x3d   : > { %916 = vmatprep.subr.bf16.mxu0 %v1518_v10  ;;  %864 = vmatpush1.bf16.msra.mxu1 %v1520_v11  ;;  %v1526_v15 = vld [vmem:[%s1786_s13 + $0x10] ss:$8 sps:$4 sm:$0xff]   ;;  %v1528_v17 = vld [vmem:[%s1786_s13 + $0x24] ss:$8 sps:$4 sm:$0xff]   ;;  %v1532_v19 = vld [vmem:[%s1786_s13 + $0x20] ss:$8 sps:$4 sm:$0xff]  }
  0x3e   : > { %917 = vmatpush1.bf16.msra.mxu0 %v1521_v12  ;;  %865 = vmatprep.subr.bf16.mxu1 %v1522_v13  ;;  %v1527_v16 = vld [vmem:[%s1786_s13 + $0x110] ss:$8 sps:$4 sm:$0xff]   ;;  %v1530_v18 = vld [vmem:[%s1786_s13 + $0x124] ss:$8 sps:$4 sm:$0xff]   ;;  %v1533_v20 = vld [vmem:[%s1786_s13 + $0x120] ss:$8 sps:$4 sm:$0xff]  }
  0x3f   : > { %918 = vmatprep.subr.bf16.mxu0 %v1524_v14  ;;  %v1534_v21 = vld [vmem:[%s1786_s13 + $0x34] ss:$8 sps:$4 sm:$0xff]   ;;  %v1538_v23 = vld [vmem:[%s1786_s13 + $0x30] ss:$8 sps:$4 sm:$0xff]   ;;  %v1540_v25 = vld [vmem:[%s1786_s13 + $0x44] ss:$8 sps:$4 sm:$0xff]  }
  0x40   : > { %v1536_v22 = vld [vmem:[%s1786_s13 + $0x134] ss:$8 sps:$4 sm:$0xff]   ;;  %v1539_v24 = vld [vmem:[%s1786_s13 + $0x130] ss:$8 sps:$4 sm:$0xff]   ;;  %v1542_v26 = vld [vmem:[%s1786_s13 + $0x144] ss:$8 sps:$4 sm:$0xff]  }
  0x41   : > { %866 = vmatpush1.bf16.msra.mxu1 %v1526_v15  ;;  %v1544_v27 = vld [vmem:[%s1786_s13 + $0x40] ss:$8 sps:$4 sm:$0xff]   ;;  %v1546_v29 = vld [vmem:[%s1786_s13 + $0x54] ss:$8 sps:$4 sm:$0xff]   ;;  %v1550_v31 = vld [vmem:[%s1786_s13 + $0x50] ss:$8 sps:$4 sm:$0xff]  }
  0x42   : > { %919 = vmatpush1.bf16.msra.mxu0 %v1527_v16  ;;  %867 = vmatprep.subr.bf16.mxu1 %v1528_v17  ;;  %v1545_v28 = vld [vmem:[%s1786_s13 + $0x140] ss:$8 sps:$4 sm:$0xff]   ;;  %v1548_v30 = vld [vmem:[%s1786_s13 + $0x154] ss:$8 sps:$4 sm:$0xff]   ;;  %v1551_v32 = vld [vmem:[%s1786_s13 + $0x150] ss:$8 sps:$4 sm:$0xff]  }
  0x43   : > { %920 = vmatprep.subr.bf16.mxu0 %v1530_v18  ;;  %v1552_v33 = vld [vmem:[%s1786_s13 + $0x64] ss:$8 sps:$4 sm:$0xff]   ;;  %v1556_v35 = vld [vmem:[%s1786_s13 + $0x60] ss:$8 sps:$4 sm:$0xff]   ;;  %v1558_v37 = vld [vmem:[%s1786_s13 + $0x74] ss:$8 sps:$4 sm:$0xff]  }
  0x44   : > { %v1554_v34 = vld [vmem:[%s1786_s13 + $0x164] ss:$8 sps:$4 sm:$0xff]   ;;  %v1557_v36 = vld [vmem:[%s1786_s13 + $0x160] ss:$8 sps:$4 sm:$0xff]   ;;  %v1560_v38 = vld [vmem:[%s1786_s13 + $0x174] ss:$8 sps:$4 sm:$0xff]  }
  0x45   : > { %868 = vmatpush1.bf16.msra.mxu1 %v1532_v19  ;;  %v1562_v39 = vld [vmem:[%s1786_s13 + $0x70] ss:$8 sps:$4 sm:$0xff]   ;;  %v1564_v41 = vld [vmem:[%s1786_s13 + $0x84] ss:$8 sps:$4 sm:$0xff]   ;;  %v1568_v43 = vld [vmem:[%s1786_s13 + $0x80] ss:$8 sps:$4 sm:$0xff]  }
  0x46   : > { %921 = vmatpush1.bf16.msra.mxu0 %v1533_v20  ;;  %869 = vmatprep.subr.bf16.mxu1 %v1534_v21  ;;  %v1563_v40 = vld [vmem:[%s1786_s13 + $0x170] ss:$8 sps:$4 sm:$0xff]   ;;  %v1566_v42 = vld [vmem:[%s1786_s13 + $0x184] ss:$8 sps:$4 sm:$0xff]   ;;  %v1569_v44 = vld [vmem:[%s1786_s13 + $0x180] ss:$8 sps:$4 sm:$0xff]  }
  0x47   : > { %922 = vmatprep.subr.bf16.mxu0 %v1536_v22  ;;  %v1570_v45 = vld [vmem:[%s1786_s13 + $0x94] ss:$8 sps:$4 sm:$0xff]   ;;  %v1574_v47 = vld [vmem:[%s1786_s13 + $0x90] ss:$8 sps:$4 sm:$0xff]   ;;  %v1576_v49 = vld [vmem:[%s1786_s13 + $0xa4] ss:$8 sps:$4 sm:$0xff]  }
  0x48   : > { %v1572_v46 = vld [vmem:[%s1786_s13 + $0x194] ss:$8 sps:$4 sm:$0xff]   ;;  %v1575_v48 = vld [vmem:[%s1786_s13 + $0x190] ss:$8 sps:$4 sm:$0xff]   ;;  %v1578_v50 = vld [vmem:[%s1786_s13 + $0x1a4] ss:$8 sps:$4 sm:$0xff]  }
  0x49   : > { %870 = vmatpush1.bf16.msra.mxu1 %v1538_v23  ;;  %v1580_v51 = vld [vmem:[%s1786_s13 + $0xa0] ss:$8 sps:$4 sm:$0xff]   ;;  %v1582_v53 = vld [vmem:[%s1786_s13 + $0xb4] ss:$8 sps:$4 sm:$0xff]   ;;  %v1586_v55 = vld [vmem:[%s1786_s13 + $0xb0] ss:$8 sps:$4 sm:$0xff]  }
  0x4a   : > { %923 = vmatpush1.bf16.msra.mxu0 %v1539_v24  ;;  %871 = vmatprep.subr.bf16.mxu1 %v1540_v25  ;;  %v1581_v52 = vld [vmem:[%s1786_s13 + $0x1a0] ss:$8 sps:$4 sm:$0xff]   ;;  %v1584_v54 = vld [vmem:[%s1786_s13 + $0x1b4] ss:$8 sps:$4 sm:$0xff]   ;;  %v1587_v56 = vld [vmem:[%s1786_s13 + $0x1b0] ss:$8 sps:$4 sm:$0xff]  }
  0x4b   : > { %924 = vmatprep.subr.bf16.mxu0 %v1542_v26  ;;  %v1588_v57 = vld [vmem:[%s1786_s13 + $0xc4] ss:$8 sps:$4 sm:$0xff]   ;;  %v1592_v61 = vld [vmem:[%s1786_s13 + $0xc0] ss:$8 sps:$4 sm:$0xff]   ;;  %v1594_v63 = vld [vmem:[%s1786_s13 + $0xd4] ss:$8 sps:$4 sm:$0xff]  }
  0x4c   : > { %v1614_v58 = vld [vmem:[%s1793_s26 + $0x4] ss:$16 sps:$4 sm:$0xff]   ;;  %v1617_v60 = vld [vmem:[%s1793_s26 + $0xc] ss:$16 sps:$4 sm:$0xff]   ;;  %v1593_v62 = vld [vmem:[%s1786_s13 + $0x1c0] ss:$8 sps:$4 sm:$0xff]  }
  0x4d   : > { %872 = vmatpush1.bf16.msra.mxu1 %v1544_v27  ;;  %v1590_v59 = vld [vmem:[%s1786_s13 + $0x1c4] ss:$8 sps:$4 sm:$0xff]   ;;  %895 = vmatprep.mubr.bf16.mxu1 %v1614_v58  ;;  %v1596_v0 = vld [vmem:[%s1786_s13 + $0x1d4] ss:$8 sps:$4 sm:$0xff]   ;;  %v1598_v1 = vld [vmem:[%s1786_s13 + $0xd0] ss:$8 sps:$4 sm:$0xff]  }
  0x4e   : > { %925 = vmatpush1.bf16.msra.mxu0 %v1545_v28  ;;  %873 = vmatprep.subr.bf16.mxu1 %v1546_v29  ;;  %v1599_v2 = vld [vmem:[%s1786_s13 + $0x1d0] ss:$8 sps:$4 sm:$0xff]   ;;  %v1600_v3 = vld [vmem:[%s1786_s13 + $0xe4] ss:$8 sps:$4 sm:$0xff]   ;;  %v1604_v5 = vld [vmem:[%s1786_s13 + $0xe0] ss:$8 sps:$4 sm:$0xff]  }
  0x4f   : > { %926 = vmatprep.subr.bf16.mxu0 %v1548_v30  ;;  %948 = vmatprep.mubr.bf16.mxu0 %v1617_v60  ;;  %v1602_v4 = vld [vmem:[%s1786_s13 + $0x1e4] ss:$8 sps:$4 sm:$0xff]   ;;  %v1605_v6 = vld [vmem:[%s1786_s13 + $0x1e0] ss:$8 sps:$4 sm:$0xff]   ;;  %v1606_v7 = vld [vmem:[%s1786_s13 + $0xf4] ss:$8 sps:$4 sm:$0xff]  }
  0x50   : > { %v1608_v8 = vld [vmem:[%s1786_s13 + $0x1f4] ss:$8 sps:$4 sm:$0xff]   ;;  %v1610_v9 = vld [vmem:[%s1786_s13 + $0xf0] ss:$8 sps:$4 sm:$0xff]   ;;  %v423_v18 = vld [vmem:[#allocation2] sm:$0xff]  ;;  %p1446_p13 = scmp.ne.s32.totalorder %s1662_s17, 3 }
  0x51   : > { %874 = vmatpush1.bf16.msra.mxu1 %v1550_v31  ;;  %v1611_v10 = vld [vmem:[%s1786_s13 + $0x1f0] ss:$8 sps:$4 sm:$0xff]   ;;  %v1618_v13 = vld [vmem:[%s1793_s26 + $0x24] ss:$16 sps:$4 sm:$0xff]   ;;  %v1620_v14 = vld [vmem:[%s1793_s26 + $0x2c] ss:$16 sps:$4 sm:$0xff]  }
  0x52   : > { %927 = vmatpush1.bf16.msra.mxu0 %v1551_v32  ;;  %875 = vmatprep.subr.bf16.mxu1 %v1552_v33  ;;  %v1612_v11 = vld [vmem:[%s1793_s26] ss:$16 sps:$4 sm:$0xff]   ;;  %v1615_v12 = vld [vmem:[%s1793_s26 + $0x8] ss:$16 sps:$4 sm:$0xff]  }
  0x53   : > { %928 = vmatprep.subr.bf16.mxu0 %v1554_v34  ;;  %v1622_v15 = vld [vmem:[%s1793_s26 + $0x20] ss:$16 sps:$4 sm:$0xff]   ;;  %v1623_v16 = vld [vmem:[%s1793_s26 + $0x28] ss:$16 sps:$4 sm:$0xff]  }
  0x54   : > { %v424_v22 = vld [vmem:[#allocation2 + $0x8] sm:$0xff]  ;;  %v425_v26 = vld [vmem:[#allocation2 + $0x10] sm:$0xff]  ;;  %v426_v31 = vld [vmem:[#allocation2 + $0x18] sm:$0xff] }
  0x55   : > { %876 = vmatpush1.bf16.msra.mxu1 %v1556_v35 }
  0x56   : > { %929 = vmatpush1.bf16.msra.mxu0 %v1557_v36  ;;  %877 = vmatprep.subr.bf16.mxu1 %v1558_v37 }
  0x57   : > { %930 = vmatprep.subr.bf16.mxu0 %v1560_v38  ;;  %v427_v38 = vld [vmem:[#allocation2 + $0x20] sm:$0xff] }
  0x59   : > { %878 = vmatpush1.bf16.msra.mxu1 %v1562_v39 }
  0x5a   : > { %931 = vmatpush1.bf16.msra.mxu0 %v1563_v40  ;;  %879 = vmatprep.subr.bf16.mxu1 %v1564_v41 }
  0x5b   : > { %932 = vmatprep.subr.bf16.mxu0 %v1566_v42  ;;  %v428_v42 = vld [vmem:[#allocation2 + $0x28] sm:$0xff] }
  0x5d   : > { %880 = vmatpush1.bf16.msra.mxu1 %v1568_v43 }
  0x5e   : > { %933 = vmatpush1.bf16.msra.mxu0 %v1569_v44  ;;  %881 = vmatprep.subr.bf16.mxu1 %v1570_v45 }
  0x5f   : > { %934 = vmatprep.subr.bf16.mxu0 %v1572_v46  ;;  %v429_v46 = vld [vmem:[#allocation2 + $0x30] sm:$0xff] }
  0x61   : > { %882 = vmatpush1.bf16.msra.mxu1 %v1574_v47 }
  0x62   : > { %935 = vmatpush1.bf16.msra.mxu0 %v1575_v48  ;;  %883 = vmatprep.subr.bf16.mxu1 %v1576_v49 }
  0x63   : > { %936 = vmatprep.subr.bf16.mxu0 %v1578_v50 }
  0x65   : > { %884 = vmatpush1.bf16.msra.mxu1 %v1580_v51  ;;  %v430_v51 = vld [vmem:[#allocation2 + $0x38] sm:$0xff] }
  0x66   : > { %937 = vmatpush1.bf16.msra.mxu0 %v1581_v52  ;;  %885 = vmatprep.subr.bf16.mxu1 %v1582_v53 }
  0x67   : > { %938 = vmatprep.subr.bf16.mxu0 %v1584_v54 }
  0x69   : > { %886 = vmatpush1.bf16.msra.mxu1 %v1586_v55 }
  0x6a   : > { %939 = vmatpush1.bf16.msra.mxu0 %v1587_v56  ;;  %887 = vmatprep.subr.bf16.mxu1 %v1588_v57 }
  0x6b   : > { %940 = vmatprep.subr.bf16.mxu0 %v1590_v59 }
  0x6d   : > { %888 = vmatpush1.bf16.msra.mxu1 %v1592_v61 }
  0x6e   : > { %941 = vmatpush1.bf16.msra.mxu0 %v1593_v62  ;;  %889 = vmatprep.subr.bf16.mxu1 %v1594_v63 }
  0x6f   : > { %942 = vmatprep.subr.bf16.mxu0 %v1596_v0 }
  0x71   : > { %890 = vmatpush1.bf16.msra.mxu1 %v1598_v1 }
  0x72   : > { %943 = vmatpush1.bf16.msra.mxu0 %v1599_v2  ;;  %891 = vmatprep.subr.bf16.mxu1 %v1600_v3 }
  0x73   : > { %944 = vmatprep.subr.bf16.mxu0 %v1602_v4 }
  0x75   : > { %892 = vmatpush1.bf16.msra.mxu1 %v1604_v5 }
  0x76   : > { %945 = vmatpush1.bf16.msra.mxu0 %v1605_v6  ;;  %893 = vmatprep.subr.bf16.mxu1 %v1606_v7 }
  0x77   : > { %946 = vmatprep.subr.bf16.mxu0 %v1608_v8 }
  0x79   : > { %894 = vmatpush1.bf16.msra.mxu1 %v1610_v9 }
  0x7a   : > { %947 = vmatpush1.bf16.msra.mxu0 %v1611_v10 }
  0x7c   : > { %896 = vmatmul.mubr.bf16.vlgmr.msra.gmra.mrb[0].mxu1 %v1612_v11 }
  0x7d   : > { %949 = vmatmul.mubr.bf16.vlgmr.msra.gmra.mrb[0].mxu0 %v1615_v12  ;;  %905 = vmatprep.mubr.bf16.mxu1 %v1618_v13 }
  0x7e   : > { %958 = vmatprep.mubr.bf16.mxu0 %v1620_v14 }
  0x84   : > { %906 = vmatmul.mubr.bf16.gmra.mrb[4].mxu1 %v1622_v15 }
  0x85   : > { %959 = vmatmul.mubr.bf16.gmra.mrb[4].mxu0 %v1623_v16 }
 0x14f   : > { %v897_v17 = vpop.f32.mrb[0].mxu1 }
 0x150   : > { %v950_v19 = vpop.f32.mrb[0].mxu0  ;;  %v899_v21 = vpop.f32.mrb[1].mxu1 }
 0x151   : > { %v951_v20 = vadd.f32 %v950_v19, %v897_v17  ;;  %v952_v23 = vpop.f32.mrb[1].mxu0  ;;  %v901_v25 = vpop.f32.mrb[2].mxu1 }
 0x152   : > { %v953_v24 = vadd.f32 %v952_v23, %v899_v21  ;;  %v954_v27 = vpop.f32.mrb[2].mxu0  ;;  %v903_v30 = vpop.f32.mrb[3].mxu1 }
 0x153   : > { %v969_v28 = vadd.f32 %v951_v20, %v423_v18  ;;  %v955_v29 = vadd.f32 %v954_v27, %v901_v25  ;;  %v956_v32 = vpop.f32.mrb[3].mxu0  ;;  %v1681_v27 = vmov (!%p1446_p13), 1966171168  }
 0x154   : > { %v970_v33 = vadd.f32 %v953_v24, %v424_v22  ;;  %v957_v34 = vadd.f32 %v956_v32, %v903_v30 }
 0x155   : > { %977 = vst [vmem:[#allocation2] sm:$0xff] %v969_v28  ;;  %v971_v35 = vadd.f32 %v955_v29, %v425_v26  ;;  %v1027_v28 = vunpack.c.l.s4 (!%p1446_p13), %v1681_v27  ;;  %v1029_v29 = vlaneseq (!%p1446_p13) }
 0x156   : > { %978 = vst [vmem:[#allocation2 + $0x8] sm:$0xff] %v970_v33  ;;  %v972_v36 = vadd.f32 %v957_v34, %v426_v31 }
 0x157   : > { %979 = vst [vmem:[#allocation2 + $0x10] sm:$0xff] %v971_v35  ;;  %v907_v37 = vpop.f32.mrb[4].mxu1  ;;  %vm1043_vm0 = vcmp.lt.s32.totalorder (!%p1446_p13), %v1029_v29, 256 }
 0x158   : > { %980 = vst [vmem:[#allocation2 + $0x18] sm:$0xff] %v972_v36  ;;  %v960_v39 = vpop.f32.mrb[4].mxu0  ;;  %v909_v41 = vpop.f32.mrb[5].mxu1 }
 0x159   : > { %v961_v40 = vadd.f32 %v960_v39, %v907_v37  ;;  %v962_v43 = vpop.f32.mrb[5].mxu0  ;;  %v911_v45 = vpop.f32.mrb[6].mxu1  ;;  %v1030_v39 = vshrl.u32 (!%p1446_p13), %v1029_v29, 7 }
 0x15a   : > { %v963_v44 = vadd.f32 %v962_v43, %v909_v41  ;;  %v964_v47 = vpop.f32.mrb[6].mxu0  ;;  %v913_v50 = vpop.f32.mrb[7].mxu1  ;;  %988 = sbr.rel (%p1446_p13) target bundleno = 383 (0x17f), region = 59 }
 0x15b   : > { %v973_v48 = vadd.f32 %v961_v40, %v427_v38  ;;  %v965_v49 = vadd.f32 %v964_v47, %v911_v45  ;;  %v966_v52 = vpop.f32.mrb[7].mxu0  ;;  %v1028_v38 = vunpack.c.0.s8 (!%p1446_p13), %v1027_v28 }
 0x15c   : > { %v974_v53 = vadd.f32 %v963_v44, %v428_v42  ;;  %v967_v54 = vadd.f32 %v966_v52, %v913_v50  ;;  %v989_v57 = vld [vmem:[#allocation2] sm:$0xff] (!%p1446_p13) }
 0x15d   : > { %981 = vst [vmem:[#allocation2 + $0x20] sm:$0xff] %v973_v48  ;;  %v975_v55 = vadd.f32 %v965_v49, %v429_v46  ;;  %v990_v58 = vld [vmem:[#allocation2 + $0x8] sm:$0xff] (!%p1446_p13)  ;;  %997 = vst [vmem:[%s1776_s5] sm:$0xff] (!%p1446_p13), %v989_v57  ;;  %v1046_v60 = vmul.f32 (!%p1446_p13), %v989_v57, %v989_v57  ;;  %v1031_v47 = vsub.s32 (!%p1446_p13), %v1028_v38, %v1030_v39 }
 0x15e   : > { %982 = vst [vmem:[#allocation2 + $0x28] sm:$0xff] %v974_v53  ;;  %v976_v56 = vadd.f32 %v967_v54, %v430_v51  ;;  %v991_v59 = vld [vmem:[#allocation2 + $0x10] sm:$0xff] (!%p1446_p13)  ;;  %998 = vst [vmem:[%s1776_s5 + $0x8] sm:$0xff] (!%p1446_p13), %v990_v58  ;;  %v1047_v61 = vmul.f32 (!%p1446_p13), %v990_v58, %v990_v58 }
 0x15f   : > { %983 = vst [vmem:[#allocation2 + $0x30] sm:$0xff] %v975_v55  ;;  %999 = vst [vmem:[%s1776_s5 + $0x10] sm:$0xff] (!%p1446_p13), %v991_v59  ;;  %v1005_v62 = vadd.f32 (!%p1446_p13), %v991_v59, %v989_v57  ;;  %v1048_v63 = vmul.f32 (!%p1446_p13), %v991_v59, %v991_v59  ;;  %v992_v0 = vld [vmem:[#allocation2 + $0x18] sm:$0xff] (!%p1446_p13) }
 0x160   : > { %984 = vst [vmem:[#allocation2 + $0x38] sm:$0xff] %v976_v56  ;;  %1000 = vst [vmem:[%s1776_s5 + $0x18] sm:$0xff] (!%p1446_p13), %v992_v0  ;;  %v1014_v3 = vadd.f32 (!%p1446_p13), %v992_v0, %v990_v58  ;;  %v1049_v4 = vmul.f32 (!%p1446_p13), %v992_v0, %v992_v0 }
 0x161   : > { %v1054_v9 = vadd.f32 %v1048_v63, %v1046_v60 }
 0x162   : > { %v1063_v12 = vadd.f32 %v1049_v4, %v1047_v61 }
 0x164   : > { %v993_v1 = vld [vmem:[#allocation2 + $0x20] sm:$0xff] }
 0x165   : > { %v994_v2 = vld [vmem:[#allocation2 + $0x28] sm:$0xff]  ;;  %1001 = vst [vmem:[%s1776_s5 + $0x20] sm:$0xff] %v993_v1  ;;  %v1050_v5 = vmul.f32 %v993_v1, %v993_v1  ;;  %v1006_v10 = vadd.f32 %v1005_v62, %v993_v1 }
 0x166   : > { %1002 = vst [vmem:[%s1776_s5 + $0x28] sm:$0xff] %v994_v2  ;;  %v1051_v6 = vmul.f32 %v994_v2, %v994_v2  ;;  %v995_v7 = vld [vmem:[#allocation2 + $0x30] sm:$0xff]  ;;  %v1015_v13 = vadd.f32 %v1014_v3, %v994_v2 }
 0x167   : > { %v996_v8 = vld [vmem:[#allocation2 + $0x38] sm:$0xff]  ;;  %1003 = vst [vmem:[%s1776_s5 + $0x30] sm:$0xff] %v995_v7  ;;  %v1052_v11 = vmul.f32 %v995_v7, %v995_v7  ;;  %v1055_v15 = vadd.f32 %v1054_v9, %v1050_v5  ;;  %v1007_v16 = vadd.f32 %v1006_v10, %v995_v7 }
 0x168   : > { %1004 = vst [vmem:[%s1776_s5 + $0x38] sm:$0xff] %v996_v8  ;;  %v1053_v14 = vmul.f32 %v996_v8, %v996_v8  ;;  %v1064_v17 = vadd.f32 %v1063_v12, %v1051_v6  ;;  %v1016_v18 = vadd.f32 %v1015_v13, %v996_v8 }
 0x169   : > { %v1008_v19 = vrot.slane %v1007_v16, 4  ;;  %v1056_v20 = vadd.f32 %v1055_v15, %v1052_v11 }
 0x16a   : > { %v1017_v21 = vrot.slane %v1016_v18, 4  ;;  %v1065_v22 = vadd.f32 %v1064_v17, %v1053_v14 }
 0x16b   : > { %v1009_v23 = vadd.f32 %v1008_v19, %v1007_v16  ;;  %v1057_v24 = vrot.slane %v1056_v20, 4 }
 0x16c   : > { %v1018_v25 = vadd.f32 %v1017_v21, %v1016_v18  ;;  %v1066_v26 = vrot.slane %v1065_v22, 4 }
 0x16d   : > { %v1010_v30 = vrot.slane %v1009_v23, 2  ;;  %v1058_v31 = vadd.f32 %v1057_v24, %v1056_v20 }
 0x16e   : > { %v1019_v32 = vrot.slane %v1018_v25, 2  ;;  %v1067_v33 = vadd.f32 %v1066_v26, %v1065_v22 }
 0x16f   : > { %v1011_v34 = vadd.f32 %v1010_v30, %v1009_v23  ;;  %v1059_v35 = vrot.slane %v1058_v31, 2 }
 0x170   : > { %v1020_v36 = vadd.f32 %v1019_v32, %v1018_v25  ;;  %v1068_v37 = vrot.slane %v1067_v33, 2 }
 0x171   : > { %v1012_v40 = vrot.slane %v1011_v34, 1  ;;  %v1060_v41 = vadd.f32 %v1059_v35, %v1058_v31 }
 0x172   : > { %v1021_v42 = vrot.slane %v1020_v36, 1  ;;  %v1069_v43 = vadd.f32 %v1068_v37, %v1067_v33 }
 0x173   : > { %v1013_v44 = vadd.f32 %v1012_v40, %v1011_v34  ;;  %v1061_v45 = vrot.slane %v1060_v41, 1 }
 0x174   : > { %v1022_v46 = vadd.f32 %v1021_v42, %v1020_v36  ;;  %v1070_v48 = vrot.slane %v1069_v43, 1 }
 0x175   : > { %v1062_v49 = vadd.f32 %v1061_v45, %v1060_v41 }
 0x176   : > { %v1025_v50 = vcombine.low %v1013_v44, %v1022_v46  ;;  %v1071_v51 = vadd.f32 %v1070_v48, %v1069_v43 }
 0x178   : > { %v1032_v52 = vrot.slane %v1025_v50, %v1031_v47  ;;  %v1074_v53 = vcombine.low %v1062_v49, %v1071_v51 }
 0x17a   : > { %v1039_v54 = vrot.slane %v1032_v52, %v1031_v47  ;;  %v1081_v55 = vrot.slane %v1074_v53, %v1031_v47 }
 0x17c   : > { %1045 = vst.msk [vmem:[%s1781_s15] sm:$0x3] %vm1043_vm0, %v1039_v54  ;;  %v1088_v56 = vrot.slane %v1081_v55, %v1031_v47 }
 0x17e   : > { %1090 = vst.msk [vmem:[%s1791_s23] sm:$0x3] %vm1043_vm0, %v1088_v56 }
 0x17f PF: > { %s15_s21 = sadd.s32 1, %s1678_s21   ;;  %s1909_s0 = sld [smem:[#allocation4_spill]] }
 0x180   : > { %p12_p0 = scmp.ge.s32.totalorder %s15_s21, 18   ;;  %s1910_s15 = smov %s1658_s16 }
 0x181   : > { %s1911_s16 = smov %s1758_s28  ;;  %s1912_s17 = smov %s1670_s19 }
 0x182   : > { %s1913_s18 = smov %s1674_s20  ;;  %s1914_s19 = smov %s1917_s22 }
 0x183   :  { %14 = sbr.rel (!%p12_p0) target bundleno = 6 (0x6), region = 121 }
 0x185   : > { %s1915_s20 = smov %s1909_s0 }

// kernel: generator_forward.10
= control target key start
LH: loop header
LB: loop body
LE: loop exit
PB: predicated region body
PF: predicated region fallthrough
CT: control target
= control target key end

     0   :  { %v48_v0 = vlaneseq  ;;  %s556_s1 = inlined_call_operand.vmem [shape: f32[1,256], index: 1, kind: input, shape index: {}]   ;;  %s557_s2 = inlined_call_operand.vmem [shape: f32[1,256], index: 2, kind: input, shape index: {}]   ;;  %s558_s0 = inlined_call_operand.vmem [shape: f32[128,256], index: 0, kind: input, shape index: {}]   ;;  %s559_s3 = inlined_call_operand.vmem [shape: bf16[128,256], index: 3, kind: output, shape index: {}]  }
   0x1   :  { %v46_v2 = vld [vmem:[%s556_s1] sm:$0x3]  ;;  %v15_v5 = vld [vmem:[%s558_s0 + $0x8] sm:$0xff]  ;;  %v16_v8 = vld [vmem:[%s558_s0 + $0x10] sm:$0xff] }
   0x2   :  { %v49_v1 = vshrl.u32 %v48_v0, 7  ;;  %v90_v3 = vld [vmem:[%s557_s2] sm:$0x3]  ;;  %v17_v9 = vld [vmem:[%s558_s0 + $0x18] sm:$0xff]  ;;  %v19_v15 = vld [vmem:[%s558_s0 + $0x28] sm:$0xff] }
   0x3   :  { %v14_v4 = vld [vmem:[%s558_s0] sm:$0xff]  ;;  %v20_v16 = vld [vmem:[%s558_s0 + $0x30] sm:$0xff]  ;;  %v21_v17 = vld [vmem:[%s558_s0 + $0x38] sm:$0xff] }
   0x4   :  { %v50_v6 = vsub.s32 0, %v49_v1  ;;  %v54_v7 = vsub.s32 1, %v49_v1  ;;  %v18_v10 = vld [vmem:[%s558_s0 + $0x20] sm:$0xff]  ;;  %v23_v35 = vld [vmem:[%s558_s0 + $0x48] sm:$0xff]  ;;  %v24_v40 = vld [vmem:[%s558_s0 + $0x50] sm:$0xff] }
   0x5   :  { %v22_v34 = vld [vmem:[%s558_s0 + $0x40] sm:$0xff]  ;;  %v25_v41 = vld [vmem:[%s558_s0 + $0x58] sm:$0xff]  ;;  %v27_v47 = vld [vmem:[%s558_s0 + $0x68] sm:$0xff] }
   0x6   :  { %v355_v11 = vrot.slane %v46_v2, %v50_v6  ;;  %v357_v12 = vrot.slane %v46_v2, %v54_v7  ;;  %v359_v13 = vrot.slane %v90_v3, %v50_v6  ;;  %v361_v14 = vrot.slane %v90_v3, %v54_v7  ;;  %v26_v46 = vld [vmem:[%s558_s0 + $0x60] sm:$0xff]  ;;  %v28_v52 = vld [vmem:[%s558_s0 + $0x70] sm:$0xff]  ;;  %v29_v53 = vld [vmem:[%s558_s0 + $0x78] sm:$0xff] }
   0x7   :  { %v30_v2 = vld [vmem:[%s558_s0 + $0x80] sm:$0xff]  ;;  %v31_v7 = vld [vmem:[%s558_s0 + $0x88] sm:$0xff] }
   0x8   :  { %v58_v18 = vmul.f32 %v355_v11, %v14_v4  ;;  %v59_v19 = vmul.f32 %v357_v12, %v15_v5  ;;  %v60_v20 = vmul.f32 %v355_v11, %v16_v8  ;;  %v61_v21 = vmul.f32 %v357_v12, %v17_v9 }
   0x9   :  { %v62_v22 = vmul.f32 %v355_v11, %v18_v10  ;;  %v63_v23 = vmul.f32 %v357_v12, %v19_v15  ;;  %v64_v24 = vmul.f32 %v355_v11, %v20_v16  ;;  %v65_v25 = vmul.f32 %v357_v12, %v21_v17  ;;  %v32_v16 = vld [vmem:[%s558_s0 + $0x90] sm:$0xff]  ;;  %v33_v17 = vld [vmem:[%s558_s0 + $0x98] sm:$0xff] }
   0xa   :  { %v102_v26 = vadd.f32 %v359_v13, %v58_v18  ;;  %v103_v27 = vadd.f32 %v361_v14, %v59_v19  ;;  %v104_v28 = vadd.f32 %v359_v13, %v60_v20  ;;  %v105_v29 = vadd.f32 %v361_v14, %v61_v21 }
   0xb   :  { %v106_v30 = vadd.f32 %v359_v13, %v62_v22  ;;  %v107_v31 = vadd.f32 %v361_v14, %v63_v23  ;;  %v108_v32 = vadd.f32 %v359_v13, %v64_v24  ;;  %v109_v33 = vadd.f32 %v361_v14, %v65_v25  ;;  %v34_v22 = vld [vmem:[%s558_s0 + $0xa0] sm:$0xff]  ;;  %v35_v23 = vld [vmem:[%s558_s0 + $0xa8] sm:$0xff] }
   0xc   :  { %v134_v36 = vmax.f32 %v102_v26, 0.0  ;;  %v135_v37 = vmax.f32 %v103_v27, 0.0  ;;  %v136_v38 = vmax.f32 %v104_v28, 0.0  ;;  %v137_v39 = vmax.f32 %v105_v29, 0.0  ;;  %v36_v28 = vld [vmem:[%s558_s0 + $0xb0] sm:$0xff] }
   0xd   :  { %v138_v42 = vmax.f32 %v106_v30, 0.0  ;;  %v139_v43 = vmax.f32 %v107_v31, 0.0  ;;  %v140_v44 = vmax.f32 %v108_v32, 0.0  ;;  %v141_v45 = vmax.f32 %v109_v33, 0.0  ;;  %v37_v33 = vld [vmem:[%s558_s0 + $0xb8] sm:$0xff] }
   0xe   :  { %v298_v48 = vpack.c.bf16 %v135_v37, %v134_v36  ;;  %v299_v49 = vpack.c.bf16 %v137_v39, %v136_v38  ;;  %v66_v50 = vmul.f32 %v355_v11, %v22_v34  ;;  %v67_v51 = vmul.f32 %v357_v12, %v23_v35  ;;  %v38_v38 = vld [vmem:[%s558_s0 + $0xc0] sm:$0xff] }
   0xf   :  { %v300_v54 = vpack.c.bf16 %v139_v43, %v138_v42  ;;  %v301_v55 = vpack.c.bf16 %v141_v45, %v140_v44  ;;  %v68_v56 = vmul.f32 %v355_v11, %v24_v40  ;;  %v69_v57 = vmul.f32 %v357_v12, %v25_v41 }
  0x10   :  { %262 = vst [vmem:[%s559_s3] sm:$0xff] %v298_v48  ;;  %263 = vst [vmem:[%s559_s3 + $0x8] sm:$0xff] %v299_v49  ;;  %v110_v58 = vadd.f32 %v359_v13, %v66_v50  ;;  %v111_v59 = vadd.f32 %v361_v14, %v67_v51  ;;  %v70_v60 = vmul.f32 %v355_v11, %v26_v46 }
  0x11   :  { %v71_v61 = vmul.f32 %v357_v12, %v27_v47  ;;  %264 = vst [vmem:[%s559_s3 + $0x10] sm:$0xff] %v300_v54  ;;  %265 = vst [vmem:[%s559_s3 + $0x18] sm:$0xff] %v301_v55  ;;  %v112_v62 = vadd.f32 %v359_v13, %v68_v56  ;;  %v113_v63 = vadd.f32 %v361_v14, %v69_v57  ;;  %v39_v47 = vld [vmem:[%s558_s0 + $0xc8] sm:$0xff] }
  0x12   :  { %v72_v0 = vmul.f32 %v355_v11, %v28_v52  ;;  %v73_v1 = vmul.f32 %v357_v12, %v29_v53  ;;  %v142_v3 = vmax.f32 %v110_v58, 0.0  ;;  %v143_v4 = vmax.f32 %v111_v59, 0.0  ;;  %v40_v52 = vld [vmem:[%s558_s0 + $0xd0] sm:$0xff]  ;;  %v41_v53 = vld [vmem:[%s558_s0 + $0xd8] sm:$0xff]  ;;  %v42_v58 = vld [vmem:[%s558_s0 + $0xe0] sm:$0xff] }
  0x13   :  { %v114_v5 = vadd.f32 %v359_v13, %v70_v60  ;;  %v115_v6 = vadd.f32 %v361_v14, %v71_v61  ;;  %v144_v8 = vmax.f32 %v112_v62, 0.0  ;;  %v145_v9 = vmax.f32 %v113_v63, 0.0  ;;  %v43_v59 = vld [vmem:[%s558_s0 + $0xe8] sm:$0xff] }
  0x14   :  { %v116_v10 = vadd.f32 %v359_v13, %v72_v0  ;;  %v117_v15 = vadd.f32 %v361_v14, %v73_v1  ;;  %v302_v18 = vpack.c.bf16 %v143_v4, %v142_v3  ;;  %v74_v21 = vmul.f32 %v355_v11, %v30_v2  ;;  %v44_v0 = vld [vmem:[%s558_s0 + $0xf0] sm:$0xff] }
  0x15   :  { %v146_v19 = vmax.f32 %v114_v5, 0.0  ;;  %v147_v20 = vmax.f32 %v115_v6, 0.0  ;;  %v303_v24 = vpack.c.bf16 %v145_v9, %v144_v8  ;;  %v75_v27 = vmul.f32 %v357_v12, %v31_v7  ;;  %v45_v5 = vld [vmem:[%s558_s0 + $0xf8] sm:$0xff] }
  0x16   :  { %v148_v25 = vmax.f32 %v116_v10, 0.0  ;;  %v149_v26 = vmax.f32 %v117_v15, 0.0  ;;  %266 = vst [vmem:[%s559_s3 + $0x20] sm:$0xff] %v302_v18  ;;  %v118_v30 = vadd.f32 %v359_v13, %v74_v21  ;;  %v76_v31 = vmul.f32 %v355_v11, %v32_v16 }
  0x17   :  { %v304_v29 = vpack.c.bf16 %v147_v20, %v146_v19  ;;  %v77_v32 = vmul.f32 %v357_v12, %v33_v17  ;;  %267 = vst [vmem:[%s559_s3 + $0x28] sm:$0xff] %v303_v24  ;;  %v119_v35 = vadd.f32 %v361_v14, %v75_v27  ;;  %v78_v36 = vmul.f32 %v355_v11, %v34_v22 }
  0x18   :  { %v305_v34 = vpack.c.bf16 %v149_v26, %v148_v25  ;;  %v79_v37 = vmul.f32 %v357_v12, %v35_v23  ;;  %v150_v39 = vmax.f32 %v118_v30, 0.0  ;;  %v120_v40 = vadd.f32 %v359_v13, %v76_v31 }
  0x19   :  { %268 = vst [vmem:[%s559_s3 + $0x30] sm:$0xff] %v304_v29  ;;  %v121_v41 = vadd.f32 %v361_v14, %v77_v32  ;;  %v80_v42 = vmul.f32 %v355_v11, %v36_v28  ;;  %v151_v43 = vmax.f32 %v119_v35, 0.0  ;;  %v122_v44 = vadd.f32 %v359_v13, %v78_v36 }
  0x1a   :  { %269 = vst [vmem:[%s559_s3 + $0x38] sm:$0xff] %v305_v34  ;;  %v123_v45 = vadd.f32 %v361_v14, %v79_v37  ;;  %v81_v46 = vmul.f32 %v357_v12, %v37_v33  ;;  %v152_v48 = vmax.f32 %v120_v40, 0.0  ;;  %v82_v51 = vmul.f32 %v355_v11, %v38_v38 }
  0x1b   :  { %v153_v49 = vmax.f32 %v121_v41, 0.0  ;;  %v124_v50 = vadd.f32 %v359_v13, %v80_v42  ;;  %v306_v54 = vpack.c.bf16 %v151_v43, %v150_v39  ;;  %v154_v55 = vmax.f32 %v122_v44, 0.0 }
  0x1c   :  { %v155_v56 = vmax.f32 %v123_v45, 0.0  ;;  %v125_v57 = vadd.f32 %v361_v14, %v81_v46  ;;  %v83_v62 = vmul.f32 %v357_v12, %v39_v47  ;;  %v126_v63 = vadd.f32 %v359_v13, %v82_v51 }
  0x1d   :  { %v307_v60 = vpack.c.bf16 %v153_v49, %v152_v48  ;;  %v156_v61 = vmax.f32 %v124_v50, 0.0  ;;  %270 = vst [vmem:[%s559_s3 + $0x40] sm:$0xff] %v306_v54  ;;  %v84_v3 = vmul.f32 %v355_v11, %v40_v52  ;;  %v85_v4 = vmul.f32 %v357_v12, %v41_v53 }
  0x1e   :  { %v308_v1 = vpack.c.bf16 %v155_v56, %v154_v55  ;;  %v157_v2 = vmax.f32 %v125_v57, 0.0  ;;  %v127_v6 = vadd.f32 %v361_v14, %v83_v62  ;;  %v158_v7 = vmax.f32 %v126_v63, 0.0 }
  0x1f   :  { %271 = vst [vmem:[%s559_s3 + $0x48] sm:$0xff] %v307_v60  ;;  %v86_v8 = vmul.f32 %v355_v11, %v42_v58  ;;  %v87_v9 = vmul.f32 %v357_v12, %v43_v59  ;;  %v128_v15 = vadd.f32 %v359_v13, %v84_v3  ;;  %v129_v16 = vadd.f32 %v361_v14, %v85_v4 }
  0x20   :  { %272 = vst [vmem:[%s559_s3 + $0x50] sm:$0xff] %v308_v1  ;;  %v309_v10 = vpack.c.bf16 %v157_v2, %v156_v61  ;;  %v88_v17 = vmul.f32 %v355_v11, %v44_v0  ;;  %v159_v18 = vmax.f32 %v127_v6, 0.0  ;;  %v89_v21 = vmul.f32 %v357_v12, %v45_v5 }
  0x21   :  { %v130_v19 = vadd.f32 %v359_v13, %v86_v8  ;;  %v131_v20 = vadd.f32 %v361_v14, %v87_v9  ;;  %v160_v22 = vmax.f32 %v128_v15, 0.0  ;;  %v161_v23 = vmax.f32 %v129_v16, 0.0 }
  0x22   :  { %273 = vst [vmem:[%s559_s3 + $0x58] sm:$0xff] %v309_v10  ;;  %v132_v24 = vadd.f32 %v359_v13, %v88_v17  ;;  %v310_v25 = vpack.c.bf16 %v159_v18, %v158_v7  ;;  %v133_v11 = vadd.f32 %v361_v14, %v89_v21 }
  0x23   :  { %v162_v26 = vmax.f32 %v130_v19, 0.0  ;;  %v163_v27 = vmax.f32 %v131_v20, 0.0  ;;  %v311_v28 = vpack.c.bf16 %v161_v23, %v160_v22 }
  0x24   :  { %v164_v29 = vmax.f32 %v132_v24, 0.0  ;;  %274 = vst [vmem:[%s559_s3 + $0x60] sm:$0xff] %v310_v25  ;;  %v165_v30 = vmax.f32 %v133_v11, 0.0 }
  0x25   :  { %v312_v12 = vpack.c.bf16 %v163_v27, %v162_v26  ;;  %275 = vst [vmem:[%s559_s3 + $0x68] sm:$0xff] %v311_v28 }
  0x26   :  { %v313_v13 = vpack.c.bf16 %v165_v30, %v164_v29 }
  0x27   :  { %276 = vst [vmem:[%s559_s3 + $0x70] sm:$0xff] %v312_v12 }
  0x28   :  { %277 = vst [vmem:[%s559_s3 + $0x78] sm:$0xff] %v313_v13 }

// kernel: generator_forward.11
= control target key start
LH: loop header
LB: loop body
LE: loop exit
PB: predicated region body
PF: predicated region fallthrough
CT: control target
= control target key end

     0   :  { %s2162_s0 = inlined_call_operand.vmem [shape: bf16[4,128,1024], index: 0, kind: input, shape index: {}]   ;;  %s2163_s1 = inlined_call_operand.vmem [shape: bf16[4,1024,128], index: 1, kind: input, shape index: {}]   ;;  %s2164_s2 = inlined_call_operand.vmem [shape: f32[4,128,128], index: 2, kind: output, shape index: {0}]   ;;  %s2165_s3 = inlined_call_operand.vmem [shape: f32[4,1,1,128], index: 3, kind: output, shape index: {1}]   ;;  %s2166_s4 = inlined_call_operand.vmem [shape: f32[4,1,1,128], index: 4, kind: output, shape index: {2}]  }
   0x1   :  { %2167 = sst [smem:[#allocation4_spill]] %s2162_s0 }
   0x2   :  { %s1892_s15 = smov 0   ;;  %s1894_s16 = smov 0  }
   0x3   :  { %s1896_s17 = smov 0   ;;  %s1898_s18 = smov 0  }
   0x4   :  { %s1900_s19 = smov 0   ;;  %s1902_s20 = smov 0  }
   0x5   :  { %s1904_s21 = smov 0  }
   0x6 LB: > { %s30_s22 = sadd.s32 1, %s1856_s19  ;;  %s41_s23 = sadd.s32 1, %s1860_s20  ;;  %s1864_s21 = sphi %s1904_s21, %s15_s21   ;;  %s1860_s20 = sphi %s1902_s20, %s2174_s20   ;;  %s1856_s19 = sphi %s1900_s19, %s2173_s19   ;;  %s1852_s18 = sphi %s1898_s18, %s2172_s18   ;;  %s1848_s17 = sphi %s1896_s17, %s2171_s17   ;;  %s1844_s16 = sphi %s1894_s16, %s2170_s16   ;;  %s1840_s15 = sphi %s1892_s15, %s2169_s15  }
   0x7   : > { %p31_p0 = scmp.ge.s32.totalorder %s30_s22, 2  ;;  %p59_p1 = scmp.ne.s32.totalorder %s1844_s16, %s1840_s15 }
   0x8   : > { %p60_p2 = scmp.eq.s32.totalorder %s1864_s21, 0  ;;  %s52_s27 = sadd.s32 1, %s1844_s16 }
   0x9   : > { %s2176_s22 = smov (%p31_p0, %s30_s22), 0  ;;  %s2178_s23 = smov (!%p31_p0, %s41_s23), %s1860_s20 }
   0xa   : > { %p61_p3 = por %p60_p2, %p59_p1  ;;  %p43_p4 = scmp.ge.s32.totalorder %s2178_s23, 4 }
   0xb   : > { %s48_s24 = ssub.s32 %s1856_s19, %s2176_s22  ;;  %p1464_p6 = scmp.ge.s32.totalorder %s1864_s21, 8 }
   0xc   : > { %s2180_s23 = smov (%p43_p4, %s2178_s23), 0 }
   0xd   : > { %s45_s25 = ssub.s32 %s1860_s20, %s2180_s23  ;;  %205 = sbr.rel (%p1464_p6) target bundleno = 46 (0x2e), region = 16 }
   0xe   : > { %s49_s26 = sor.u32 %s48_s24, %s45_s25 }
   0xf   : > { %p50_p5 = scmp.eq.s32.totalorder %s49_s26, 0 }
  0x11   : > { %s1943_s28 = scalar_select %p50_p5, %s1844_s16, %s52_s27  }
  0x14   : > { %208 = sbr.rel (!%p61_p3) target bundleno = 46 (0x2e), region = 20  ;;  %s210_s29 = sand.u32 (%p61_p3), 1, %s1844_s16  }
  0x15   : > { %s1466_s30 = sshll.u32 (%p61_p3), %s1856_s19, 2  ;;  %s1465_s5 = sshll.u32 (%p61_p3), %s210_s29, 8 }
  0x16   : > { %s1467_s6 = sshll.u32 (%p61_p3), %s1860_s20, 7  ;;  %s2168_s0 = sld [smem:[#allocation4_spill]] (%p61_p3) }
  0x17   : > { %s218_s7 = sadd.s32 (%p61_p3), %s1467_s6, %s1466_s30  ;;  %s1957_s12 = scalar_lea.vmem (%p61_p3), [#allocation3], %s1465_s5 }
  0x18   : > { %s1468_s8 = sshll.u32 (%p61_p3), %s218_s7, 2 }
  0x1c   : > { %s1952_s11 = scalar_lea.vmem %s2168_s0, %s1468_s8 }
  0x1d   : > { %v233_v0 = vld [vmem:[%s1952_s11] sm:$0xff]  ;;  %v235_v1 = vld [vmem:[%s1952_s11 + $0x8] sm:$0xff] }
  0x1e   : > { %v237_v2 = vld [vmem:[%s1952_s11 + $0x20] sm:$0xff]  ;;  %234 = vst [vmem:[%s1957_s12] sm:$0xff] %v233_v0  ;;  %236 = vst [vmem:[%s1957_s12 + $0x8] sm:$0xff] %v235_v1  ;;  %v239_v3 = vld [vmem:[%s1952_s11 + $0x28] sm:$0xff] }
  0x1f   : > { %238 = vst [vmem:[%s1957_s12 + $0x10] sm:$0xff] %v237_v2  ;;  %v241_v4 = vld [vmem:[%s1952_s11 + $0x40] sm:$0xff]  ;;  %v243_v5 = vld [vmem:[%s1952_s11 + $0x48] sm:$0xff]  ;;  %240 = vst [vmem:[%s1957_s12 + $0x18] sm:$0xff] %v239_v3 }
  0x20   : > { %242 = vst [vmem:[%s1957_s12 + $0x20] sm:$0xff] %v241_v4  ;;  %244 = vst [vmem:[%s1957_s12 + $0x28] sm:$0xff] %v243_v5  ;;  %v245_v6 = vld [vmem:[%s1952_s11 + $0x60] sm:$0xff]  ;;  %v247_v7 = vld [vmem:[%s1952_s11 + $0x68] sm:$0xff] }
  0x21   : > { %v249_v8 = vld [vmem:[%s1952_s11 + $0x80] sm:$0xff]  ;;  %246 = vst [vmem:[%s1957_s12 + $0x30] sm:$0xff] %v245_v6  ;;  %248 = vst [vmem:[%s1957_s12 + $0x38] sm:$0xff] %v247_v7  ;;  %v251_v9 = vld [vmem:[%s1952_s11 + $0x88] sm:$0xff] }
  0x22   : > { %250 = vst [vmem:[%s1957_s12 + $0x40] sm:$0xff] %v249_v8  ;;  %v253_v10 = vld [vmem:[%s1952_s11 + $0xa0] sm:$0xff]  ;;  %v255_v11 = vld [vmem:[%s1952_s11 + $0xa8] sm:$0xff]  ;;  %252 = vst [vmem:[%s1957_s12 + $0x48] sm:$0xff] %v251_v9 }
  0x23   : > { %254 = vst [vmem:[%s1957_s12 + $0x50] sm:$0xff] %v253_v10  ;;  %256 = vst [vmem:[%s1957_s12 + $0x58] sm:$0xff] %v255_v11  ;;  %v257_v12 = vld [vmem:[%s1952_s11 + $0xc0] sm:$0xff]  ;;  %v259_v13 = vld [vmem:[%s1952_s11 + $0xc8] sm:$0xff] }
  0x24   : > { %v261_v14 = vld [vmem:[%s1952_s11 + $0xe0] sm:$0xff]  ;;  %258 = vst [vmem:[%s1957_s12 + $0x60] sm:$0xff] %v257_v12  ;;  %260 = vst [vmem:[%s1957_s12 + $0x68] sm:$0xff] %v259_v13  ;;  %v263_v15 = vld [vmem:[%s1952_s11 + $0xe8] sm:$0xff] }
  0x25   : > { %262 = vst [vmem:[%s1957_s12 + $0x70] sm:$0xff] %v261_v14  ;;  %v265_v16 = vld [vmem:[%s1952_s11 + $0x100] sm:$0xff]  ;;  %v267_v17 = vld [vmem:[%s1952_s11 + $0x108] sm:$0xff]  ;;  %264 = vst [vmem:[%s1957_s12 + $0x78] sm:$0xff] %v263_v15 }
  0x26   : > { %266 = vst [vmem:[%s1957_s12 + $0x80] sm:$0xff] %v265_v16  ;;  %268 = vst [vmem:[%s1957_s12 + $0x88] sm:$0xff] %v267_v17  ;;  %v269_v18 = vld [vmem:[%s1952_s11 + $0x120] sm:$0xff]  ;;  %v271_v19 = vld [vmem:[%s1952_s11 + $0x128] sm:$0xff] }
  0x27   : > { %v273_v20 = vld [vmem:[%s1952_s11 + $0x140] sm:$0xff]  ;;  %270 = vst [vmem:[%s1957_s12 + $0x90] sm:$0xff] %v269_v18  ;;  %272 = vst [vmem:[%s1957_s12 + $0x98] sm:$0xff] %v271_v19  ;;  %v275_v21 = vld [vmem:[%s1952_s11 + $0x148] sm:$0xff] }
  0x28   : > { %274 = vst [vmem:[%s1957_s12 + $0xa0] sm:$0xff] %v273_v20  ;;  %v277_v22 = vld [vmem:[%s1952_s11 + $0x160] sm:$0xff]  ;;  %v279_v23 = vld [vmem:[%s1952_s11 + $0x168] sm:$0xff]  ;;  %276 = vst [vmem:[%s1957_s12 + $0xa8] sm:$0xff] %v275_v21 }
  0x29   : > { %278 = vst [vmem:[%s1957_s12 + $0xb0] sm:$0xff] %v277_v22  ;;  %280 = vst [vmem:[%s1957_s12 + $0xb8] sm:$0xff] %v279_v23  ;;  %v281_v24 = vld [vmem:[%s1952_s11 + $0x180] sm:$0xff]  ;;  %v283_v25 = vld [vmem:[%s1952_s11 + $0x188] sm:$0xff] }
  0x2a   : > { %v285_v26 = vld [vmem:[%s1952_s11 + $0x1a0] sm:$0xff]  ;;  %282 = vst [vmem:[%s1957_s12 + $0xc0] sm:$0xff] %v281_v24  ;;  %284 = vst [vmem:[%s1957_s12 + $0xc8] sm:$0xff] %v283_v25  ;;  %v287_v27 = vld [vmem:[%s1952_s11 + $0x1a8] sm:$0xff] }
  0x2b   : > { %286 = vst [vmem:[%s1957_s12 + $0xd0] sm:$0xff] %v285_v26  ;;  %v289_v28 = vld [vmem:[%s1952_s11 + $0x1c0] sm:$0xff]  ;;  %v291_v29 = vld [vmem:[%s1952_s11 + $0x1c8] sm:$0xff]  ;;  %288 = vst [vmem:[%s1957_s12 + $0xd8] sm:$0xff] %v287_v27 }
  0x2c   : > { %290 = vst [vmem:[%s1957_s12 + $0xe0] sm:$0xff] %v289_v28  ;;  %292 = vst [vmem:[%s1957_s12 + $0xe8] sm:$0xff] %v291_v29  ;;  %v293_v30 = vld [vmem:[%s1952_s11 + $0x1e0] sm:$0xff]  ;;  %v295_v31 = vld [vmem:[%s1952_s11 + $0x1e8] sm:$0xff] }
  0x2d   : > { %294 = vst [vmem:[%s1957_s12 + $0xf0] sm:$0xff] %v293_v30  ;;  %296 = vst [vmem:[%s1957_s12 + $0xf8] sm:$0xff] %v295_v31 }
  0x2e PF: > { %p1469_p7 = scmp.ge.s32.totalorder %s1864_s21, 1  ;;  %p317_p8 = scmp.lt.s32.totalorder %s1864_s21, 9 }
  0x30   : > { %p318_p9 = pnand %p1469_p7, %p317_p8 }
  0x31   : > { %s324_s13 = sand.u32 (!%p318_p9), 1, %s1840_s15   ;;  %s1471_s14 = sshll.u32 (!%p318_p9), %s1848_s17, 6 }
  0x32   : > { %321 = sbr.rel (%p318_p9) target bundleno = 405 (0x195), region = 47  ;;  %s1470_s24 = sshll.u32 (!%p318_p9), %s324_s13, 8 }
  0x33   : > { %p389_p10 = scmp.lt.s32.totalorder (!%p318_p9), %s1852_s18, 3  ;;  %p391_p11 = scmp.lt.s32.totalorder (!%p318_p9), %s1471_s14, 127 }
  0x34   : > { %s2047_s0 = scalar_lea.vmem (!%p318_p9), [#allocation3], %s1470_s24  ;;  %p1476_p12 = scmp.ne.s32.totalorder (!%p318_p9), %s1848_s17, 0 }
  0x39   : > { %s2182_s18 = smov (!%p389_p10, %s1852_s18), 3  ;;  %s2184_s14 = smov (!%p391_p11, %s1471_s14), 127 }
  0x3a   : > { %s1472_s25 = sshll.u32 %s2182_s18, 7  ;;  %s422_s29 = scalar_lea.vmem %s2165_s3, %s2182_s18  ;;  %v1866_v32 = vmov (!%p1476_p12), 0.0  }
  0x3b   : > { %s397_s30 = sadd.s32 %s1472_s25, %s2184_s14  ;;  %s2036_s15 = scalar_lea.vmem %s2164_s2, %s1472_s25  ;;  %437 = vst [vmem:[#allocation2] sm:$0xff] (!%p1476_p12), %v1866_v32  ;;  %438 = vst [vmem:[#allocation2 + $0x8] sm:$0xff] (!%p1476_p12), %v1866_v32 }
  0x3c   : > { %s1473_s7 = sshll.u32 %s397_s30, 2  ;;  %s431_s10 = scalar_lea.vmem %s2166_s4, %s2182_s18  ;;  %439 = vst [vmem:[#allocation2 + $0x10] sm:$0xff] (!%p1476_p12), %v1866_v32  ;;  %440 = vst [vmem:[#allocation2 + $0x18] sm:$0xff] (!%p1476_p12), %v1866_v32 }
  0x3d   : > { %s2045_s13 = scalar_lea.vmem %s2163_s1, %s1473_s7  ;;  %436 = sbr.rel (%p1476_p12) target bundleno = 68 (0x44), region = 55  ;;  %441 = vst [vmem:[#allocation2 + $0x20] sm:$0xff] (!%p1476_p12), %v1866_v32  ;;  %442 = vst [vmem:[#allocation2 + $0x28] sm:$0xff] (!%p1476_p12), %v1866_v32 }
  0x3e   : > { %443 = vst [vmem:[#allocation2 + $0x30] sm:$0xff] (!%p1476_p12), %v1866_v32  ;;  %444 = vst [vmem:[#allocation2 + $0x38] sm:$0xff] (!%p1476_p12), %v1866_v32 }
  0x3f   : > { %445 = vst [vmem:[#allocation2 + $0x40] sm:$0xff] (!%p1476_p12), %v1866_v32  ;;  %446 = vst [vmem:[#allocation2 + $0x48] sm:$0xff] (!%p1476_p12), %v1866_v32 }
  0x40   : > { %447 = vst [vmem:[#allocation2 + $0x50] sm:$0xff] (!%p1476_p12), %v1866_v32  ;;  %448 = vst [vmem:[#allocation2 + $0x58] sm:$0xff] (!%p1476_p12), %v1866_v32 }
  0x41   : > { %449 = vst [vmem:[#allocation2 + $0x60] sm:$0xff] (!%p1476_p12), %v1866_v32  ;;  %450 = vst [vmem:[#allocation2 + $0x68] sm:$0xff] (!%p1476_p12), %v1866_v32 }
  0x42   : > { %451 = vst [vmem:[#allocation2 + $0x70] sm:$0xff] (!%p1476_p12), %v1866_v32  ;;  %452 = vst [vmem:[#allocation2 + $0x78] sm:$0xff] (!%p1476_p12), %v1866_v32 }
  0x44 PF: > { %v1730_v33 = vld [vmem:[%s2045_s13 + $0x40] sm:$0xff]   ;;  %v1734_v37 = vld [vmem:[%s2045_s13 + $0x48] sm:$0xff]   ;;  %v1738_v41 = vld [vmem:[%s2045_s13 + $0x50] sm:$0xff]   ;;  %p1541_p13 = scmp.ne.s32.totalorder %s1848_s17, 1 }
  0x45   : > { %v1731_v34 = vld [vmem:[%s2045_s13 + $0xc0] sm:$0xff]   ;;  %1545 = vmatprep.subr.bf16.mxu0 %v1730_v33  ;;  %v1735_v38 = vld [vmem:[%s2045_s13 + $0xc8] sm:$0xff]   ;;  %v1739_v42 = vld [vmem:[%s2045_s13 + $0xd0] sm:$0xff]  }
  0x46   : > { %v1732_v35 = vld [vmem:[%s2045_s13] sm:$0xff]   ;;  %1609 = vmatprep.subr.bf16.mxu1 %v1731_v34  ;;  %v1736_v39 = vld [vmem:[%s2045_s13 + $0x8] sm:$0xff]   ;;  %v1740_v43 = vld [vmem:[%s2045_s13 + $0x10] sm:$0xff]  }
  0x47   : > { %v1733_v36 = vld [vmem:[%s2045_s13 + $0x80] sm:$0xff]   ;;  %1546 = vmatpush3.bf16.msra.mxu0 %v1732_v35  ;;  %v1737_v40 = vld [vmem:[%s2045_s13 + $0x88] sm:$0xff]   ;;  %v1741_v44 = vld [vmem:[%s2045_s13 + $0x90] sm:$0xff]  }
  0x48   : > { %1610 = vmatpush3.bf16.msra.mxu1 %v1733_v36  ;;  %1547 = vmatprep.subr.bf16.mxu0 %v1734_v37  ;;  %v1742_v45 = vld [vmem:[%s2045_s13 + $0x58] sm:$0xff]   ;;  %v1746_v49 = vld [vmem:[%s2045_s13 + $0x60] sm:$0xff]   ;;  %v1750_v53 = vld [vmem:[%s2045_s13 + $0x68] sm:$0xff]  }
  0x49   : > { %1611 = vmatprep.subr.bf16.mxu1 %v1735_v38  ;;  %v1743_v46 = vld [vmem:[%s2045_s13 + $0xd8] sm:$0xff]   ;;  %v1747_v50 = vld [vmem:[%s2045_s13 + $0xe0] sm:$0xff]   ;;  %v1751_v54 = vld [vmem:[%s2045_s13 + $0xe8] sm:$0xff]  }
  0x4a   : > { %v1744_v47 = vld [vmem:[%s2045_s13 + $0x18] sm:$0xff]   ;;  %v1748_v51 = vld [vmem:[%s2045_s13 + $0x20] sm:$0xff]   ;;  %v1752_v55 = vld [vmem:[%s2045_s13 + $0x28] sm:$0xff]  }
  0x4b   : > { %1548 = vmatpush3.bf16.msra.mxu0 %v1736_v39  ;;  %v1745_v48 = vld [vmem:[%s2045_s13 + $0x98] sm:$0xff]   ;;  %v1749_v52 = vld [vmem:[%s2045_s13 + $0xa0] sm:$0xff]   ;;  %v1753_v56 = vld [vmem:[%s2045_s13 + $0xa8] sm:$0xff]  }
  0x4c   : > { %1612 = vmatpush3.bf16.msra.mxu1 %v1737_v40  ;;  %1549 = vmatprep.subr.bf16.mxu0 %v1738_v41  ;;  %v1754_v57 = vld [vmem:[%s2045_s13 + $0x70] sm:$0xff]   ;;  %v1758_v61 = vld [vmem:[%s2045_s13 + $0x78] sm:$0xff]  }
  0x4d   : > { %1613 = vmatprep.subr.bf16.mxu1 %v1739_v42  ;;  %v1755_v58 = vld [vmem:[%s2045_s13 + $0xf0] sm:$0xff]   ;;  %v1759_v62 = vld [vmem:[%s2045_s13 + $0xf8] sm:$0xff]   ;;  %v453_v42 = vld [vmem:[#allocation2] sm:$0xff] }
  0x4e   : > { %v1756_v59 = vld [vmem:[%s2045_s13 + $0x30] sm:$0xff]   ;;  %v1760_v63 = vld [vmem:[%s2045_s13 + $0x38] sm:$0xff]  }
  0x4f   : > { %1550 = vmatpush3.bf16.msra.mxu0 %v1740_v43  ;;  %v1757_v60 = vld [vmem:[%s2045_s13 + $0xb0] sm:$0xff]   ;;  %v1761_v0 = vld [vmem:[%s2045_s13 + $0xb8] sm:$0xff]  }
  0x50   : > { %1614 = vmatpush3.bf16.msra.mxu1 %v1741_v44  ;;  %1551 = vmatprep.subr.bf16.mxu0 %v1742_v45  ;;  %v1762_v1 = vld [vmem:[%s2047_s0] ss:$16 sps:$4 sm:$0xff]   ;;  %v1764_v2 = vld [vmem:[%s2047_s0 + $0x4] ss:$16 sps:$4 sm:$0xff]   ;;  %v1765_v3 = vld [vmem:[%s2047_s0 + $0x8] ss:$16 sps:$4 sm:$0xff]  }
  0x51   : > { %1615 = vmatprep.subr.bf16.mxu1 %v1743_v46  ;;  %v1767_v4 = vld [vmem:[%s2047_s0 + $0xc] ss:$16 sps:$4 sm:$0xff]   ;;  %949 = vmatprep.mubr.bf16.mxu0 %v1764_v2  ;;  %v1768_v5 = vld [vmem:[%s2047_s0 + $0x24] ss:$16 sps:$4 sm:$0xff]   ;;  %v1772_v7 = vld [vmem:[%s2047_s0 + $0x20] ss:$16 sps:$4 sm:$0xff]  }
  0x52   : > { %1046 = vmatprep.mubr.bf16.mxu1 %v1767_v4  ;;  %v1770_v6 = vld [vmem:[%s2047_s0 + $0x2c] ss:$16 sps:$4 sm:$0xff]   ;;  %v1773_v8 = vld [vmem:[%s2047_s0 + $0x28] ss:$16 sps:$4 sm:$0xff]   ;;  %v1774_v9 = vld [vmem:[%s2047_s0 + $0x44] ss:$16 sps:$4 sm:$0xff]  }
  0x53   : > { %1552 = vmatpush3.bf16.msra.mxu0 %v1744_v47  ;;  %v1776_v10 = vld [vmem:[%s2047_s0 + $0x4c] ss:$16 sps:$4 sm:$0xff]   ;;  %v1778_v11 = vld [vmem:[%s2047_s0 + $0x40] ss:$16 sps:$4 sm:$0xff]   ;;  %v1779_v12 = vld [vmem:[%s2047_s0 + $0x48] ss:$16 sps:$4 sm:$0xff]  }
  0x54   : > { %1616 = vmatpush3.bf16.msra.mxu1 %v1745_v48  ;;  %1553 = vmatprep.subr.bf16.mxu0 %v1746_v49  ;;  %v1780_v13 = vld [vmem:[%s2047_s0 + $0x64] ss:$16 sps:$4 sm:$0xff]   ;;  %v1782_v14 = vld [vmem:[%s2047_s0 + $0x6c] ss:$16 sps:$4 sm:$0xff]   ;;  %v1784_v15 = vld [vmem:[%s2047_s0 + $0x60] ss:$16 sps:$4 sm:$0xff]  }
  0x55   : > { %1617 = vmatprep.subr.bf16.mxu1 %v1747_v50  ;;  %v1785_v16 = vld [vmem:[%s2047_s0 + $0x68] ss:$16 sps:$4 sm:$0xff]   ;;  %v1786_v17 = vld [vmem:[%s2047_s0 + $0x84] ss:$16 sps:$4 sm:$0xff]   ;;  %v1788_v18 = vld [vmem:[%s2047_s0 + $0x8c] ss:$16 sps:$4 sm:$0xff]  }
  0x56   : > { %v1790_v19 = vld [vmem:[%s2047_s0 + $0x80] ss:$16 sps:$4 sm:$0xff]   ;;  %v1791_v20 = vld [vmem:[%s2047_s0 + $0x88] ss:$16 sps:$4 sm:$0xff]   ;;  %v1792_v21 = vld [vmem:[%s2047_s0 + $0xa4] ss:$16 sps:$4 sm:$0xff]  }
  0x57   : > { %1554 = vmatpush3.bf16.msra.mxu0 %v1748_v51  ;;  %v1794_v22 = vld [vmem:[%s2047_s0 + $0xac] ss:$16 sps:$4 sm:$0xff]   ;;  %v1796_v23 = vld [vmem:[%s2047_s0 + $0xa0] ss:$16 sps:$4 sm:$0xff]   ;;  %v1797_v24 = vld [vmem:[%s2047_s0 + $0xa8] ss:$16 sps:$4 sm:$0xff]  }
  0x58   : > { %1618 = vmatpush3.bf16.msra.mxu1 %v1749_v52  ;;  %1555 = vmatprep.subr.bf16.mxu0 %v1750_v53  ;;  %v1798_v25 = vld [vmem:[%s2047_s0 + $0xc4] ss:$16 sps:$4 sm:$0xff]   ;;  %v1800_v26 = vld [vmem:[%s2047_s0 + $0xcc] ss:$16 sps:$4 sm:$0xff]   ;;  %v1802_v27 = vld [vmem:[%s2047_s0 + $0xc0] ss:$16 sps:$4 sm:$0xff]  }
  0x59   : > { %1619 = vmatprep.subr.bf16.mxu1 %v1751_v54  ;;  %v1803_v28 = vld [vmem:[%s2047_s0 + $0xc8] ss:$16 sps:$4 sm:$0xff]   ;;  %v1804_v29 = vld [vmem:[%s2047_s0 + $0xe4] ss:$16 sps:$4 sm:$0xff]   ;;  %v1806_v30 = vld [vmem:[%s2047_s0 + $0xec] ss:$16 sps:$4 sm:$0xff]  }
  0x5a   : > { %v1808_v31 = vld [vmem:[%s2047_s0 + $0xe0] ss:$16 sps:$4 sm:$0xff]   ;;  %v1809_v32 = vld [vmem:[%s2047_s0 + $0xe8] ss:$16 sps:$4 sm:$0xff]  }
  0x5b   : > { %1556 = vmatpush3.bf16.msra.mxu0 %v1752_v55  ;;  %v454_v47 = vld [vmem:[#allocation2 + $0x8] sm:$0xff] }
  0x5c   : > { %1620 = vmatpush3.bf16.msra.mxu1 %v1753_v56  ;;  %1557 = vmatprep.subr.bf16.mxu0 %v1754_v57 }
  0x5d   : > { %1621 = vmatprep.subr.bf16.mxu1 %v1755_v58 }
  0x5f   : > { %1558 = vmatpush3.bf16.msra.mxu0 %v1756_v59 }
  0x60   : > { %1622 = vmatpush3.bf16.msra.mxu1 %v1757_v60  ;;  %1559 = vmatprep.subr.bf16.mxu0 %v1758_v61  ;;  %v455_v60 = vld [vmem:[#allocation2 + $0x10] sm:$0xff] }
  0x61   : > { %1623 = vmatprep.subr.bf16.mxu1 %v1759_v62 }
  0x63   : > { %1560 = vmatpush3.bf16.msra.mxu0 %v1760_v63 }
  0x64   : > { %1624 = vmatpush3.bf16.msra.mxu1 %v1761_v0 }
  0x66   : > { %950 = vmatmul.mubr.bf16.vlgmr.msra.gmra.mrb[0].mxu0 %v1762_v1  ;;  %v456_v1 = vld [vmem:[#allocation2 + $0x18] sm:$0xff] }
  0x67   : > { %1047 = vmatmul.mubr.bf16.vlgmr.msra.gmra.mrb[0].mxu1 %v1765_v3  ;;  %957 = vmatprep.mubr.bf16.mxu0 %v1768_v5 }
  0x68   : > { %1054 = vmatprep.mubr.bf16.mxu1 %v1770_v6 }
  0x6e   : > { %958 = vmatmul.mubr.bf16.gmra.mrb[4].mxu0 %v1772_v7 }
  0x6f   : > { %1055 = vmatmul.mubr.bf16.gmra.mrb[4].mxu1 %v1773_v8  ;;  %965 = vmatprep.mubr.bf16.mxu0 %v1774_v9 }
  0x70   : > { %1062 = vmatprep.mubr.bf16.mxu1 %v1776_v10 }
  0x76   : > { %966 = vmatmul.mubr.bf16.gmra.mrb[8].mxu0 %v1778_v11 }
  0x77   : > { %1063 = vmatmul.mubr.bf16.gmra.mrb[8].mxu1 %v1779_v12  ;;  %973 = vmatprep.mubr.bf16.mxu0 %v1780_v13 }
  0x78   : > { %1070 = vmatprep.mubr.bf16.mxu1 %v1782_v14  ;;  %v457_v14 = vld [vmem:[#allocation2 + $0x20] sm:$0xff] }
  0x7e   : > { %974 = vmatmul.mubr.bf16.gmra.mrb[12].mxu0 %v1784_v15 }
  0x7f   : > { %1071 = vmatmul.mubr.bf16.gmra.mrb[12].mxu1 %v1785_v16  ;;  %981 = vmatprep.mubr.bf16.mxu0 %v1786_v17 }
  0x80   : > { %1078 = vmatprep.mubr.bf16.mxu1 %v1788_v18 }
  0x86   : > { %982 = vmatmul.mubr.bf16.gmra.mrb[16].mxu0 %v1790_v19  ;;  %v458_v19 = vld [vmem:[#allocation2 + $0x28] sm:$0xff] }
  0x87   : > { %1079 = vmatmul.mubr.bf16.gmra.mrb[16].mxu1 %v1791_v20  ;;  %989 = vmatprep.mubr.bf16.mxu0 %v1792_v21 }
  0x88   : > { %1086 = vmatprep.mubr.bf16.mxu1 %v1794_v22 }
  0x8e   : > { %990 = vmatmul.mubr.bf16.gmra.mrb[20].mxu0 %v1796_v23 }
  0x8f   : > { %1087 = vmatmul.mubr.bf16.gmra.mrb[20].mxu1 %v1797_v24  ;;  %997 = vmatprep.mubr.bf16.mxu0 %v1798_v25 }
  0x90   : > { %1094 = vmatprep.mubr.bf16.mxu1 %v1800_v26 }
  0x96   : > { %998 = vmatmul.mubr.bf16.gmra.mrb[24].mxu0 %v1802_v27 }
  0x97   : > { %1095 = vmatmul.mubr.bf16.gmra.mrb[24].mxu1 %v1803_v28  ;;  %1005 = vmatprep.mubr.bf16.mxu0 %v1804_v29 }
  0x98   : > { %1102 = vmatprep.mubr.bf16.mxu1 %v1806_v30 }
  0x9e   : > { %1006 = vmatmul.mubr.bf16.gmra.mrb[28].mxu0 %v1808_v31 }
  0x9f   : > { %1103 = vmatmul.mubr.bf16.gmra.mrb[28].mxu1 %v1809_v32  ;;  %v459_v32 = vld [vmem:[#allocation2 + $0x30] sm:$0xff] }
 0x139   : > { %v1561_v33 = vpop.f32.mrb[0].mxu0 }
 0x13a   : > { %v1625_v34 = vpop.f32.mrb[0].mxu1  ;;  %v1562_v35 = vpop.f32.mrb[1].mxu0 }
 0x13b   : > { %v1563_v36 = vadd.f32 %v1562_v35, %v1561_v33  ;;  %v1626_v37 = vpop.f32.mrb[1].mxu1  ;;  %v1564_v38 = vpop.f32.mrb[2].mxu0 }
 0x13c   : > { %v1627_v39 = vadd.f32 %v1626_v37, %v1625_v34  ;;  %v1628_v40 = vpop.f32.mrb[2].mxu1  ;;  %v1565_v41 = vpop.f32.mrb[3].mxu0  ;;  %v460_v37 = vld [vmem:[#allocation2 + $0x38] sm:$0xff] }
 0x13d   : > { %v1566_v43 = vadd.f32 %v1565_v41, %v1564_v38  ;;  %v1629_v44 = vpop.f32.mrb[3].mxu1 }
 0x13e   : > { %v1049_v45 = vadd.f32 %v1627_v39, %v1563_v36  ;;  %v1630_v46 = vadd.f32 %v1629_v44, %v1628_v40 }
 0x140   : > { %v1111_v48 = vadd.f32 %v1049_v45, %v453_v42  ;;  %v1052_v49 = vadd.f32 %v1630_v46, %v1566_v43 }
 0x141   : > { %v1567_v50 = vpop.f32.mrb[4].mxu0 }
 0x142   : > { %1127 = vst [vmem:[#allocation2] sm:$0xff] %v1111_v48  ;;  %v1112_v51 = vadd.f32 %v1052_v49, %v454_v47  ;;  %v1631_v52 = vpop.f32.mrb[4].mxu1  ;;  %v1568_v53 = vpop.f32.mrb[5].mxu0 }
 0x143   : > { %v1569_v54 = vadd.f32 %v1568_v53, %v1567_v50  ;;  %v1632_v55 = vpop.f32.mrb[5].mxu1  ;;  %v1570_v56 = vpop.f32.mrb[6].mxu0  ;;  %v461_v50 = vld [vmem:[#allocation2 + $0x40] sm:$0xff] }
 0x144   : > { %1128 = vst [vmem:[#allocation2 + $0x8] sm:$0xff] %v1112_v51  ;;  %v1633_v57 = vadd.f32 %v1632_v55, %v1631_v52  ;;  %v1634_v58 = vpop.f32.mrb[6].mxu1  ;;  %v1571_v59 = vpop.f32.mrb[7].mxu0  ;;  %v462_v55 = vld [vmem:[#allocation2 + $0x48] sm:$0xff] }
 0x145   : > { %v1572_v61 = vadd.f32 %v1571_v59, %v1570_v56  ;;  %v1635_v62 = vpop.f32.mrb[7].mxu1 }
 0x146   : > { %v1057_v63 = vadd.f32 %v1633_v57, %v1569_v54  ;;  %v1636_v0 = vadd.f32 %v1635_v62, %v1634_v58 }
 0x148   : > { %v1113_v2 = vadd.f32 %v1057_v63, %v455_v60  ;;  %v1060_v3 = vadd.f32 %v1636_v0, %v1572_v61 }
 0x149   : > { %v1573_v4 = vpop.f32.mrb[8].mxu0 }
 0x14a   : > { %1129 = vst [vmem:[#allocation2 + $0x10] sm:$0xff] %v1113_v2  ;;  %v1114_v5 = vadd.f32 %v1060_v3, %v456_v1  ;;  %v1637_v6 = vpop.f32.mrb[8].mxu1  ;;  %v1574_v7 = vpop.f32.mrb[9].mxu0 }
 0x14b   : > { %v1575_v8 = vadd.f32 %v1574_v7, %v1573_v4  ;;  %v1638_v9 = vpop.f32.mrb[9].mxu1  ;;  %v1576_v10 = vpop.f32.mrb[10].mxu0  ;;  %v463_v4 = vld [vmem:[#allocation2 + $0x50] sm:$0xff] }
 0x14c   : > { %1130 = vst [vmem:[#allocation2 + $0x18] sm:$0xff] %v1114_v5  ;;  %v1639_v11 = vadd.f32 %v1638_v9, %v1637_v6  ;;  %v1640_v12 = vpop.f32.mrb[10].mxu1  ;;  %v1577_v13 = vpop.f32.mrb[11].mxu0  ;;  %v464_v9 = vld [vmem:[#allocation2 + $0x58] sm:$0xff] }
 0x14d   : > { %v1578_v15 = vadd.f32 %v1577_v13, %v1576_v10  ;;  %v1641_v16 = vpop.f32.mrb[11].mxu1 }
 0x14e   : > { %v1065_v17 = vadd.f32 %v1639_v11, %v1575_v8  ;;  %v1642_v18 = vadd.f32 %v1641_v16, %v1640_v12 }
 0x150   : > { %v1115_v20 = vadd.f32 %v1065_v17, %v457_v14  ;;  %v1068_v21 = vadd.f32 %v1642_v18, %v1578_v15 }
 0x151   : > { %v1579_v22 = vpop.f32.mrb[12].mxu0 }
 0x152   : > { %1131 = vst [vmem:[#allocation2 + $0x20] sm:$0xff] %v1115_v20  ;;  %v1116_v23 = vadd.f32 %v1068_v21, %v458_v19  ;;  %v1643_v24 = vpop.f32.mrb[12].mxu1  ;;  %v1580_v25 = vpop.f32.mrb[13].mxu0 }
 0x153   : > { %v1581_v26 = vadd.f32 %v1580_v25, %v1579_v22  ;;  %v1644_v27 = vpop.f32.mrb[13].mxu1  ;;  %v1582_v28 = vpop.f32.mrb[14].mxu0  ;;  %v465_v22 = vld [vmem:[#allocation2 + $0x60] sm:$0xff] }
 0x154   : > { %1132 = vst [vmem:[#allocation2 + $0x28] sm:$0xff] %v1116_v23  ;;  %v1645_v29 = vadd.f32 %v1644_v27, %v1643_v24  ;;  %v1646_v30 = vpop.f32.mrb[14].mxu1  ;;  %v1583_v31 = vpop.f32.mrb[15].mxu0  ;;  %v466_v27 = vld [vmem:[#allocation2 + $0x68] sm:$0xff] }
 0x155   : > { %v1584_v33 = vadd.f32 %v1583_v31, %v1582_v28  ;;  %v1647_v34 = vpop.f32.mrb[15].mxu1 }
 0x156   : > { %v1073_v35 = vadd.f32 %v1645_v29, %v1581_v26  ;;  %v1648_v36 = vadd.f32 %v1647_v34, %v1646_v30 }
 0x158   : > { %v1117_v38 = vadd.f32 %v1073_v35, %v459_v32  ;;  %v1076_v39 = vadd.f32 %v1648_v36, %v1584_v33 }
 0x159   : > { %v1585_v40 = vpop.f32.mrb[16].mxu0 }
 0x15a   : > { %1133 = vst [vmem:[#allocation2 + $0x30] sm:$0xff] %v1117_v38  ;;  %v1118_v41 = vadd.f32 %v1076_v39, %v460_v37  ;;  %v1649_v42 = vpop.f32.mrb[16].mxu1  ;;  %v1586_v43 = vpop.f32.mrb[17].mxu0 }
 0x15b   : > { %v1587_v44 = vadd.f32 %v1586_v43, %v1585_v40  ;;  %v1650_v45 = vpop.f32.mrb[17].mxu1  ;;  %v1588_v46 = vpop.f32.mrb[18].mxu0  ;;  %v467_v40 = vld [vmem:[#allocation2 + $0x70] sm:$0xff] }
 0x15c   : > { %1134 = vst [vmem:[#allocation2 + $0x38] sm:$0xff] %v1118_v41  ;;  %v1651_v47 = vadd.f32 %v1650_v45, %v1649_v42  ;;  %v1652_v48 = vpop.f32.mrb[18].mxu1  ;;  %v1589_v49 = vpop.f32.mrb[19].mxu0  ;;  %v468_v45 = vld [vmem:[#allocation2 + $0x78] sm:$0xff] }
 0x15d   : > { %v1590_v51 = vadd.f32 %v1589_v49, %v1588_v46  ;;  %v1653_v52 = vpop.f32.mrb[19].mxu1  ;;  %v1147_v49 = vld [vmem:[#allocation2] sm:$0xff] (!%p1541_p13) }
 0x15e   : > { %v1081_v53 = vadd.f32 %v1651_v47, %v1587_v44  ;;  %v1654_v54 = vadd.f32 %v1653_v52, %v1652_v48  ;;  %1163 = vst [vmem:[%s2036_s15] sm:$0xff] (!%p1541_p13), %v1147_v49  ;;  %v1201_v52 = vmul.f32 (!%p1541_p13), %v1147_v49, %v1147_v49 }
 0x160   : > { %v1119_v56 = vadd.f32 %v1081_v53, %v461_v50  ;;  %v1084_v57 = vadd.f32 %v1654_v54, %v1590_v51  ;;  %v1148_v50 = vld [vmem:[#allocation2 + $0x8] sm:$0xff] (!%p1541_p13)  ;;  %v1149_v51 = vld [vmem:[#allocation2 + $0x10] sm:$0xff] (!%p1541_p13) }
 0x161   : > { %v1591_v58 = vpop.f32.mrb[20].mxu0  ;;  %1164 = vst [vmem:[%s2036_s15 + $0x8] sm:$0xff] (!%p1541_p13), %v1148_v50  ;;  %v1179_v53 = vadd.f32 (!%p1541_p13), %v1148_v50, %v1147_v49  ;;  %v1202_v54 = vmul.f32 (!%p1541_p13), %v1148_v50, %v1148_v50  ;;  %1165 = vst [vmem:[%s2036_s15 + $0x10] sm:$0xff] (!%p1541_p13), %v1149_v51 }
 0x162   : > { %1135 = vst [vmem:[#allocation2 + $0x40] sm:$0xff] %v1119_v56  ;;  %v1120_v59 = vadd.f32 %v1084_v57, %v462_v55  ;;  %v1655_v60 = vpop.f32.mrb[20].mxu1  ;;  %v1592_v61 = vpop.f32.mrb[21].mxu0  ;;  %v1203_v55 = vmul.f32 (!%p1541_p13), %v1149_v51, %v1149_v51  ;;  %v1150_v56 = vld [vmem:[#allocation2 + $0x18] sm:$0xff] (!%p1541_p13)  ;;  %v1151_v57 = vld [vmem:[#allocation2 + $0x20] sm:$0xff] (!%p1541_p13) }
 0x163   : > { %v1593_v62 = vadd.f32 %v1592_v61, %v1591_v58  ;;  %v1656_v63 = vpop.f32.mrb[21].mxu1  ;;  %v1594_v0 = vpop.f32.mrb[22].mxu0  ;;  %v1152_v58 = vld [vmem:[#allocation2 + $0x28] sm:$0xff] (!%p1541_p13)  ;;  %1166 = vst [vmem:[%s2036_s15 + $0x18] sm:$0xff] (!%p1541_p13), %v1150_v56  ;;  %1167 = vst [vmem:[%s2036_s15 + $0x20] sm:$0xff] (!%p1541_p13), %v1151_v57 }
 0x164   : > { %1136 = vst [vmem:[#allocation2 + $0x48] sm:$0xff] %v1120_v59  ;;  %v1657_v1 = vadd.f32 %v1656_v63, %v1655_v60  ;;  %v1658_v2 = vpop.f32.mrb[22].mxu1  ;;  %v1595_v3 = vpop.f32.mrb[23].mxu0  ;;  %1168 = vst [vmem:[%s2036_s15 + $0x28] sm:$0xff] (!%p1541_p13), %v1152_v58  ;;  %v1153_v59 = vld [vmem:[#allocation2 + $0x30] sm:$0xff] (!%p1541_p13)  ;;  %v1154_v60 = vld [vmem:[#allocation2 + $0x38] sm:$0xff] (!%p1541_p13)  ;;  %v1180_v63 = vadd.f32 (!%p1541_p13), %v1179_v53, %v1149_v51 }
 0x165   : > { %v1596_v5 = vadd.f32 %v1595_v3, %v1594_v0  ;;  %v1659_v6 = vpop.f32.mrb[23].mxu1  ;;  %v1204_v0 = vmul.f32 (!%p1541_p13), %v1150_v56, %v1150_v56  ;;  %1169 = vst [vmem:[%s2036_s15 + $0x30] sm:$0xff] (!%p1541_p13), %v1153_v59  ;;  %1170 = vst [vmem:[%s2036_s15 + $0x38] sm:$0xff] (!%p1541_p13), %v1154_v60 }
 0x166   : > { %v1089_v7 = vadd.f32 %v1657_v1, %v1593_v62  ;;  %v1660_v8 = vadd.f32 %v1659_v6, %v1658_v2  ;;  %v1217_v62 = vadd.f32 (!%p1541_p13), %v1202_v54, %v1201_v52 }
 0x168   : > { %v1121_v10 = vadd.f32 %v1089_v7, %v463_v4  ;;  %v1092_v11 = vadd.f32 %v1660_v8, %v1596_v5  ;;  %v1218_v7 = vadd.f32 (!%p1541_p13), %v1217_v62, %v1203_v55  ;;  %v1181_v8 = vadd.f32 (!%p1541_p13), %v1180_v63, %v1150_v56 }
 0x169   : > { %v1597_v12 = vpop.f32.mrb[24].mxu0  ;;  %v1155_v61 = vld [vmem:[#allocation2 + $0x40] sm:$0xff] (!%p1541_p13) }
 0x16a   : > { %1137 = vst [vmem:[#allocation2 + $0x50] sm:$0xff] %v1121_v10  ;;  %v1122_v13 = vadd.f32 %v1092_v11, %v464_v9  ;;  %v1661_v14 = vpop.f32.mrb[24].mxu1  ;;  %v1598_v15 = vpop.f32.mrb[25].mxu0  ;;  %1171 = vst [vmem:[%s2036_s15 + $0x40] sm:$0xff] (!%p1541_p13), %v1155_v61  ;;  %v1205_v9 = vmul.f32 (!%p1541_p13), %v1151_v57, %v1151_v57  ;;  %v1219_v11 = vadd.f32 (!%p1541_p13), %v1218_v7, %v1204_v0 }
 0x16b   : > { %v1599_v16 = vadd.f32 %v1598_v15, %v1597_v12  ;;  %v1662_v17 = vpop.f32.mrb[25].mxu1  ;;  %v1600_v18 = vpop.f32.mrb[26].mxu0  ;;  %v1156_v1 = vld [vmem:[#allocation2 + $0x48] sm:$0xff] (!%p1541_p13)  ;;  %v1182_v12 = vadd.f32 (!%p1541_p13), %v1181_v8, %v1151_v57 }
 0x16c   : > { %1138 = vst [vmem:[#allocation2 + $0x58] sm:$0xff] %v1122_v13  ;;  %v1663_v19 = vadd.f32 %v1662_v17, %v1661_v14  ;;  %v1664_v20 = vpop.f32.mrb[26].mxu1  ;;  %v1601_v21 = vpop.f32.mrb[27].mxu0  ;;  %1172 = vst [vmem:[%s2036_s15 + $0x48] sm:$0xff] (!%p1541_p13), %v1156_v1  ;;  %v1206_v13 = vmul.f32 (!%p1541_p13), %v1152_v58, %v1152_v58  ;;  %v1220_v14 = vadd.f32 (!%p1541_p13), %v1219_v11, %v1205_v9 }
 0x16d   : > { %v1602_v23 = vadd.f32 %v1601_v21, %v1600_v18  ;;  %v1665_v24 = vpop.f32.mrb[27].mxu1  ;;  %v1183_v15 = vadd.f32 (!%p1541_p13), %v1182_v12, %v1152_v58 }
 0x16e   : > { %v1097_v25 = vadd.f32 %v1663_v19, %v1599_v16  ;;  %v1666_v26 = vadd.f32 %v1665_v24, %v1664_v20  ;;  %v1207_v16 = vmul.f32 (!%p1541_p13), %v1153_v59, %v1153_v59  ;;  %v1221_v17 = vadd.f32 (!%p1541_p13), %v1220_v14, %v1206_v13 }
 0x16f   : > { %v1184_v18 = vadd.f32 (!%p1541_p13), %v1183_v15, %v1153_v59  ;;  %v1208_v19 = vmul.f32 (!%p1541_p13), %v1154_v60, %v1154_v60 }
 0x170   : > { %v1123_v28 = vadd.f32 %v1097_v25, %v465_v22  ;;  %v1100_v29 = vadd.f32 %v1666_v26, %v1602_v23  ;;  %v1222_v20 = vadd.f32 (!%p1541_p13), %v1221_v17, %v1207_v16  ;;  %v1209_v22 = vmul.f32 (!%p1541_p13), %v1155_v61, %v1155_v61 }
 0x171   : > { %v1603_v30 = vpop.f32.mrb[28].mxu0  ;;  %v1157_v2 = vld [vmem:[#allocation2 + $0x50] sm:$0xff] (!%p1541_p13)  ;;  %v1185_v21 = vadd.f32 (!%p1541_p13), %v1184_v18, %v1154_v60  ;;  %v1210_v25 = vmul.f32 (!%p1541_p13), %v1156_v1, %v1156_v1 }
 0x172   : > { %1139 = vst [vmem:[#allocation2 + $0x60] sm:$0xff] %v1123_v28  ;;  %v1124_v31 = vadd.f32 %v1100_v29, %v466_v27  ;;  %v1667_v32 = vpop.f32.mrb[28].mxu1  ;;  %v1604_v33 = vpop.f32.mrb[29].mxu0  ;;  %1173 = vst [vmem:[%s2036_s15 + $0x50] sm:$0xff] (!%p1541_p13), %v1157_v2  ;;  %v1223_v23 = vadd.f32 (!%p1541_p13), %v1222_v20, %v1208_v19  ;;  %v1211_v28 = vmul.f32 (!%p1541_p13), %v1157_v2, %v1157_v2 }
 0x173   : > { %v1605_v34 = vadd.f32 %v1604_v33, %v1603_v30  ;;  %v1668_v35 = vpop.f32.mrb[29].mxu1  ;;  %v1606_v36 = vpop.f32.mrb[30].mxu0  ;;  %v1158_v3 = vld [vmem:[#allocation2 + $0x58] sm:$0xff] (!%p1541_p13)  ;;  %v1186_v24 = vadd.f32 (!%p1541_p13), %v1185_v21, %v1155_v61 }
 0x174   : > { %1140 = vst [vmem:[#allocation2 + $0x68] sm:$0xff] %v1124_v31  ;;  %v1669_v37 = vadd.f32 %v1668_v35, %v1667_v32  ;;  %v1670_v38 = vpop.f32.mrb[30].mxu1  ;;  %v1607_v39 = vpop.f32.mrb[31].mxu0  ;;  %1174 = vst [vmem:[%s2036_s15 + $0x58] sm:$0xff] (!%p1541_p13), %v1158_v3  ;;  %v1224_v26 = vadd.f32 (!%p1541_p13), %v1223_v23, %v1209_v22  ;;  %v1212_v31 = vmul.f32 (!%p1541_p13), %v1158_v3, %v1158_v3 }
 0x175   : > { %v1608_v41 = vadd.f32 %v1607_v39, %v1606_v36  ;;  %v1671_v42 = vpop.f32.mrb[31].mxu1  ;;  %v1187_v27 = vadd.f32 (!%p1541_p13), %v1186_v24, %v1156_v1 }
 0x176   : > { %v1105_v43 = vadd.f32 %v1669_v37, %v1605_v34  ;;  %v1672_v44 = vadd.f32 %v1671_v42, %v1670_v38  ;;  %1146 = sbr.rel (%p1541_p13) target bundleno = 405 (0x195), region = 59  ;;  %v1225_v29 = vadd.f32 (!%p1541_p13), %v1224_v26, %v1210_v25 }
 0x177   : > { %v1188_v30 = vadd.f32 (!%p1541_p13), %v1187_v27, %v1157_v2 }
 0x178   : > { %v1125_v46 = vadd.f32 %v1105_v43, %v467_v40  ;;  %v1108_v47 = vadd.f32 %v1672_v44, %v1608_v41  ;;  %v1226_v32 = vadd.f32 (!%p1541_p13), %v1225_v29, %v1211_v28 }
 0x179   : > { %v1159_v4 = vld [vmem:[#allocation2 + $0x60] sm:$0xff] (!%p1541_p13)  ;;  %v1189_v33 = vadd.f32 (!%p1541_p13), %v1188_v30, %v1158_v3 }
 0x17a   : > { %1141 = vst [vmem:[#allocation2 + $0x70] sm:$0xff] %v1125_v46  ;;  %v1126_v48 = vadd.f32 %v1108_v47, %v468_v45  ;;  %1175 = vst [vmem:[%s2036_s15 + $0x60] sm:$0xff] (!%p1541_p13), %v1159_v4  ;;  %v1213_v34 = vmul.f32 (!%p1541_p13), %v1159_v4, %v1159_v4  ;;  %v1227_v35 = vadd.f32 (!%p1541_p13), %v1226_v32, %v1212_v31 }
 0x17b   : > { %v1160_v5 = vld [vmem:[#allocation2 + $0x68] sm:$0xff] (!%p1541_p13)  ;;  %v1190_v36 = vadd.f32 (!%p1541_p13), %v1189_v33, %v1159_v4 }
 0x17c   : > { %1142 = vst [vmem:[#allocation2 + $0x78] sm:$0xff] %v1126_v48  ;;  %1176 = vst [vmem:[%s2036_s15 + $0x68] sm:$0xff] (!%p1541_p13), %v1160_v5  ;;  %v1214_v37 = vmul.f32 (!%p1541_p13), %v1160_v5, %v1160_v5  ;;  %v1228_v38 = vadd.f32 (!%p1541_p13), %v1227_v35, %v1213_v34 }
 0x17d   : > { %v1191_v39 = vadd.f32 %v1190_v36, %v1160_v5 }
 0x17e   : > { %v1229_v41 = vadd.f32 %v1228_v38, %v1214_v37 }
 0x181   : > { %v1161_v6 = vld [vmem:[#allocation2 + $0x70] sm:$0xff] }
 0x182   : > { %1177 = vst [vmem:[%s2036_s15 + $0x70] sm:$0xff] %v1161_v6  ;;  %v1215_v40 = vmul.f32 %v1161_v6, %v1161_v6  ;;  %v1192_v42 = vadd.f32 %v1191_v39, %v1161_v6 }
 0x183   : > { %v1162_v10 = vld [vmem:[#allocation2 + $0x78] sm:$0xff] }
 0x184   : > { %1178 = vst [vmem:[%s2036_s15 + $0x78] sm:$0xff] %v1162_v10  ;;  %v1216_v43 = vmul.f32 %v1162_v10, %v1162_v10  ;;  %v1230_v44 = vadd.f32 %v1229_v41, %v1215_v40  ;;  %v1193_v45 = vadd.f32 %v1192_v42, %v1162_v10 }
 0x186   : > { %v1194_v46 = vrot.slane %v1193_v45, 4  ;;  %v1231_v47 = vadd.f32 %v1230_v44, %v1216_v43 }
 0x188   : > { %v1195_v48 = vadd.f32 %v1194_v46, %v1193_v45  ;;  %v1232_v49 = vrot.slane %v1231_v47, 4 }
 0x18a   : > { %v1196_v50 = vrot.slane %v1195_v48, 2  ;;  %v1233_v51 = vadd.f32 %v1232_v49, %v1231_v47 }
 0x18c   : > { %v1197_v52 = vadd.f32 %v1196_v50, %v1195_v48  ;;  %v1234_v53 = vrot.slane %v1233_v51, 2 }
 0x18e   : > { %v1198_v54 = vrot.slane %v1197_v52, 1  ;;  %v1235_v55 = vadd.f32 %v1234_v53, %v1233_v51 }
 0x190   : > { %v1199_v56 = vadd.f32 %v1198_v54, %v1197_v52  ;;  %v1236_v57 = vrot.slane %v1235_v55, 1 }
 0x192   : > { %1200 = vst [vmem:[%s422_s29] sm:$0x1] %v1199_v56  ;;  %v1237_v58 = vadd.f32 %v1236_v57, %v1235_v55 }
 0x194   : > { %1238 = vst [vmem:[%s431_s10] sm:$0x1] %v1237_v58 }
 0x195 PF: > { %s15_s21 = sadd.s32 1, %s1864_s21   ;;  %s2169_s15 = smov %s1844_s16 }
 0x196   : > { %p12_p0 = scmp.ge.s32.totalorder %s15_s21, 10   ;;  %s2170_s16 = smov %s1943_s28 }
 0x197   : > { %s2171_s17 = smov %s1856_s19  ;;  %s2172_s18 = smov %s1860_s20 }
 0x198   : > { %s2173_s19 = smov %s2176_s22  ;;  %s2174_s20 = smov %s2180_s23 }
 0x199   :  { %14 = sbr.rel (!%p12_p0) target bundleno = 6 (0x6), region = 121 }

// kernel: generator_forward.12
= control target key start
LH: loop header
LB: loop body
LE: loop exit
PB: predicated region body
PF: predicated region fallthrough
CT: control target
= control target key end

     0   :  { %s740_s12 = smov 0   ;;  %s887_s0 = inlined_call_operand.vmem [shape: f32[512,128], index: 0, kind: input, shape index: {}]   ;;  %s888_s1 = inlined_call_operand.vmem [shape: f32[1,128], index: 1, kind: input, shape index: {}]   ;;  %s889_s2 = inlined_call_operand.vmem [shape: f32[1,128], index: 2, kind: input, shape index: {}]   ;;  %s890_s3 = inlined_call_operand.vmem [shape: bf16[512,128], index: 3, kind: output, shape index: {}]  }
   0x1 LB: > { %s532_s13 = sadd.s32 4294967295, %s718_s12   ;;  %p536_p0 = scmp.ge.s32.totalorder %s718_s12, 1  ;;  %s718_s12 = sphi %s740_s12, %s13_s12  }
   0x2   : > { %p138_p1 = scmp.lt.s32.totalorder %s718_s12, 3 }
   0x4   : > { %p139_p2 = pnand %p536_p0, %p138_p1 }
   0x5   : > { %s537_s14 = sshll.u32 (!%p139_p2), %s532_s13, 5  ;;  %v754_v0 = vld [vmem:[%s888_s1] ss:$0 sm:$0xff] (!%p139_p2) }
   0x6   : > { %142 = sbr.rel (%p139_p2) target bundleno = 51 (0x33), region = 32  ;;  %p163_p3 = scmp.lt.s32.totalorder (!%p139_p2), %s537_s14, 63  ;;  %v764_v1 = vld [vmem:[%s889_s2] ss:$0 sm:$0xff] (!%p139_p2) }
   0xd   : > { %s892_s14 = smov (!%p163_p3, %s537_s14), 63 }
   0xe   : > { %s538_s15 = sshll.u32 %s892_s14, 3  ;;  %s540_s23 = sshll.u32 %s892_s14, 2 }
   0xf   : > { %s759_s20 = scalar_lea.vmem %s887_s0, %s538_s15  ;;  %s796_s26 = scalar_lea.vmem %s890_s3, %s540_s23 }
  0x10   : > { %v174_v2 = vld [vmem:[%s759_s20] sm:$0xff]  ;;  %v175_v3 = vld [vmem:[%s759_s20 + $0x8] sm:$0xff]  ;;  %v176_v4 = vld [vmem:[%s759_s20 + $0x10] sm:$0xff] }
  0x11   : > { %v213_v5 = vmul.f32 %v754_v0, %v174_v2  ;;  %v214_v6 = vmul.f32 %v754_v0, %v175_v3  ;;  %v177_v7 = vld [vmem:[%s759_s20 + $0x18] sm:$0xff]  ;;  %v215_v8 = vmul.f32 %v754_v0, %v176_v4  ;;  %v178_v9 = vld [vmem:[%s759_s20 + $0x20] sm:$0xff]  ;;  %v179_v10 = vld [vmem:[%s759_s20 + $0x28] sm:$0xff] }
  0x12   : > { %v216_v11 = vmul.f32 %v754_v0, %v177_v7  ;;  %v217_v12 = vmul.f32 %v754_v0, %v178_v9  ;;  %v218_v13 = vmul.f32 %v754_v0, %v179_v10  ;;  %v180_v14 = vld [vmem:[%s759_s20 + $0x30] sm:$0xff]  ;;  %v181_v15 = vld [vmem:[%s759_s20 + $0x38] sm:$0xff]  ;;  %v182_v24 = vld [vmem:[%s759_s20 + $0x40] sm:$0xff] }
  0x13   : > { %v252_v16 = vadd.f32 %v764_v1, %v213_v5  ;;  %v253_v17 = vadd.f32 %v764_v1, %v214_v6  ;;  %v254_v18 = vadd.f32 %v764_v1, %v215_v8  ;;  %v219_v19 = vmul.f32 %v754_v0, %v180_v14  ;;  %v183_v25 = vld [vmem:[%s759_s20 + $0x48] sm:$0xff]  ;;  %v184_v30 = vld [vmem:[%s759_s20 + $0x50] sm:$0xff]  ;;  %v185_v35 = vld [vmem:[%s759_s20 + $0x58] sm:$0xff] }
  0x14   : > { %v255_v20 = vadd.f32 %v764_v1, %v216_v11  ;;  %v256_v21 = vadd.f32 %v764_v1, %v217_v12  ;;  %v257_v22 = vadd.f32 %v764_v1, %v218_v13  ;;  %v220_v23 = vmul.f32 %v754_v0, %v181_v15  ;;  %v186_v36 = vld [vmem:[%s759_s20 + $0x60] sm:$0xff]  ;;  %v187_v41 = vld [vmem:[%s759_s20 + $0x68] sm:$0xff]  ;;  %v188_v42 = vld [vmem:[%s759_s20 + $0x70] sm:$0xff] }
  0x15   : > { %v284_v26 = vmax.f32 %v252_v16, 0.0  ;;  %v285_v27 = vmax.f32 %v253_v17, 0.0  ;;  %v286_v28 = vmax.f32 %v254_v18, 0.0  ;;  %v258_v29 = vadd.f32 %v764_v1, %v219_v19  ;;  %v189_v51 = vld [vmem:[%s759_s20 + $0x78] sm:$0xff]  ;;  %v190_v56 = vld [vmem:[%s759_s20 + $0x80] sm:$0xff]  ;;  %v191_v61 = vld [vmem:[%s759_s20 + $0x88] sm:$0xff] }
  0x16   : > { %v287_v31 = vmax.f32 %v255_v20, 0.0  ;;  %v288_v32 = vmax.f32 %v256_v21, 0.0  ;;  %v289_v33 = vmax.f32 %v257_v22, 0.0  ;;  %v259_v34 = vadd.f32 %v764_v1, %v220_v23  ;;  %v192_v4 = vld [vmem:[%s759_s20 + $0x90] sm:$0xff]  ;;  %v193_v5 = vld [vmem:[%s759_s20 + $0x98] sm:$0xff]  ;;  %v194_v10 = vld [vmem:[%s759_s20 + $0xa0] sm:$0xff] }
  0x17   : > { %v612_v37 = vpack.c.bf16 %v285_v27, %v284_v26  ;;  %v290_v38 = vmax.f32 %v258_v29, 0.0  ;;  %v221_v39 = vmul.f32 %v754_v0, %v182_v24  ;;  %v222_v40 = vmul.f32 %v754_v0, %v183_v25  ;;  %v195_v15 = vld [vmem:[%s759_s20 + $0xa8] sm:$0xff]  ;;  %v196_v20 = vld [vmem:[%s759_s20 + $0xb0] sm:$0xff]  ;;  %v197_v25 = vld [vmem:[%s759_s20 + $0xb8] sm:$0xff] }
  0x18   : > { %v617_v43 = vpack.c.bf16 %v287_v31, %v286_v28  ;;  %v622_v44 = vpack.c.bf16 %v289_v33, %v288_v32  ;;  %v291_v45 = vmax.f32 %v259_v34, 0.0  ;;  %v223_v46 = vmul.f32 %v754_v0, %v184_v30  ;;  %v198_v30 = vld [vmem:[%s759_s20 + $0xc0] sm:$0xff] }
  0x19   : > { %613 = vst [vmem:[%s796_s26] sm:$0xff] %v612_v37   ;;  %v260_v47 = vadd.f32 %v764_v1, %v221_v39  ;;  %v261_v48 = vadd.f32 %v764_v1, %v222_v40  ;;  %v224_v49 = vmul.f32 %v754_v0, %v185_v35  ;;  %v225_v50 = vmul.f32 %v754_v0, %v186_v36  ;;  %v199_v35 = vld [vmem:[%s759_s20 + $0xc8] sm:$0xff]  ;;  %v200_v40 = vld [vmem:[%s759_s20 + $0xd0] sm:$0xff] }
  0x1a   : > { %689 = vst [vmem:[%s796_s26 + $0x8] sm:$0xff] %v617_v43   ;;  %690 = vst [vmem:[%s796_s26 + $0x10] sm:$0xff] %v622_v44   ;;  %v627_v52 = vpack.c.bf16 %v291_v45, %v290_v38  ;;  %v262_v53 = vadd.f32 %v764_v1, %v223_v46  ;;  %v226_v54 = vmul.f32 %v754_v0, %v187_v41  ;;  %v201_v41 = vld [vmem:[%s759_s20 + $0xd8] sm:$0xff]  ;;  %v202_v46 = vld [vmem:[%s759_s20 + $0xe0] sm:$0xff] }
  0x1b   : > { %v227_v55 = vmul.f32 %v754_v0, %v188_v42  ;;  %v292_v57 = vmax.f32 %v260_v47, 0.0  ;;  %v293_v58 = vmax.f32 %v261_v48, 0.0  ;;  %v263_v59 = vadd.f32 %v764_v1, %v224_v49 }
  0x1c   : > { %v264_v60 = vadd.f32 %v764_v1, %v225_v50  ;;  %691 = vst [vmem:[%s796_s26 + $0x18] sm:$0xff] %v627_v52   ;;  %v294_v62 = vmax.f32 %v262_v53, 0.0  ;;  %v265_v63 = vadd.f32 %v764_v1, %v226_v54  ;;  %v228_v2 = vmul.f32 %v754_v0, %v189_v51  ;;  %v203_v51 = vld [vmem:[%s759_s20 + $0xe8] sm:$0xff] }
  0x1d   : > { %v266_v3 = vadd.f32 %v764_v1, %v227_v55  ;;  %v632_v6 = vpack.c.bf16 %v293_v58, %v292_v57  ;;  %v295_v7 = vmax.f32 %v263_v59, 0.0  ;;  %v229_v9 = vmul.f32 %v754_v0, %v190_v56  ;;  %v204_v56 = vld [vmem:[%s759_s20 + $0xf0] sm:$0xff] }
  0x1e   : > { %v296_v8 = vmax.f32 %v264_v60, 0.0  ;;  %v297_v11 = vmax.f32 %v265_v63, 0.0  ;;  %v267_v12 = vadd.f32 %v764_v1, %v228_v2  ;;  %v230_v14 = vmul.f32 %v754_v0, %v191_v61  ;;  %v205_v61 = vld [vmem:[%s759_s20 + $0xf8] sm:$0xff] }
  0x1f   : > { %v298_v13 = vmax.f32 %v266_v3, 0.0  ;;  %692 = vst [vmem:[%s796_s26 + $0x20] sm:$0xff] %v632_v6   ;;  %v637_v16 = vpack.c.bf16 %v295_v7, %v294_v62  ;;  %v268_v17 = vadd.f32 %v764_v1, %v229_v9  ;;  %v231_v18 = vmul.f32 %v754_v0, %v192_v4 }
  0x20   : > { %v232_v19 = vmul.f32 %v754_v0, %v193_v5  ;;  %v642_v21 = vpack.c.bf16 %v297_v11, %v296_v8  ;;  %v299_v22 = vmax.f32 %v267_v12, 0.0  ;;  %v269_v23 = vadd.f32 %v764_v1, %v230_v14 }
  0x21   : > { %v233_v24 = vmul.f32 %v754_v0, %v194_v10  ;;  %693 = vst [vmem:[%s796_s26 + $0x28] sm:$0xff] %v637_v16   ;;  %v300_v26 = vmax.f32 %v268_v17, 0.0  ;;  %v270_v27 = vadd.f32 %v764_v1, %v231_v18  ;;  %v234_v29 = vmul.f32 %v754_v0, %v195_v15 }
  0x22   : > { %v271_v28 = vadd.f32 %v764_v1, %v232_v19  ;;  %694 = vst [vmem:[%s796_s26 + $0x30] sm:$0xff] %v642_v21   ;;  %v647_v31 = vpack.c.bf16 %v299_v22, %v298_v13  ;;  %v301_v32 = vmax.f32 %v269_v23, 0.0  ;;  %v235_v34 = vmul.f32 %v754_v0, %v196_v20 }
  0x23   : > { %v272_v33 = vadd.f32 %v764_v1, %v233_v24  ;;  %v302_v36 = vmax.f32 %v270_v27, 0.0  ;;  %v273_v38 = vadd.f32 %v764_v1, %v234_v29  ;;  %v236_v39 = vmul.f32 %v754_v0, %v197_v25 }
  0x24   : > { %v303_v37 = vmax.f32 %v271_v28, 0.0  ;;  %695 = vst [vmem:[%s796_s26 + $0x38] sm:$0xff] %v647_v31   ;;  %v652_v42 = vpack.c.bf16 %v301_v32, %v300_v26  ;;  %v274_v44 = vadd.f32 %v764_v1, %v235_v34  ;;  %v237_v45 = vmul.f32 %v754_v0, %v198_v30 }
  0x25   : > { %v304_v43 = vmax.f32 %v272_v33, 0.0  ;;  %v305_v48 = vmax.f32 %v273_v38, 0.0  ;;  %v275_v49 = vadd.f32 %v764_v1, %v236_v39  ;;  %v238_v50 = vmul.f32 %v754_v0, %v199_v35 }
  0x26   : > { %v657_v47 = vpack.c.bf16 %v303_v37, %v302_v36  ;;  %696 = vst [vmem:[%s796_s26 + $0x40] sm:$0xff] %v652_v42   ;;  %v306_v52 = vmax.f32 %v274_v44, 0.0  ;;  %v276_v53 = vadd.f32 %v764_v1, %v237_v45  ;;  %v239_v54 = vmul.f32 %v754_v0, %v200_v40 }
  0x27   : > { %v240_v55 = vmul.f32 %v754_v0, %v201_v41  ;;  %v662_v57 = vpack.c.bf16 %v305_v48, %v304_v43  ;;  %v307_v58 = vmax.f32 %v275_v49, 0.0  ;;  %v277_v59 = vadd.f32 %v764_v1, %v238_v50 }
  0x28   : > { %697 = vst [vmem:[%s796_s26 + $0x48] sm:$0xff] %v657_v47   ;;  %v241_v60 = vmul.f32 %v754_v0, %v202_v46  ;;  %v308_v62 = vmax.f32 %v276_v53, 0.0  ;;  %v278_v63 = vadd.f32 %v764_v1, %v239_v54  ;;  %v242_v3 = vmul.f32 %v754_v0, %v203_v51 }
  0x29   : > { %v279_v2 = vadd.f32 %v764_v1, %v240_v55  ;;  %698 = vst [vmem:[%s796_s26 + $0x50] sm:$0xff] %v662_v57   ;;  %v667_v4 = vpack.c.bf16 %v307_v58, %v306_v52  ;;  %v309_v5 = vmax.f32 %v277_v59, 0.0  ;;  %v243_v7 = vmul.f32 %v754_v0, %v204_v56 }
  0x2a   : > { %v280_v6 = vadd.f32 %v764_v1, %v241_v60  ;;  %v310_v8 = vmax.f32 %v278_v63, 0.0  ;;  %v281_v10 = vadd.f32 %v764_v1, %v242_v3  ;;  %v244_v11 = vmul.f32 %v754_v0, %v205_v61 }
  0x2b   : > { %v311_v9 = vmax.f32 %v279_v2, 0.0  ;;  %699 = vst [vmem:[%s796_s26 + $0x58] sm:$0xff] %v667_v4   ;;  %v672_v12 = vpack.c.bf16 %v309_v5, %v308_v62  ;;  %v282_v14 = vadd.f32 %v764_v1, %v243_v7 }
  0x2c   : > { %v312_v13 = vmax.f32 %v280_v6, 0.0  ;;  %v313_v16 = vmax.f32 %v281_v10, 0.0  ;;  %v283_v17 = vadd.f32 %v764_v1, %v244_v11 }
  0x2d   : > { %v677_v15 = vpack.c.bf16 %v311_v9, %v310_v8  ;;  %700 = vst [vmem:[%s796_s26 + $0x60] sm:$0xff] %v672_v12   ;;  %v314_v18 = vmax.f32 %v282_v14, 0.0 }
  0x2e   : > { %v682_v19 = vpack.c.bf16 %v313_v16, %v312_v13  ;;  %v315_v20 = vmax.f32 %v283_v17, 0.0 }
  0x2f   : > { %701 = vst [vmem:[%s796_s26 + $0x68] sm:$0xff] %v677_v15  }
  0x30   : > { %702 = vst [vmem:[%s796_s26 + $0x70] sm:$0xff] %v682_v19   ;;  %v687_v21 = vpack.c.bf16 %v315_v20, %v314_v18 }
  0x32   : > { %703 = vst [vmem:[%s796_s26 + $0x78] sm:$0xff] %v687_v21  }
  0x33 PF: > { %s13_s12 = sadd.s32 1, %s718_s12  }
  0x34   : > { %p10_p4 = scmp.ge.s32.totalorder %s13_s12, 4  }
  0x36   :  { %12 = sbr.rel (!%p10_p4) target bundleno = 1 (0x1), region = 62 }

// kernel: tile.13
= control target key start
LH: loop header
LB: loop body
LE: loop exit
PB: predicated region body
PF: predicated region fallthrough
CT: control target
= control target key end

     0   :  { %s28_s0 = inlined_call_operand.vmem [shape: f32[64], index: 0, kind: input, shape index: {}]   ;;  %s29_s1 = inlined_call_operand.vmem [shape: f32[16,64], index: 1, kind: output, shape index: {}]  }
   0x1   :  { %v4_v0 = vld [vmem:[%s28_s0] ss:$0 sm:$0xff] }
   0x2   :  { %5 = vst [vmem:[%s29_s1] sm:$0xff] %v4_v0  ;;  %8 = vst [vmem:[%s29_s1 + $0x8] sm:$0xff] %v4_v0 }

// kernel: generator_forward.13
= control target key start
LH: loop header
LB: loop body
LE: loop exit
PB: predicated region body
PF: predicated region fallthrough
CT: control target
= control target key end

     0   :  { %s2455_s15 = smov 0   ;;  %s2457_s16 = smov 0   ;;  %s2667_s0 = inlined_call_operand.vmem [shape: bf16[4,512,512], index: 0, kind: input, shape index: {}]   ;;  %s2668_s1 = inlined_call_operand.vmem [shape: bf16[4,512,128], index: 1, kind: input, shape index: {}]   ;;  %s2669_s2 = inlined_call_operand.vmem [shape: f32[4,512,128], index: 2, kind: output, shape index: {0}]   ;;  %s2670_s3 = inlined_call_operand.vmem [shape: f32[4,2,1,128], index: 3, kind: output, shape index: {1}]   ;;  %s2671_s4 = inlined_call_operand.vmem [shape: f32[4,2,1,128], index: 4, kind: output, shape index: {2}]  }
   0x1   :  { %s2459_s17 = smov 0   ;;  %s2461_s18 = smov 0  }
   0x2   :  { %s2463_s19 = smov 0  }
   0x3 LB: > { %s37_s20 = sadd.s32 1, %s2420_s17  ;;  %s41_s21 = sadd.s32 1, %s2424_s18  ;;  %s2428_s19 = sphi %s2463_s19, %s15_s19   ;;  %s2424_s18 = sphi %s2461_s18, %s2675_s18   ;;  %s2420_s17 = sphi %s2459_s17, %s2674_s17   ;;  %s2416_s16 = sphi %s2457_s16, %s2673_s16   ;;  %s2412_s15 = sphi %s2455_s15, %s2672_s15  }
   0x4   : > { %p39_p0 = scmp.ge.s32.totalorder %s37_s20, 2  ;;  %p1887_p1 = scmp.ge.s32.totalorder %s2428_s19, 1 }
   0x5   : > { %p242_p2 = scmp.lt.s32.totalorder %s2428_s19, 9 }
   0x6   : > { %s2677_s20 = smov (%p39_p0, %s37_s20), 0  ;;  %s2679_s21 = smov (!%p39_p0, %s41_s21), %s2424_s18 }
   0x7   : > { %p243_p3 = pnand %p1887_p1, %p242_p2  ;;  %p43_p4 = scmp.ge.s32.totalorder %s2679_s21, 4 }
   0x8   : > { %p318_p5 = scmp.lt.s32.totalorder (!%p243_p3), %s2416_s16, 3  ;;  %s1888_s26 = sshll.u32 (!%p243_p3), %s2412_s15, 5 }
   0x9   : > { %s2681_s21 = smov (%p43_p4, %s2679_s21), 0  ;;  %246 = sbr.rel (%p243_p3) target bundleno = 410 (0x19a), region = 28 }
   0xa   : > { %p320_p6 = scmp.lt.s32.totalorder (!%p243_p3), %s1888_s26, 63  ;;  %p360_p7 = scmp.lt.s32.totalorder (!%p243_p3), %s2412_s15, 1 }
  0x10   : > { %s2683_s16 = smov (!%p318_p5, %s2416_s16), 3  ;;  %s2685_s26 = smov (!%p320_p6, %s1888_s26), 63 }
  0x11   : > { %s1890_s22 = sshll.u32 %s2683_s16, 8  ;;  %s1889_s27 = sshll.u32 %s2685_s26, 2 }
  0x12   : > { %s2495_s25 = scalar_lea.vmem %s2668_s1, %s1890_s22  ;;  %s327_s28 = sadd.s32 %s1890_s22, %s1889_s27 }
  0x13   : > { %v2262_v0 = vld [vmem:[%s2495_s25 + $0x40] sm:$0xff]   ;;  %v2266_v4 = vld [vmem:[%s2495_s25 + $0x48] sm:$0xff]   ;;  %v2270_v8 = vld [vmem:[%s2495_s25 + $0x50] sm:$0xff]   ;;  %s1891_s29 = sshll.u32 %s327_s28, 2  ;;  %s1895_s7 = sshll.u32 %s2683_s16, 6 }
  0x14   : > { %v2263_v1 = vld [vmem:[%s2495_s25 + $0xc0] sm:$0xff]   ;;  %1998 = vmatprep.subr.bf16.mxu0 %v2262_v0  ;;  %v2267_v5 = vld [vmem:[%s2495_s25 + $0xc8] sm:$0xff]   ;;  %v2271_v9 = vld [vmem:[%s2495_s25 + $0xd0] sm:$0xff]   ;;  %s2536_s6 = scalar_lea.vmem %s2667_s0, %s1891_s29  ;;  %s354_s8 = sadd.s32 %s1895_s7, %s2685_s26 }
  0x15   : > { %v2264_v2 = vld [vmem:[%s2495_s25] sm:$0xff]   ;;  %2110 = vmatprep.subr.bf16.mxu1 %v2263_v1  ;;  %v2268_v6 = vld [vmem:[%s2495_s25 + $0x8] sm:$0xff]   ;;  %v2272_v10 = vld [vmem:[%s2495_s25 + $0x10] sm:$0xff]   ;;  %s1896_s9 = sshll.u32 %s354_s8, 3  ;;  %s2687_s15 = smov (!%p360_p7, %s2412_s15), 1 }
  0x16   : > { %v2265_v3 = vld [vmem:[%s2495_s25 + $0x80] sm:$0xff]   ;;  %1999 = vmatpush3.bf16.msra.mxu0 %v2264_v2  ;;  %v2269_v7 = vld [vmem:[%s2495_s25 + $0x88] sm:$0xff]   ;;  %v2273_v11 = vld [vmem:[%s2495_s25 + $0x90] sm:$0xff]   ;;  %s2609_s12 = scalar_lea.vmem %s2669_s2, %s1896_s9  ;;  %s1897_s13 = sshll.u32 %s2683_s16, 1 }
  0x17   : > { %2111 = vmatpush3.bf16.msra.mxu1 %v2265_v3  ;;  %2000 = vmatprep.subr.bf16.mxu0 %v2266_v4  ;;  %v2274_v12 = vld [vmem:[%s2495_s25 + $0x58] sm:$0xff]   ;;  %v2278_v16 = vld [vmem:[%s2495_s25 + $0x60] sm:$0xff]   ;;  %v2282_v20 = vld [vmem:[%s2495_s25 + $0x68] sm:$0xff]   ;;  %s366_s14 = sadd.s32 %s1897_s13, %s2687_s15 }
  0x18   : > { %2112 = vmatprep.subr.bf16.mxu1 %v2267_v5  ;;  %v2275_v13 = vld [vmem:[%s2495_s25 + $0xd8] sm:$0xff]   ;;  %v2279_v17 = vld [vmem:[%s2495_s25 + $0xe0] sm:$0xff]   ;;  %v2283_v21 = vld [vmem:[%s2495_s25 + $0xe8] sm:$0xff]   ;;  %s367_s24 = scalar_lea.vmem %s2670_s3, %s366_s14  ;;  %s377_s27 = scalar_lea.vmem %s2671_s4, %s366_s14 }
  0x19   : > { %v2276_v14 = vld [vmem:[%s2495_s25 + $0x18] sm:$0xff]   ;;  %v2280_v18 = vld [vmem:[%s2495_s25 + $0x20] sm:$0xff]   ;;  %v2284_v22 = vld [vmem:[%s2495_s25 + $0x28] sm:$0xff]  }
  0x1a   : > { %2001 = vmatpush3.bf16.msra.mxu0 %v2268_v6  ;;  %v2277_v15 = vld [vmem:[%s2495_s25 + $0x98] sm:$0xff]   ;;  %v2281_v19 = vld [vmem:[%s2495_s25 + $0xa0] sm:$0xff]   ;;  %v2285_v23 = vld [vmem:[%s2495_s25 + $0xa8] sm:$0xff]  }
  0x1b   : > { %2113 = vmatpush3.bf16.msra.mxu1 %v2269_v7  ;;  %2002 = vmatprep.subr.bf16.mxu0 %v2270_v8  ;;  %v2286_v24 = vld [vmem:[%s2495_s25 + $0x70] sm:$0xff]   ;;  %v2290_v28 = vld [vmem:[%s2495_s25 + $0x78] sm:$0xff]  }
  0x1c   : > { %2114 = vmatprep.subr.bf16.mxu1 %v2271_v9  ;;  %v2287_v25 = vld [vmem:[%s2495_s25 + $0xf0] sm:$0xff]   ;;  %v2291_v29 = vld [vmem:[%s2495_s25 + $0xf8] sm:$0xff]  }
  0x1d   : > { %v2288_v26 = vld [vmem:[%s2495_s25 + $0x30] sm:$0xff]   ;;  %v2292_v30 = vld [vmem:[%s2495_s25 + $0x38] sm:$0xff]  }
  0x1e   : > { %2003 = vmatpush3.bf16.msra.mxu0 %v2272_v10  ;;  %v2289_v27 = vld [vmem:[%s2495_s25 + $0xb0] sm:$0xff]   ;;  %v2293_v31 = vld [vmem:[%s2495_s25 + $0xb8] sm:$0xff]  }
  0x1f   : > { %2115 = vmatpush3.bf16.msra.mxu1 %v2273_v11  ;;  %2004 = vmatprep.subr.bf16.mxu0 %v2274_v12  ;;  %v2294_v32 = vld [vmem:[%s2536_s6] ss:$16 sps:$4 sm:$0xff]   ;;  %v2296_v33 = vld [vmem:[%s2536_s6 + $0x4] ss:$16 sps:$4 sm:$0xff]   ;;  %v2297_v34 = vld [vmem:[%s2536_s6 + $0x8] ss:$16 sps:$4 sm:$0xff]  }
  0x20   : > { %2116 = vmatprep.subr.bf16.mxu1 %v2275_v13  ;;  %v2299_v35 = vld [vmem:[%s2536_s6 + $0xc] ss:$16 sps:$4 sm:$0xff]   ;;  %1119 = vmatprep.mubr.bf16.mxu0 %v2296_v33  ;;  %v2300_v36 = vld [vmem:[%s2536_s6 + $0x24] ss:$16 sps:$4 sm:$0xff]   ;;  %v2304_v38 = vld [vmem:[%s2536_s6 + $0x20] ss:$16 sps:$4 sm:$0xff]  }
  0x21   : > { %1280 = vmatprep.mubr.bf16.mxu1 %v2299_v35  ;;  %v2302_v37 = vld [vmem:[%s2536_s6 + $0x2c] ss:$16 sps:$4 sm:$0xff]   ;;  %v2305_v39 = vld [vmem:[%s2536_s6 + $0x28] ss:$16 sps:$4 sm:$0xff]   ;;  %v2306_v40 = vld [vmem:[%s2536_s6 + $0x44] ss:$16 sps:$4 sm:$0xff]  }
  0x22   : > { %2005 = vmatpush3.bf16.msra.mxu0 %v2276_v14  ;;  %v2308_v41 = vld [vmem:[%s2536_s6 + $0x4c] ss:$16 sps:$4 sm:$0xff]   ;;  %v2310_v42 = vld [vmem:[%s2536_s6 + $0x40] ss:$16 sps:$4 sm:$0xff]   ;;  %v2311_v43 = vld [vmem:[%s2536_s6 + $0x48] ss:$16 sps:$4 sm:$0xff]  }
  0x23   : > { %2117 = vmatpush3.bf16.msra.mxu1 %v2277_v15  ;;  %2006 = vmatprep.subr.bf16.mxu0 %v2278_v16  ;;  %v2312_v44 = vld [vmem:[%s2536_s6 + $0x64] ss:$16 sps:$4 sm:$0xff]   ;;  %v2314_v45 = vld [vmem:[%s2536_s6 + $0x6c] ss:$16 sps:$4 sm:$0xff]   ;;  %v2316_v46 = vld [vmem:[%s2536_s6 + $0x60] ss:$16 sps:$4 sm:$0xff]  }
  0x24   : > { %2118 = vmatprep.subr.bf16.mxu1 %v2279_v17  ;;  %v2317_v47 = vld [vmem:[%s2536_s6 + $0x68] ss:$16 sps:$4 sm:$0xff]   ;;  %v2318_v48 = vld [vmem:[%s2536_s6 + $0x84] ss:$16 sps:$4 sm:$0xff]   ;;  %v2320_v49 = vld [vmem:[%s2536_s6 + $0x8c] ss:$16 sps:$4 sm:$0xff]  }
  0x25   : > { %v2322_v50 = vld [vmem:[%s2536_s6 + $0x80] ss:$16 sps:$4 sm:$0xff]   ;;  %v2323_v51 = vld [vmem:[%s2536_s6 + $0x88] ss:$16 sps:$4 sm:$0xff]   ;;  %v2324_v52 = vld [vmem:[%s2536_s6 + $0xa4] ss:$16 sps:$4 sm:$0xff]  }
  0x26   : > { %2007 = vmatpush3.bf16.msra.mxu0 %v2280_v18  ;;  %v2326_v53 = vld [vmem:[%s2536_s6 + $0xac] ss:$16 sps:$4 sm:$0xff]   ;;  %v2328_v54 = vld [vmem:[%s2536_s6 + $0xa0] ss:$16 sps:$4 sm:$0xff]   ;;  %v2329_v55 = vld [vmem:[%s2536_s6 + $0xa8] ss:$16 sps:$4 sm:$0xff]  }
  0x27   : > { %2119 = vmatpush3.bf16.msra.mxu1 %v2281_v19  ;;  %2008 = vmatprep.subr.bf16.mxu0 %v2282_v20  ;;  %v2330_v56 = vld [vmem:[%s2536_s6 + $0xc4] ss:$16 sps:$4 sm:$0xff]   ;;  %v2332_v57 = vld [vmem:[%s2536_s6 + $0xcc] ss:$16 sps:$4 sm:$0xff]   ;;  %v2334_v58 = vld [vmem:[%s2536_s6 + $0xc0] ss:$16 sps:$4 sm:$0xff]  }
  0x28   : > { %2120 = vmatprep.subr.bf16.mxu1 %v2283_v21  ;;  %v2335_v59 = vld [vmem:[%s2536_s6 + $0xc8] ss:$16 sps:$4 sm:$0xff]   ;;  %v2336_v60 = vld [vmem:[%s2536_s6 + $0xe4] ss:$16 sps:$4 sm:$0xff]   ;;  %v2338_v61 = vld [vmem:[%s2536_s6 + $0xec] ss:$16 sps:$4 sm:$0xff]  }
  0x29   : > { %v2340_v62 = vld [vmem:[%s2536_s6 + $0xe0] ss:$16 sps:$4 sm:$0xff]   ;;  %v2341_v63 = vld [vmem:[%s2536_s6 + $0xe8] ss:$16 sps:$4 sm:$0xff]   ;;  %v2342_v0 = vld [vmem:[%s2536_s6 + $0x104] ss:$16 sps:$4 sm:$0xff]  }
  0x2a   : > { %2009 = vmatpush3.bf16.msra.mxu0 %v2284_v22  ;;  %v2344_v1 = vld [vmem:[%s2536_s6 + $0x10c] ss:$16 sps:$4 sm:$0xff]   ;;  %v2346_v2 = vld [vmem:[%s2536_s6 + $0x100] ss:$16 sps:$4 sm:$0xff]   ;;  %v2347_v3 = vld [vmem:[%s2536_s6 + $0x108] ss:$16 sps:$4 sm:$0xff]  }
  0x2b   : > { %2121 = vmatpush3.bf16.msra.mxu1 %v2285_v23  ;;  %2010 = vmatprep.subr.bf16.mxu0 %v2286_v24  ;;  %v2348_v4 = vld [vmem:[%s2536_s6 + $0x124] ss:$16 sps:$4 sm:$0xff]   ;;  %v2350_v5 = vld [vmem:[%s2536_s6 + $0x12c] ss:$16 sps:$4 sm:$0xff]   ;;  %v2352_v6 = vld [vmem:[%s2536_s6 + $0x120] ss:$16 sps:$4 sm:$0xff]  }
  0x2c   : > { %2122 = vmatprep.subr.bf16.mxu1 %v2287_v25  ;;  %v2353_v7 = vld [vmem:[%s2536_s6 + $0x128] ss:$16 sps:$4 sm:$0xff]   ;;  %v2354_v8 = vld [vmem:[%s2536_s6 + $0x144] ss:$16 sps:$4 sm:$0xff]   ;;  %v2356_v9 = vld [vmem:[%s2536_s6 + $0x14c] ss:$16 sps:$4 sm:$0xff]  }
  0x2d   : > { %v2358_v10 = vld [vmem:[%s2536_s6 + $0x140] ss:$16 sps:$4 sm:$0xff]   ;;  %v2359_v11 = vld [vmem:[%s2536_s6 + $0x148] ss:$16 sps:$4 sm:$0xff]   ;;  %v2360_v12 = vld [vmem:[%s2536_s6 + $0x164] ss:$16 sps:$4 sm:$0xff]  }
  0x2e   : > { %2011 = vmatpush3.bf16.msra.mxu0 %v2288_v26  ;;  %v2362_v13 = vld [vmem:[%s2536_s6 + $0x16c] ss:$16 sps:$4 sm:$0xff]   ;;  %v2364_v14 = vld [vmem:[%s2536_s6 + $0x160] ss:$16 sps:$4 sm:$0xff]   ;;  %v2365_v15 = vld [vmem:[%s2536_s6 + $0x168] ss:$16 sps:$4 sm:$0xff]  }
  0x2f   : > { %2123 = vmatpush3.bf16.msra.mxu1 %v2289_v27  ;;  %2012 = vmatprep.subr.bf16.mxu0 %v2290_v28  ;;  %v2366_v16 = vld [vmem:[%s2536_s6 + $0x184] ss:$16 sps:$4 sm:$0xff]   ;;  %v2368_v17 = vld [vmem:[%s2536_s6 + $0x18c] ss:$16 sps:$4 sm:$0xff]   ;;  %v2370_v18 = vld [vmem:[%s2536_s6 + $0x180] ss:$16 sps:$4 sm:$0xff]  }
  0x30   : > { %2124 = vmatprep.subr.bf16.mxu1 %v2291_v29  ;;  %v2371_v19 = vld [vmem:[%s2536_s6 + $0x188] ss:$16 sps:$4 sm:$0xff]   ;;  %v2372_v20 = vld [vmem:[%s2536_s6 + $0x1a4] ss:$16 sps:$4 sm:$0xff]   ;;  %v2374_v21 = vld [vmem:[%s2536_s6 + $0x1ac] ss:$16 sps:$4 sm:$0xff]  }
  0x31   : > { %v2376_v22 = vld [vmem:[%s2536_s6 + $0x1a0] ss:$16 sps:$4 sm:$0xff]   ;;  %v2377_v23 = vld [vmem:[%s2536_s6 + $0x1a8] ss:$16 sps:$4 sm:$0xff]   ;;  %v2378_v24 = vld [vmem:[%s2536_s6 + $0x1c4] ss:$16 sps:$4 sm:$0xff]  }
  0x32   : > { %2013 = vmatpush3.bf16.msra.mxu0 %v2292_v30  ;;  %v2380_v25 = vld [vmem:[%s2536_s6 + $0x1cc] ss:$16 sps:$4 sm:$0xff]   ;;  %v2382_v26 = vld [vmem:[%s2536_s6 + $0x1c0] ss:$16 sps:$4 sm:$0xff]   ;;  %v2383_v27 = vld [vmem:[%s2536_s6 + $0x1c8] ss:$16 sps:$4 sm:$0xff]  }
  0x33   : > { %2125 = vmatpush3.bf16.msra.mxu1 %v2293_v31  ;;  %v2384_v28 = vld [vmem:[%s2536_s6 + $0x1e4] ss:$16 sps:$4 sm:$0xff]   ;;  %v2386_v29 = vld [vmem:[%s2536_s6 + $0x1ec] ss:$16 sps:$4 sm:$0xff]   ;;  %v2388_v30 = vld [vmem:[%s2536_s6 + $0x1e0] ss:$16 sps:$4 sm:$0xff]  }
  0x34   : > { %v2389_v31 = vld [vmem:[%s2536_s6 + $0x1e8] ss:$16 sps:$4 sm:$0xff]  }
  0x35   : > { %1120 = vmatmul.mubr.bf16.vlgmr.msra.gmra.mrb[0].mxu0 %v2294_v32 }
  0x36   : > { %1281 = vmatmul.mubr.bf16.vlgmr.msra.gmra.mrb[0].mxu1 %v2297_v34  ;;  %1127 = vmatprep.mubr.bf16.mxu0 %v2300_v36 }
  0x37   : > { %1288 = vmatprep.mubr.bf16.mxu1 %v2302_v37 }
  0x3d   : > { %1128 = vmatmul.mubr.bf16.gmra.mrb[4].mxu0 %v2304_v38 }
  0x3e   : > { %1289 = vmatmul.mubr.bf16.gmra.mrb[4].mxu1 %v2305_v39  ;;  %1135 = vmatprep.mubr.bf16.mxu0 %v2306_v40 }
  0x3f   : > { %1296 = vmatprep.mubr.bf16.mxu1 %v2308_v41 }
  0x45   : > { %1136 = vmatmul.mubr.bf16.gmra.mrb[8].mxu0 %v2310_v42 }
  0x46   : > { %1297 = vmatmul.mubr.bf16.gmra.mrb[8].mxu1 %v2311_v43  ;;  %1143 = vmatprep.mubr.bf16.mxu0 %v2312_v44 }
  0x47   : > { %1304 = vmatprep.mubr.bf16.mxu1 %v2314_v45 }
  0x4d   : > { %1144 = vmatmul.mubr.bf16.gmra.mrb[12].mxu0 %v2316_v46 }
  0x4e   : > { %1305 = vmatmul.mubr.bf16.gmra.mrb[12].mxu1 %v2317_v47  ;;  %1151 = vmatprep.mubr.bf16.mxu0 %v2318_v48 }
  0x4f   : > { %1312 = vmatprep.mubr.bf16.mxu1 %v2320_v49 }
  0x55   : > { %1152 = vmatmul.mubr.bf16.gmra.mrb[16].mxu0 %v2322_v50 }
  0x56   : > { %1313 = vmatmul.mubr.bf16.gmra.mrb[16].mxu1 %v2323_v51  ;;  %1159 = vmatprep.mubr.bf16.mxu0 %v2324_v52 }
  0x57   : > { %1320 = vmatprep.mubr.bf16.mxu1 %v2326_v53 }
  0x5d   : > { %1160 = vmatmul.mubr.bf16.gmra.mrb[20].mxu0 %v2328_v54 }
  0x5e   : > { %1321 = vmatmul.mubr.bf16.gmra.mrb[20].mxu1 %v2329_v55  ;;  %1167 = vmatprep.mubr.bf16.mxu0 %v2330_v56 }
  0x5f   : > { %1328 = vmatprep.mubr.bf16.mxu1 %v2332_v57 }
  0x65   : > { %1168 = vmatmul.mubr.bf16.gmra.mrb[24].mxu0 %v2334_v58 }
  0x66   : > { %1329 = vmatmul.mubr.bf16.gmra.mrb[24].mxu1 %v2335_v59  ;;  %1175 = vmatprep.mubr.bf16.mxu0 %v2336_v60 }
  0x67   : > { %1336 = vmatprep.mubr.bf16.mxu1 %v2338_v61 }
  0x6d   : > { %1176 = vmatmul.mubr.bf16.gmra.mrb[28].mxu0 %v2340_v62 }
  0x6e   : > { %1337 = vmatmul.mubr.bf16.gmra.mrb[28].mxu1 %v2341_v63  ;;  %1183 = vmatprep.mubr.bf16.mxu0 %v2342_v0 }
  0x6f   : > { %1344 = vmatprep.mubr.bf16.mxu1 %v2344_v1 }
  0x75   : > { %1184 = vmatmul.mubr.bf16.gmra.mrb[32].mxu0 %v2346_v2 }
  0x76   : > { %1345 = vmatmul.mubr.bf16.gmra.mrb[32].mxu1 %v2347_v3  ;;  %1191 = vmatprep.mubr.bf16.mxu0 %v2348_v4 }
  0x77   : > { %1352 = vmatprep.mubr.bf16.mxu1 %v2350_v5 }
  0x7d   : > { %1192 = vmatmul.mubr.bf16.gmra.mrb[36].mxu0 %v2352_v6 }
  0x7e   : > { %1353 = vmatmul.mubr.bf16.gmra.mrb[36].mxu1 %v2353_v7  ;;  %1199 = vmatprep.mubr.bf16.mxu0 %v2354_v8 }
  0x7f   : > { %1360 = vmatprep.mubr.bf16.mxu1 %v2356_v9 }
  0x85   : > { %1200 = vmatmul.mubr.bf16.gmra.mrb[40].mxu0 %v2358_v10 }
  0x86   : > { %1361 = vmatmul.mubr.bf16.gmra.mrb[40].mxu1 %v2359_v11  ;;  %1207 = vmatprep.mubr.bf16.mxu0 %v2360_v12 }
  0x87   : > { %1368 = vmatprep.mubr.bf16.mxu1 %v2362_v13 }
  0x8d   : > { %1208 = vmatmul.mubr.bf16.gmra.mrb[44].mxu0 %v2364_v14 }
  0x8e   : > { %1369 = vmatmul.mubr.bf16.gmra.mrb[44].mxu1 %v2365_v15  ;;  %1215 = vmatprep.mubr.bf16.mxu0 %v2366_v16 }
  0x8f   : > { %1376 = vmatprep.mubr.bf16.mxu1 %v2368_v17 }
  0x95   : > { %1216 = vmatmul.mubr.bf16.gmra.mrb[48].mxu0 %v2370_v18 }
  0x96   : > { %1377 = vmatmul.mubr.bf16.gmra.mrb[48].mxu1 %v2371_v19  ;;  %1223 = vmatprep.mubr.bf16.mxu0 %v2372_v20 }
  0x97   : > { %1384 = vmatprep.mubr.bf16.mxu1 %v2374_v21 }
  0x9d   : > { %1224 = vmatmul.mubr.bf16.gmra.mrb[52].mxu0 %v2376_v22 }
  0x9e   : > { %1385 = vmatmul.mubr.bf16.gmra.mrb[52].mxu1 %v2377_v23  ;;  %1231 = vmatprep.mubr.bf16.mxu0 %v2378_v24 }
  0x9f   : > { %1392 = vmatprep.mubr.bf16.mxu1 %v2380_v25 }
  0xa5   : > { %1232 = vmatmul.mubr.bf16.gmra.mrb[56].mxu0 %v2382_v26 }
  0xa6   : > { %1393 = vmatmul.mubr.bf16.gmra.mrb[56].mxu1 %v2383_v27  ;;  %1239 = vmatprep.mubr.bf16.mxu0 %v2384_v28 }
  0xa7   : > { %1400 = vmatprep.mubr.bf16.mxu1 %v2386_v29 }
  0xad   : > { %1240 = vmatmul.mubr.bf16.gmra.mrb[60].mxu0 %v2388_v30 }
  0xae   : > { %1401 = vmatmul.mubr.bf16.gmra.mrb[60].mxu1 %v2389_v31 }
 0x108   : > { %v2014_v32 = vpop.f32.mrb[0].mxu0 }
 0x109   : > { %v2126_v33 = vpop.f32.mrb[0].mxu1  ;;  %v2015_v34 = vpop.f32.mrb[1].mxu0 }
 0x10a   : > { %v2016_v35 = vadd.f32 %v2015_v34, %v2014_v32  ;;  %v2127_v36 = vpop.f32.mrb[1].mxu1  ;;  %v2017_v37 = vpop.f32.mrb[2].mxu0 }
 0x10b   : > { %v2128_v38 = vadd.f32 %v2127_v36, %v2126_v33  ;;  %v2129_v39 = vpop.f32.mrb[2].mxu1  ;;  %v2018_v40 = vpop.f32.mrb[3].mxu0 }
 0x10c   : > { %v2019_v41 = vadd.f32 %v2018_v40, %v2017_v37  ;;  %v2130_v42 = vpop.f32.mrb[3].mxu1 }
 0x10d   : > { %v1283_v43 = vadd.f32 %v2128_v38, %v2016_v35  ;;  %v2131_v44 = vadd.f32 %v2130_v42, %v2129_v39 }
 0x10f   : > { %1508 = vst [vmem:[%s2609_s12] sm:$0xff] %v1283_v43  ;;  %v1286_v45 = vadd.f32 %v2131_v44, %v2019_v41  ;;  %v1578_v47 = vmul.f32 %v1283_v43, %v1283_v43 }
 0x110   : > { %v2020_v46 = vpop.f32.mrb[4].mxu0 }
 0x111   : > { %1509 = vst [vmem:[%s2609_s12 + $0x8] sm:$0xff] %v1286_v45  ;;  %v1540_v48 = vadd.f32 %v1286_v45, %v1283_v43  ;;  %v1579_v49 = vmul.f32 %v1286_v45, %v1286_v45  ;;  %v2132_v50 = vpop.f32.mrb[4].mxu1  ;;  %v2021_v51 = vpop.f32.mrb[5].mxu0 }
 0x112   : > { %v2022_v52 = vadd.f32 %v2021_v51, %v2020_v46  ;;  %v2133_v53 = vpop.f32.mrb[5].mxu1  ;;  %v2023_v54 = vpop.f32.mrb[6].mxu0 }
 0x113   : > { %v1610_v55 = vadd.f32 %v1579_v49, %v1578_v47  ;;  %v2134_v56 = vadd.f32 %v2133_v53, %v2132_v50  ;;  %v2135_v57 = vpop.f32.mrb[6].mxu1  ;;  %v2024_v58 = vpop.f32.mrb[7].mxu0 }
 0x114   : > { %v2025_v59 = vadd.f32 %v2024_v58, %v2023_v54  ;;  %v2136_v60 = vpop.f32.mrb[7].mxu1 }
 0x115   : > { %v1291_v61 = vadd.f32 %v2134_v56, %v2022_v52  ;;  %v2137_v62 = vadd.f32 %v2136_v60, %v2135_v57 }
 0x117   : > { %1510 = vst [vmem:[%s2609_s12 + $0x10] sm:$0xff] %v1291_v61  ;;  %v1541_v63 = vadd.f32 %v1540_v48, %v1291_v61  ;;  %v1580_v0 = vmul.f32 %v1291_v61, %v1291_v61  ;;  %v1294_v1 = vadd.f32 %v2137_v62, %v2025_v59 }
 0x118   : > { %v2026_v2 = vpop.f32.mrb[8].mxu0 }
 0x119   : > { %v1611_v3 = vadd.f32 %v1610_v55, %v1580_v0  ;;  %1511 = vst [vmem:[%s2609_s12 + $0x18] sm:$0xff] %v1294_v1  ;;  %v1542_v4 = vadd.f32 %v1541_v63, %v1294_v1  ;;  %v1581_v5 = vmul.f32 %v1294_v1, %v1294_v1  ;;  %v2138_v6 = vpop.f32.mrb[8].mxu1  ;;  %v2027_v7 = vpop.f32.mrb[9].mxu0 }
 0x11a   : > { %v2028_v8 = vadd.f32 %v2027_v7, %v2026_v2  ;;  %v2139_v9 = vpop.f32.mrb[9].mxu1  ;;  %v2029_v10 = vpop.f32.mrb[10].mxu0 }
 0x11b   : > { %v1612_v11 = vadd.f32 %v1611_v3, %v1581_v5  ;;  %v2140_v12 = vadd.f32 %v2139_v9, %v2138_v6  ;;  %v2141_v13 = vpop.f32.mrb[10].mxu1  ;;  %v2030_v14 = vpop.f32.mrb[11].mxu0 }
 0x11c   : > { %v2031_v15 = vadd.f32 %v2030_v14, %v2029_v10  ;;  %v2142_v16 = vpop.f32.mrb[11].mxu1 }
 0x11d   : > { %v1299_v17 = vadd.f32 %v2140_v12, %v2028_v8  ;;  %v2143_v18 = vadd.f32 %v2142_v16, %v2141_v13 }
 0x11f   : > { %1512 = vst [vmem:[%s2609_s12 + $0x20] sm:$0xff] %v1299_v17  ;;  %v1543_v19 = vadd.f32 %v1542_v4, %v1299_v17  ;;  %v1582_v20 = vmul.f32 %v1299_v17, %v1299_v17  ;;  %v1302_v21 = vadd.f32 %v2143_v18, %v2031_v15 }
 0x120   : > { %v2032_v22 = vpop.f32.mrb[12].mxu0 }
 0x121   : > { %v1613_v23 = vadd.f32 %v1612_v11, %v1582_v20  ;;  %1513 = vst [vmem:[%s2609_s12 + $0x28] sm:$0xff] %v1302_v21  ;;  %v1544_v24 = vadd.f32 %v1543_v19, %v1302_v21  ;;  %v1583_v25 = vmul.f32 %v1302_v21, %v1302_v21  ;;  %v2144_v26 = vpop.f32.mrb[12].mxu1  ;;  %v2033_v27 = vpop.f32.mrb[13].mxu0 }
 0x122   : > { %v2034_v28 = vadd.f32 %v2033_v27, %v2032_v22  ;;  %v2145_v29 = vpop.f32.mrb[13].mxu1  ;;  %v2035_v30 = vpop.f32.mrb[14].mxu0 }
 0x123   : > { %v1614_v31 = vadd.f32 %v1613_v23, %v1583_v25  ;;  %v2146_v32 = vadd.f32 %v2145_v29, %v2144_v26  ;;  %v2147_v33 = vpop.f32.mrb[14].mxu1  ;;  %v2036_v34 = vpop.f32.mrb[15].mxu0 }
 0x124   : > { %v2037_v35 = vadd.f32 %v2036_v34, %v2035_v30  ;;  %v2148_v36 = vpop.f32.mrb[15].mxu1 }
 0x125   : > { %v1307_v37 = vadd.f32 %v2146_v32, %v2034_v28  ;;  %v2149_v38 = vadd.f32 %v2148_v36, %v2147_v33 }
 0x127   : > { %1514 = vst [vmem:[%s2609_s12 + $0x30] sm:$0xff] %v1307_v37  ;;  %v1545_v39 = vadd.f32 %v1544_v24, %v1307_v37  ;;  %v1584_v40 = vmul.f32 %v1307_v37, %v1307_v37  ;;  %v1310_v41 = vadd.f32 %v2149_v38, %v2037_v35 }
 0x128   : > { %v2038_v42 = vpop.f32.mrb[16].mxu0 }
 0x129   : > { %v1615_v43 = vadd.f32 %v1614_v31, %v1584_v40  ;;  %1515 = vst [vmem:[%s2609_s12 + $0x38] sm:$0xff] %v1310_v41  ;;  %v1546_v44 = vadd.f32 %v1545_v39, %v1310_v41  ;;  %v1585_v45 = vmul.f32 %v1310_v41, %v1310_v41  ;;  %v2150_v46 = vpop.f32.mrb[16].mxu1  ;;  %v2039_v47 = vpop.f32.mrb[17].mxu0 }
 0x12a   : > { %v2040_v48 = vadd.f32 %v2039_v47, %v2038_v42  ;;  %v2151_v49 = vpop.f32.mrb[17].mxu1  ;;  %v2041_v50 = vpop.f32.mrb[18].mxu0 }
 0x12b   : > { %v1616_v51 = vadd.f32 %v1615_v43, %v1585_v45  ;;  %v2152_v52 = vadd.f32 %v2151_v49, %v2150_v46  ;;  %v2153_v53 = vpop.f32.mrb[18].mxu1  ;;  %v2042_v54 = vpop.f32.mrb[19].mxu0 }
 0x12c   : > { %v2043_v55 = vadd.f32 %v2042_v54, %v2041_v50  ;;  %v2154_v56 = vpop.f32.mrb[19].mxu1 }
 0x12d   : > { %v1315_v57 = vadd.f32 %v2152_v52, %v2040_v48  ;;  %v2155_v58 = vadd.f32 %v2154_v56, %v2153_v53 }
 0x12f   : > { %1516 = vst [vmem:[%s2609_s12 + $0x40] sm:$0xff] %v1315_v57  ;;  %v1547_v59 = vadd.f32 %v1546_v44, %v1315_v57  ;;  %v1586_v60 = vmul.f32 %v1315_v57, %v1315_v57  ;;  %v1318_v61 = vadd.f32 %v2155_v58, %v2043_v55 }
 0x130   : > { %v2044_v62 = vpop.f32.mrb[20].mxu0 }
 0x131   : > { %v1617_v63 = vadd.f32 %v1616_v51, %v1586_v60  ;;  %1517 = vst [vmem:[%s2609_s12 + $0x48] sm:$0xff] %v1318_v61  ;;  %v1548_v0 = vadd.f32 %v1547_v59, %v1318_v61  ;;  %v1587_v1 = vmul.f32 %v1318_v61, %v1318_v61  ;;  %v2156_v2 = vpop.f32.mrb[20].mxu1  ;;  %v2045_v3 = vpop.f32.mrb[21].mxu0 }
 0x132   : > { %v2046_v4 = vadd.f32 %v2045_v3, %v2044_v62  ;;  %v2157_v5 = vpop.f32.mrb[21].mxu1  ;;  %v2047_v6 = vpop.f32.mrb[22].mxu0 }
 0x133   : > { %v1618_v7 = vadd.f32 %v1617_v63, %v1587_v1  ;;  %v2158_v8 = vadd.f32 %v2157_v5, %v2156_v2  ;;  %v2159_v9 = vpop.f32.mrb[22].mxu1  ;;  %v2048_v10 = vpop.f32.mrb[23].mxu0 }
 0x134   : > { %v2049_v11 = vadd.f32 %v2048_v10, %v2047_v6  ;;  %v2160_v12 = vpop.f32.mrb[23].mxu1 }
 0x135   : > { %v1323_v13 = vadd.f32 %v2158_v8, %v2046_v4  ;;  %v2161_v14 = vadd.f32 %v2160_v12, %v2159_v9 }
 0x137   : > { %1518 = vst [vmem:[%s2609_s12 + $0x50] sm:$0xff] %v1323_v13  ;;  %v1549_v15 = vadd.f32 %v1548_v0, %v1323_v13  ;;  %v1588_v16 = vmul.f32 %v1323_v13, %v1323_v13  ;;  %v1326_v17 = vadd.f32 %v2161_v14, %v2049_v11 }
 0x138   : > { %v2050_v18 = vpop.f32.mrb[24].mxu0 }
 0x139   : > { %v1619_v19 = vadd.f32 %v1618_v7, %v1588_v16  ;;  %1519 = vst [vmem:[%s2609_s12 + $0x58] sm:$0xff] %v1326_v17  ;;  %v1550_v20 = vadd.f32 %v1549_v15, %v1326_v17  ;;  %v1589_v21 = vmul.f32 %v1326_v17, %v1326_v17  ;;  %v2162_v22 = vpop.f32.mrb[24].mxu1  ;;  %v2051_v23 = vpop.f32.mrb[25].mxu0 }
 0x13a   : > { %v2052_v24 = vadd.f32 %v2051_v23, %v2050_v18  ;;  %v2163_v25 = vpop.f32.mrb[25].mxu1  ;;  %v2053_v26 = vpop.f32.mrb[26].mxu0 }
 0x13b   : > { %v1620_v27 = vadd.f32 %v1619_v19, %v1589_v21  ;;  %v2164_v28 = vadd.f32 %v2163_v25, %v2162_v22  ;;  %v2165_v29 = vpop.f32.mrb[26].mxu1  ;;  %v2054_v30 = vpop.f32.mrb[27].mxu0 }
 0x13c   : > { %v2055_v31 = vadd.f32 %v2054_v30, %v2053_v26  ;;  %v2166_v32 = vpop.f32.mrb[27].mxu1 }
 0x13d   : > { %v1331_v33 = vadd.f32 %v2164_v28, %v2052_v24  ;;  %v2167_v34 = vadd.f32 %v2166_v32, %v2165_v29 }
 0x13f   : > { %1520 = vst [vmem:[%s2609_s12 + $0x60] sm:$0xff] %v1331_v33  ;;  %v1551_v35 = vadd.f32 %v1550_v20, %v1331_v33  ;;  %v1590_v36 = vmul.f32 %v1331_v33, %v1331_v33  ;;  %v1334_v37 = vadd.f32 %v2167_v34, %v2055_v31 }
 0x140   : > { %v2056_v38 = vpop.f32.mrb[28].mxu0 }
 0x141   : > { %v1621_v39 = vadd.f32 %v1620_v27, %v1590_v36  ;;  %1521 = vst [vmem:[%s2609_s12 + $0x68] sm:$0xff] %v1334_v37  ;;  %v1552_v40 = vadd.f32 %v1551_v35, %v1334_v37  ;;  %v1591_v41 = vmul.f32 %v1334_v37, %v1334_v37  ;;  %v2168_v42 = vpop.f32.mrb[28].mxu1  ;;  %v2057_v43 = vpop.f32.mrb[29].mxu0 }
 0x142   : > { %v2058_v44 = vadd.f32 %v2057_v43, %v2056_v38  ;;  %v2169_v45 = vpop.f32.mrb[29].mxu1  ;;  %v2059_v46 = vpop.f32.mrb[30].mxu0 }
 0x143   : > { %v1622_v47 = vadd.f32 %v1621_v39, %v1591_v41  ;;  %v2170_v48 = vadd.f32 %v2169_v45, %v2168_v42  ;;  %v2171_v49 = vpop.f32.mrb[30].mxu1  ;;  %v2060_v50 = vpop.f32.mrb[31].mxu0 }
 0x144   : > { %v2061_v51 = vadd.f32 %v2060_v50, %v2059_v46  ;;  %v2172_v52 = vpop.f32.mrb[31].mxu1 }
 0x145   : > { %v1339_v53 = vadd.f32 %v2170_v48, %v2058_v44  ;;  %v2173_v54 = vadd.f32 %v2172_v52, %v2171_v49 }
 0x147   : > { %1522 = vst [vmem:[%s2609_s12 + $0x70] sm:$0xff] %v1339_v53  ;;  %v1553_v55 = vadd.f32 %v1552_v40, %v1339_v53  ;;  %v1592_v56 = vmul.f32 %v1339_v53, %v1339_v53  ;;  %v1342_v57 = vadd.f32 %v2173_v54, %v2061_v51 }
 0x148   : > { %v2062_v58 = vpop.f32.mrb[32].mxu0 }
 0x149   : > { %v1623_v59 = vadd.f32 %v1622_v47, %v1592_v56  ;;  %1523 = vst [vmem:[%s2609_s12 + $0x78] sm:$0xff] %v1342_v57  ;;  %v1554_v60 = vadd.f32 %v1553_v55, %v1342_v57  ;;  %v1593_v61 = vmul.f32 %v1342_v57, %v1342_v57  ;;  %v2174_v62 = vpop.f32.mrb[32].mxu1  ;;  %v2063_v63 = vpop.f32.mrb[33].mxu0 }
 0x14a   : > { %v2064_v0 = vadd.f32 %v2063_v63, %v2062_v58  ;;  %v2175_v1 = vpop.f32.mrb[33].mxu1  ;;  %v2065_v2 = vpop.f32.mrb[34].mxu0 }
 0x14b   : > { %v1624_v3 = vadd.f32 %v1623_v59, %v1593_v61  ;;  %v2176_v4 = vadd.f32 %v2175_v1, %v2174_v62  ;;  %v2177_v5 = vpop.f32.mrb[34].mxu1  ;;  %v2066_v6 = vpop.f32.mrb[35].mxu0 }
 0x14c   : > { %v2067_v7 = vadd.f32 %v2066_v6, %v2065_v2  ;;  %v2178_v8 = vpop.f32.mrb[35].mxu1 }
 0x14d   : > { %v1347_v9 = vadd.f32 %v2176_v4, %v2064_v0  ;;  %v2179_v10 = vadd.f32 %v2178_v8, %v2177_v5 }
 0x14f   : > { %1524 = vst [vmem:[%s2609_s12 + $0x80] sm:$0xff] %v1347_v9  ;;  %v1555_v11 = vadd.f32 %v1554_v60, %v1347_v9  ;;  %v1594_v12 = vmul.f32 %v1347_v9, %v1347_v9  ;;  %v1350_v13 = vadd.f32 %v2179_v10, %v2067_v7 }
 0x150   : > { %v2068_v14 = vpop.f32.mrb[36].mxu0 }
 0x151   : > { %v1625_v15 = vadd.f32 %v1624_v3, %v1594_v12  ;;  %1525 = vst [vmem:[%s2609_s12 + $0x88] sm:$0xff] %v1350_v13  ;;  %v1556_v16 = vadd.f32 %v1555_v11, %v1350_v13  ;;  %v1595_v17 = vmul.f32 %v1350_v13, %v1350_v13  ;;  %v2180_v18 = vpop.f32.mrb[36].mxu1  ;;  %v2069_v19 = vpop.f32.mrb[37].mxu0 }
 0x152   : > { %v2070_v20 = vadd.f32 %v2069_v19, %v2068_v14  ;;  %v2181_v21 = vpop.f32.mrb[37].mxu1  ;;  %v2071_v22 = vpop.f32.mrb[38].mxu0 }
 0x153   : > { %v1626_v23 = vadd.f32 %v1625_v15, %v1595_v17  ;;  %v2182_v24 = vadd.f32 %v2181_v21, %v2180_v18  ;;  %v2183_v25 = vpop.f32.mrb[38].mxu1  ;;  %v2072_v26 = vpop.f32.mrb[39].mxu0 }
 0x154   : > { %v2073_v27 = vadd.f32 %v2072_v26, %v2071_v22  ;;  %v2184_v28 = vpop.f32.mrb[39].mxu1 }
 0x155   : > { %v1355_v29 = vadd.f32 %v2182_v24, %v2070_v20  ;;  %v2185_v30 = vadd.f32 %v2184_v28, %v2183_v25 }
 0x157   : > { %1526 = vst [vmem:[%s2609_s12 + $0x90] sm:$0xff] %v1355_v29  ;;  %v1557_v31 = vadd.f32 %v1556_v16, %v1355_v29  ;;  %v1596_v32 = vmul.f32 %v1355_v29, %v1355_v29  ;;  %v1358_v33 = vadd.f32 %v2185_v30, %v2073_v27 }
 0x158   : > { %v2074_v34 = vpop.f32.mrb[40].mxu0 }
 0x159   : > { %v1627_v35 = vadd.f32 %v1626_v23, %v1596_v32  ;;  %1527 = vst [vmem:[%s2609_s12 + $0x98] sm:$0xff] %v1358_v33  ;;  %v1558_v36 = vadd.f32 %v1557_v31, %v1358_v33  ;;  %v1597_v37 = vmul.f32 %v1358_v33, %v1358_v33  ;;  %v2186_v38 = vpop.f32.mrb[40].mxu1  ;;  %v2075_v39 = vpop.f32.mrb[41].mxu0 }
 0x15a   : > { %v2076_v40 = vadd.f32 %v2075_v39, %v2074_v34  ;;  %v2187_v41 = vpop.f32.mrb[41].mxu1  ;;  %v2077_v42 = vpop.f32.mrb[42].mxu0 }
 0x15b   : > { %v1628_v43 = vadd.f32 %v1627_v35, %v1597_v37  ;;  %v2188_v44 = vadd.f32 %v2187_v41, %v2186_v38  ;;  %v2189_v45 = vpop.f32.mrb[42].mxu1  ;;  %v2078_v46 = vpop.f32.mrb[43].mxu0 }
 0x15c   : > { %v2079_v47 = vadd.f32 %v2078_v46, %v2077_v42  ;;  %v2190_v48 = vpop.f32.mrb[43].mxu1 }
 0x15d   : > { %v1363_v49 = vadd.f32 %v2188_v44, %v2076_v40  ;;  %v2191_v50 = vadd.f32 %v2190_v48, %v2189_v45 }
 0x15f   : > { %1528 = vst [vmem:[%s2609_s12 + $0xa0] sm:$0xff] %v1363_v49  ;;  %v1559_v51 = vadd.f32 %v1558_v36, %v1363_v49  ;;  %v1598_v52 = vmul.f32 %v1363_v49, %v1363_v49  ;;  %v1366_v53 = vadd.f32 %v2191_v50, %v2079_v47 }
 0x160   : > { %v2080_v54 = vpop.f32.mrb[44].mxu0 }
 0x161   : > { %v1629_v55 = vadd.f32 %v1628_v43, %v1598_v52  ;;  %1529 = vst [vmem:[%s2609_s12 + $0xa8] sm:$0xff] %v1366_v53  ;;  %v1560_v56 = vadd.f32 %v1559_v51, %v1366_v53  ;;  %v1599_v57 = vmul.f32 %v1366_v53, %v1366_v53  ;;  %v2192_v58 = vpop.f32.mrb[44].mxu1  ;;  %v2081_v59 = vpop.f32.mrb[45].mxu0 }
 0x162   : > { %v2082_v60 = vadd.f32 %v2081_v59, %v2080_v54  ;;  %v2193_v61 = vpop.f32.mrb[45].mxu1  ;;  %v2083_v62 = vpop.f32.mrb[46].mxu0 }
 0x163   : > { %v1630_v63 = vadd.f32 %v1629_v55, %v1599_v57  ;;  %v2194_v0 = vadd.f32 %v2193_v61, %v2192_v58  ;;  %v2195_v1 = vpop.f32.mrb[46].mxu1  ;;  %v2084_v2 = vpop.f32.mrb[47].mxu0 }
 0x164   : > { %v2085_v3 = vadd.f32 %v2084_v2, %v2083_v62  ;;  %v2196_v4 = vpop.f32.mrb[47].mxu1 }
 0x165   : > { %v1371_v5 = vadd.f32 %v2194_v0, %v2082_v60  ;;  %v2197_v6 = vadd.f32 %v2196_v4, %v2195_v1 }
 0x167   : > { %1530 = vst [vmem:[%s2609_s12 + $0xb0] sm:$0xff] %v1371_v5  ;;  %v1561_v7 = vadd.f32 %v1560_v56, %v1371_v5  ;;  %v1600_v8 = vmul.f32 %v1371_v5, %v1371_v5  ;;  %v1374_v9 = vadd.f32 %v2197_v6, %v2085_v3 }
 0x168   : > { %v2086_v10 = vpop.f32.mrb[48].mxu0 }
 0x169   : > { %v1631_v11 = vadd.f32 %v1630_v63, %v1600_v8  ;;  %1531 = vst [vmem:[%s2609_s12 + $0xb8] sm:$0xff] %v1374_v9  ;;  %v1562_v12 = vadd.f32 %v1561_v7, %v1374_v9  ;;  %v1601_v13 = vmul.f32 %v1374_v9, %v1374_v9  ;;  %v2198_v14 = vpop.f32.mrb[48].mxu1  ;;  %v2087_v15 = vpop.f32.mrb[49].mxu0 }
 0x16a   : > { %v2088_v16 = vadd.f32 %v2087_v15, %v2086_v10  ;;  %v2199_v17 = vpop.f32.mrb[49].mxu1  ;;  %v2089_v18 = vpop.f32.mrb[50].mxu0 }
 0x16b   : > { %v1632_v19 = vadd.f32 %v1631_v11, %v1601_v13  ;;  %v2200_v20 = vadd.f32 %v2199_v17, %v2198_v14  ;;  %v2201_v21 = vpop.f32.mrb[50].mxu1  ;;  %v2090_v22 = vpop.f32.mrb[51].mxu0 }
 0x16c   : > { %v2091_v23 = vadd.f32 %v2090_v22, %v2089_v18  ;;  %v2202_v24 = vpop.f32.mrb[51].mxu1 }
 0x16d   : > { %v1379_v25 = vadd.f32 %v2200_v20, %v2088_v16  ;;  %v2203_v26 = vadd.f32 %v2202_v24, %v2201_v21 }
 0x16f   : > { %1532 = vst [vmem:[%s2609_s12 + $0xc0] sm:$0xff] %v1379_v25  ;;  %v1563_v27 = vadd.f32 %v1562_v12, %v1379_v25  ;;  %v1602_v28 = vmul.f32 %v1379_v25, %v1379_v25  ;;  %v1382_v29 = vadd.f32 %v2203_v26, %v2091_v23 }
 0x170   : > { %v2092_v30 = vpop.f32.mrb[52].mxu0 }
 0x171   : > { %v1633_v31 = vadd.f32 %v1632_v19, %v1602_v28  ;;  %1533 = vst [vmem:[%s2609_s12 + $0xc8] sm:$0xff] %v1382_v29  ;;  %v1564_v32 = vadd.f32 %v1563_v27, %v1382_v29  ;;  %v1603_v33 = vmul.f32 %v1382_v29, %v1382_v29  ;;  %v2204_v34 = vpop.f32.mrb[52].mxu1  ;;  %v2093_v35 = vpop.f32.mrb[53].mxu0 }
 0x172   : > { %v2094_v36 = vadd.f32 %v2093_v35, %v2092_v30  ;;  %v2205_v37 = vpop.f32.mrb[53].mxu1  ;;  %v2095_v38 = vpop.f32.mrb[54].mxu0 }
 0x173   : > { %v1634_v39 = vadd.f32 %v1633_v31, %v1603_v33  ;;  %v2206_v40 = vadd.f32 %v2205_v37, %v2204_v34  ;;  %v2207_v41 = vpop.f32.mrb[54].mxu1  ;;  %v2096_v42 = vpop.f32.mrb[55].mxu0 }
 0x174   : > { %v2097_v43 = vadd.f32 %v2096_v42, %v2095_v38  ;;  %v2208_v44 = vpop.f32.mrb[55].mxu1 }
 0x175   : > { %v1387_v45 = vadd.f32 %v2206_v40, %v2094_v36  ;;  %v2209_v46 = vadd.f32 %v2208_v44, %v2207_v41 }
 0x177   : > { %1534 = vst [vmem:[%s2609_s12 + $0xd0] sm:$0xff] %v1387_v45  ;;  %v1565_v47 = vadd.f32 %v1564_v32, %v1387_v45  ;;  %v1604_v48 = vmul.f32 %v1387_v45, %v1387_v45  ;;  %v1390_v49 = vadd.f32 %v2209_v46, %v2097_v43 }
 0x178   : > { %v2098_v50 = vpop.f32.mrb[56].mxu0 }
 0x179   : > { %v1635_v51 = vadd.f32 %v1634_v39, %v1604_v48  ;;  %1535 = vst [vmem:[%s2609_s12 + $0xd8] sm:$0xff] %v1390_v49  ;;  %v1566_v52 = vadd.f32 %v1565_v47, %v1390_v49  ;;  %v1605_v53 = vmul.f32 %v1390_v49, %v1390_v49  ;;  %v2210_v54 = vpop.f32.mrb[56].mxu1  ;;  %v2099_v55 = vpop.f32.mrb[57].mxu0 }
 0x17a   : > { %v2100_v56 = vadd.f32 %v2099_v55, %v2098_v50  ;;  %v2211_v57 = vpop.f32.mrb[57].mxu1  ;;  %v2101_v58 = vpop.f32.mrb[58].mxu0 }
 0x17b   : > { %v1636_v59 = vadd.f32 %v1635_v51, %v1605_v53  ;;  %v2212_v60 = vadd.f32 %v2211_v57, %v2210_v54  ;;  %v2213_v61 = vpop.f32.mrb[58].mxu1  ;;  %v2102_v62 = vpop.f32.mrb[59].mxu0 }
 0x17c   : > { %v2103_v63 = vadd.f32 %v2102_v62, %v2101_v58  ;;  %v2214_v0 = vpop.f32.mrb[59].mxu1 }
 0x17d   : > { %v1395_v1 = vadd.f32 %v2212_v60, %v2100_v56  ;;  %v2215_v2 = vadd.f32 %v2214_v0, %v2213_v61 }
 0x17f   : > { %1536 = vst [vmem:[%s2609_s12 + $0xe0] sm:$0xff] %v1395_v1  ;;  %v1567_v3 = vadd.f32 %v1566_v52, %v1395_v1  ;;  %v1606_v4 = vmul.f32 %v1395_v1, %v1395_v1  ;;  %v1398_v5 = vadd.f32 %v2215_v2, %v2103_v63 }
 0x180   : > { %v2104_v6 = vpop.f32.mrb[60].mxu0 }
 0x181   : > { %v1637_v7 = vadd.f32 %v1636_v59, %v1606_v4  ;;  %1537 = vst [vmem:[%s2609_s12 + $0xe8] sm:$0xff] %v1398_v5  ;;  %v1568_v8 = vadd.f32 %v1567_v3, %v1398_v5  ;;  %v1607_v9 = vmul.f32 %v1398_v5, %v1398_v5  ;;  %v2216_v10 = vpop.f32.mrb[60].mxu1  ;;  %v2105_v11 = vpop.f32.mrb[61].mxu0 }
 0x182   : > { %v2106_v12 = vadd.f32 %v2105_v11, %v2104_v6  ;;  %v2217_v13 = vpop.f32.mrb[61].mxu1  ;;  %v2107_v14 = vpop.f32.mrb[62].mxu0 }
 0x183   : > { %v1638_v15 = vadd.f32 %v1637_v7, %v1607_v9  ;;  %v2218_v16 = vadd.f32 %v2217_v13, %v2216_v10  ;;  %v2219_v17 = vpop.f32.mrb[62].mxu1  ;;  %v2108_v18 = vpop.f32.mrb[63].mxu0 }
 0x184   : > { %v2109_v19 = vadd.f32 %v2108_v18, %v2107_v14  ;;  %v2220_v20 = vpop.f32.mrb[63].mxu1 }
 0x185   : > { %v1403_v21 = vadd.f32 %v2218_v16, %v2106_v12  ;;  %v2221_v22 = vadd.f32 %v2220_v20, %v2219_v17 }
 0x187   : > { %1538 = vst [vmem:[%s2609_s12 + $0xf0] sm:$0xff] %v1403_v21  ;;  %v1569_v23 = vadd.f32 %v1568_v8, %v1403_v21  ;;  %v1608_v24 = vmul.f32 %v1403_v21, %v1403_v21  ;;  %v1406_v25 = vadd.f32 %v2221_v22, %v2109_v19 }
 0x189   : > { %v1639_v26 = vadd.f32 %v1638_v15, %v1608_v24  ;;  %1539 = vst [vmem:[%s2609_s12 + $0xf8] sm:$0xff] %v1406_v25  ;;  %v1570_v27 = vadd.f32 %v1569_v23, %v1406_v25  ;;  %v1609_v28 = vmul.f32 %v1406_v25, %v1406_v25 }
 0x18b   : > { %v1571_v29 = vrot.slane %v1570_v27, 4  ;;  %v1640_v30 = vadd.f32 %v1639_v26, %v1609_v28 }
 0x18d   : > { %v1572_v31 = vadd.f32 %v1571_v29, %v1570_v27  ;;  %v1641_v32 = vrot.slane %v1640_v30, 4 }
 0x18f   : > { %v1573_v33 = vrot.slane %v1572_v31, 2  ;;  %v1642_v34 = vadd.f32 %v1641_v32, %v1640_v30 }
 0x191   : > { %v1574_v35 = vadd.f32 %v1573_v33, %v1572_v31  ;;  %v1643_v36 = vrot.slane %v1642_v34, 2 }
 0x193   : > { %v1575_v37 = vrot.slane %v1574_v35, 1  ;;  %v1644_v38 = vadd.f32 %v1643_v36, %v1642_v34 }
 0x195   : > { %v1576_v39 = vadd.f32 %v1575_v37, %v1574_v35  ;;  %v1645_v40 = vrot.slane %v1644_v38, 1 }
 0x197   : > { %1577 = vst [vmem:[%s367_s24] sm:$0x1] %v1576_v39  ;;  %v1646_v41 = vadd.f32 %v1645_v40, %v1644_v38 }
 0x199   : > { %1647 = vst [vmem:[%s377_s27] sm:$0x1] %v1646_v41 }
 0x19a PF: > { %s15_s19 = sadd.s32 1, %s2428_s19   ;;  %s2672_s15 = smov %s2420_s17 }
 0x19b   : > { %p12_p8 = scmp.ge.s32.totalorder %s15_s19, 10   ;;  %s2673_s16 = smov %s2424_s18 }
 0x19c   : > { %s2674_s17 = smov %s2677_s20  ;;  %s2675_s18 = smov %s2681_s21 }
 0x19d   :  { %14 = sbr.rel (!%p12_p8) target bundleno = 3 (0x3), region = 93 }

// kernel: tile.18
= control target key start
LH: loop header
LB: loop body
LE: loop exit
PB: predicated region body
PF: predicated region fallthrough
CT: control target
= control target key end

     0   :  { %vm3_vm0 = vcmask 523264   ;;  %vm10_vm1 = vcmask 1048064   ;;  %s116_s0 = inlined_call_operand.vmem [shape: f32[16,64], index: 0, kind: input, shape index: {}]   ;;  %s117_s1 = inlined_call_operand.vmem [shape: f32[1,1024], index: 1, kind: output, shape index: {}]  }
   0x1   :  { %v66_v0 = vld [vmem:[%s116_s0 + $0x1] ss:$2 sm:$0xff]   ;;  %v2_v1 = vld [vmem:[%s116_s0] ss:$2 sm:$0xff]   ;;  %s75_s0 = smov 64  }
   0x2   :  { %8 = vrot.lane.b32.xlu0 %v66_v0, %s75_s0  ;;  %4 = vst.msk [vmem:[#allocation0] ss:$8 sm:$0xf] %vm3_vm0, %v2_v1   ;;  %5 = vst.msk [vmem:[#allocation0] ss:$8 sm:$0xf0] %vm3_vm0, %v2_v1  }
  0x74   :  { %v9_v2 = vpop.permute.xlu0 %8  }
  0x75   :  { %11 = vst.msk [vmem:[#allocation0] ss:$8 sm:$0xf] %vm10_vm1, %v9_v2   ;;  %12 = vst.msk [vmem:[#allocation0] ss:$8 sm:$0xf0] %vm10_vm1, %v9_v2  }
  0x7c   :  { %v16_v3 = vld [vmem:[#allocation0] sm:$0x1]  ;;  %v20_v4 = vld [vmem:[#allocation0 + $0x8] sm:$0x1]  ;;  %v25_v5 = vld [vmem:[#allocation0 + $0x10] sm:$0x1] }
  0x7d   :  { %18 = vst [vmem:[%s117_s1] sm:$0x1] %v16_v3  ;;  %67 = vst [vmem:[%s117_s1 + $0x1] sm:$0x1] %v20_v4  ;;  %v31_v6 = vld [vmem:[#allocation0 + $0x18] sm:$0x1] }
  0x7e   :  { %68 = vst [vmem:[%s117_s1 + $0x2] sm:$0x1] %v25_v5  ;;  %v37_v7 = vld [vmem:[#allocation0 + $0x20] sm:$0x1]  ;;  %v43_v8 = vld [vmem:[#allocation0 + $0x28] sm:$0x1] }
  0x7f   :  { %69 = vst [vmem:[%s117_s1 + $0x3] sm:$0x1] %v31_v6  ;;  %70 = vst [vmem:[%s117_s1 + $0x4] sm:$0x1] %v37_v7  ;;  %v49_v9 = vld [vmem:[#allocation0 + $0x30] sm:$0x1] }
  0x80   :  { %71 = vst [vmem:[%s117_s1 + $0x5] sm:$0x1] %v43_v8  ;;  %v55_v10 = vld [vmem:[#allocation0 + $0x38] sm:$0x1]  ;;  %72 = vst [vmem:[%s117_s1 + $0x6] sm:$0x1] %v49_v9 }
  0x81   :  { %73 = vst [vmem:[%s117_s1 + $0x7] sm:$0x1] %v55_v10 }

// kernel: generator_forward.14
= control target key start
LH: loop header
LB: loop body
LE: loop exit
PB: predicated region body
PF: predicated region fallthrough
CT: control target
= control target key end

     0   :  { %v144_v0 = vlaneseq  ;;  %s2090_s1 = inlined_call_operand.vmem [shape: f32[1,1024], index: 1, kind: input, shape index: {}]   ;;  %s2091_s2 = inlined_call_operand.vmem [shape: f32[1,1024], index: 2, kind: input, shape index: {}]   ;;  %s2092_s0 = inlined_call_operand.vmem [shape: f32[128,1024], index: 0, kind: input, shape index: {}]   ;;  %s2093_s3 = inlined_call_operand.vmem [shape: bf16[128,1024], index: 3, kind: output, shape index: {}]  }
   0x1   :  { %v142_v2 = vld [vmem:[%s2090_s1] sm:$0xff]  ;;  %v15_v9 = vld [vmem:[%s2092_s0 + $0x8] sm:$0xff]  ;;  %v16_v18 = vld [vmem:[%s2092_s0 + $0x10] sm:$0xff] }
   0x2   :  { %v1210_v1 = vshrl.u32 %v144_v0, 7  ;;  %v312_v3 = vld [vmem:[%s2091_s2] sm:$0xff]  ;;  %v17_v19 = vld [vmem:[%s2092_s0 + $0x18] sm:$0xff]  ;;  %v19_v25 = vld [vmem:[%s2092_s0 + $0x28] sm:$0xff] }
   0x3   :  { %v14_v8 = vld [vmem:[%s2092_s0] sm:$0xff]  ;;  %v20_v38 = vld [vmem:[%s2092_s0 + $0x30] sm:$0xff]  ;;  %v21_v39 = vld [vmem:[%s2092_s0 + $0x38] sm:$0xff] }
   0x4   :  { %v146_v4 = vsub.s32 0, %v1210_v1  ;;  %v150_v5 = vsub.s32 1, %v1210_v1  ;;  %v154_v6 = vsub.s32 2, %v1210_v1  ;;  %v158_v7 = vsub.s32 3, %v1210_v1  ;;  %v18_v24 = vld [vmem:[%s2092_s0 + $0x20] sm:$0xff]  ;;  %v23_v49 = vld [vmem:[%s2092_s0 + $0x48] sm:$0xff] }
   0x5   :  { %v162_v10 = vsub.s32 4, %v1210_v1  ;;  %v166_v11 = vsub.s32 5, %v1210_v1  ;;  %v170_v12 = vsub.s32 6, %v1210_v1  ;;  %v174_v13 = vsub.s32 7, %v1210_v1  ;;  %v22_v48 = vld [vmem:[%s2092_s0 + $0x40] sm:$0xff]  ;;  %v24_v54 = vld [vmem:[%s2092_s0 + $0x50] sm:$0xff] }
   0x6   :  { %v1232_v14 = vrot.slane %v142_v2, %v146_v4  ;;  %v1234_v15 = vrot.slane %v142_v2, %v150_v5  ;;  %v1236_v16 = vrot.slane %v312_v3, %v146_v4  ;;  %v1238_v17 = vrot.slane %v312_v3, %v150_v5  ;;  %v25_v55 = vld [vmem:[%s2092_s0 + $0x58] sm:$0xff]  ;;  %v26_v60 = vld [vmem:[%s2092_s0 + $0x60] sm:$0xff]  ;;  %v27_v1 = vld [vmem:[%s2092_s0 + $0x68] sm:$0xff] }
   0x7   :  { %v1246_v20 = vrot.slane %v142_v2, %v154_v6  ;;  %v1248_v21 = vrot.slane %v142_v2, %v158_v7  ;;  %v1250_v22 = vrot.slane %v312_v3, %v154_v6  ;;  %v1252_v23 = vrot.slane %v312_v3, %v158_v7 }
   0x8   :  { %v184_v26 = vmul.f32 %v1232_v14, %v14_v8  ;;  %v185_v27 = vmul.f32 %v1234_v15, %v15_v9  ;;  %v1262_v28 = vrot.slane %v142_v2, %v162_v10  ;;  %v1264_v29 = vrot.slane %v142_v2, %v166_v11 }
   0x9   :  { %v186_v30 = vmul.f32 %v1246_v20, %v16_v18  ;;  %v187_v31 = vmul.f32 %v1248_v21, %v17_v19  ;;  %v1268_v32 = vrot.slane %v312_v3, %v162_v10  ;;  %v1270_v33 = vrot.slane %v312_v3, %v166_v11  ;;  %v28_v10 = vld [vmem:[%s2092_s0 + $0x70] sm:$0xff]  ;;  %v29_v19 = vld [vmem:[%s2092_s0 + $0x78] sm:$0xff] }
   0xa   :  { %v354_v34 = vadd.f32 %v1236_v16, %v184_v26  ;;  %v355_v35 = vadd.f32 %v1238_v17, %v185_v27  ;;  %v188_v36 = vmul.f32 %v1262_v28, %v18_v24  ;;  %v189_v37 = vmul.f32 %v1264_v29, %v19_v25 }
   0xb   :  { %v356_v40 = vadd.f32 %v1250_v22, %v186_v30  ;;  %v357_v41 = vadd.f32 %v1252_v23, %v187_v31  ;;  %v1284_v42 = vrot.slane %v142_v2, %v170_v12  ;;  %v1286_v43 = vrot.slane %v142_v2, %v174_v13  ;;  %v30_v30 = vld [vmem:[%s2092_s0 + $0x80] sm:$0xff] }
   0xc   :  { %v482_v44 = vmax.f32 %v354_v34, 0.0  ;;  %v483_v45 = vmax.f32 %v355_v35, 0.0  ;;  %v358_v46 = vadd.f32 %v1268_v32, %v188_v36  ;;  %v359_v47 = vadd.f32 %v1270_v33, %v189_v37  ;;  %v31_v37 = vld [vmem:[%s2092_s0 + $0x88] sm:$0xff] }
   0xd   :  { %v484_v50 = vmax.f32 %v356_v40, 0.0  ;;  %v485_v51 = vmax.f32 %v357_v41, 0.0  ;;  %v190_v52 = vmul.f32 %v1284_v42, %v20_v38  ;;  %v191_v53 = vmul.f32 %v1286_v43, %v21_v39  ;;  %v32_v38 = vld [vmem:[%s2092_s0 + $0x90] sm:$0xff]  ;;  %v33_v39 = vld [vmem:[%s2092_s0 + $0x98] sm:$0xff] }
   0xe   :  { %v1126_v56 = vpack.c.bf16 %v483_v45, %v482_v44  ;;  %v486_v57 = vmax.f32 %v358_v46, 0.0  ;;  %v487_v58 = vmax.f32 %v359_v47, 0.0  ;;  %v1304_v59 = vrot.slane %v312_v3, %v170_v12  ;;  %v34_v46 = vld [vmem:[%s2092_s0 + $0xa0] sm:$0xff] }
   0xf   :  { %v1127_v61 = vpack.c.bf16 %v485_v51, %v484_v50  ;;  %v1309_v62 = vrot.slane %v312_v3, %v174_v13  ;;  %v192_v63 = vmul.f32 %v1232_v14, %v22_v48  ;;  %v193_v0 = vmul.f32 %v1234_v15, %v23_v49 }
  0x10   :  { %994 = vst [vmem:[%s2093_s3] sm:$0xff] %v1126_v56  ;;  %v1128_v2 = vpack.c.bf16 %v487_v58, %v486_v57  ;;  %v360_v4 = vadd.f32 %v1304_v59, %v190_v52  ;;  %v194_v5 = vmul.f32 %v1246_v20, %v24_v54  ;;  %v195_v3 = vmul.f32 %v1248_v21, %v25_v55  ;;  %v35_v55 = vld [vmem:[%s2092_s0 + $0xa8] sm:$0xff]  ;;  %v36_v56 = vld [vmem:[%s2092_s0 + $0xb0] sm:$0xff] }
  0x11   :  { %995 = vst [vmem:[%s2093_s3 + $0x8] sm:$0xff] %v1127_v61  ;;  %v361_v6 = vadd.f32 %v1309_v62, %v191_v53  ;;  %v362_v7 = vadd.f32 %v1236_v16, %v192_v63  ;;  %v363_v8 = vadd.f32 %v1238_v17, %v193_v0  ;;  %v196_v9 = vmul.f32 %v1262_v28, %v26_v60 }
  0x12   :  { %996 = vst [vmem:[%s2093_s3 + $0x10] sm:$0xff] %v1128_v2  ;;  %v488_v11 = vmax.f32 %v360_v4, 0.0  ;;  %v364_v12 = vadd.f32 %v1250_v22, %v194_v5  ;;  %v365_v13 = vadd.f32 %v1252_v23, %v195_v3  ;;  %v197_v18 = vmul.f32 %v1264_v29, %v27_v1  ;;  %v37_v4 = vld [vmem:[%s2092_s0 + $0xb8] sm:$0xff] }
  0x13   :  { %v489_v24 = vmax.f32 %v361_v6, 0.0  ;;  %v490_v25 = vmax.f32 %v362_v7, 0.0  ;;  %v491_v26 = vmax.f32 %v363_v8, 0.0  ;;  %v366_v27 = vadd.f32 %v1268_v32, %v196_v9  ;;  %v38_v8 = vld [vmem:[%s2092_s0 + $0xc0] sm:$0xff]  ;;  %v39_v9 = vld [vmem:[%s2092_s0 + $0xc8] sm:$0xff] }
  0x14   :  { %v492_v31 = vmax.f32 %v364_v12, 0.0  ;;  %v493_v34 = vmax.f32 %v365_v13, 0.0  ;;  %v367_v35 = vadd.f32 %v1270_v33, %v197_v18  ;;  %v198_v36 = vmul.f32 %v1284_v42, %v28_v10  ;;  %v40_v18 = vld [vmem:[%s2092_s0 + $0xd0] sm:$0xff] }
  0x15   :  { %v1129_v40 = vpack.c.bf16 %v489_v24, %v488_v11  ;;  %v1130_v41 = vpack.c.bf16 %v491_v26, %v490_v25  ;;  %v494_v44 = vmax.f32 %v366_v27, 0.0  ;;  %v199_v45 = vmul.f32 %v1286_v43, %v29_v19  ;;  %v41_v27 = vld [vmem:[%s2092_s0 + $0xd8] sm:$0xff] }
  0x16   :  { %v1131_v47 = vpack.c.bf16 %v493_v34, %v492_v31  ;;  %v495_v48 = vmax.f32 %v367_v35, 0.0  ;;  %v368_v49 = vadd.f32 %v1304_v59, %v198_v36  ;;  %v200_v50 = vmul.f32 %v1232_v14, %v30_v30  ;;  %v42_v30 = vld [vmem:[%s2092_s0 + $0xe0] sm:$0xff] }
  0x17   :  { %997 = vst [vmem:[%s2093_s3 + $0x18] sm:$0xff] %v1129_v40  ;;  %998 = vst [vmem:[%s2093_s3 + $0x20] sm:$0xff] %v1130_v41  ;;  %v369_v51 = vadd.f32 %v1309_v62, %v199_v45  ;;  %v201_v52 = vmul.f32 %v1234_v15, %v31_v37  ;;  %v202_v53 = vmul.f32 %v1246_v20, %v32_v38  ;;  %v43_v37 = vld [vmem:[%s2092_s0 + $0xe8] sm:$0xff] }
  0x18   :  { %v203_v54 = vmul.f32 %v1248_v21, %v33_v39  ;;  %999 = vst [vmem:[%s2093_s3 + $0x28] sm:$0xff] %v1131_v47  ;;  %v1132_v57 = vpack.c.bf16 %v495_v48, %v494_v44  ;;  %v496_v58 = vmax.f32 %v368_v49, 0.0  ;;  %v370_v60 = vadd.f32 %v1236_v16, %v200_v50  ;;  %v44_v48 = vld [vmem:[%s2092_s0 + $0xf0] sm:$0xff] }
  0x19   :  { %v204_v61 = vmul.f32 %v1262_v28, %v34_v46  ;;  %v497_v63 = vmax.f32 %v369_v51, 0.0  ;;  %v371_v0 = vadd.f32 %v1238_v17, %v201_v52  ;;  %v372_v1 = vadd.f32 %v1250_v22, %v202_v53  ;;  %v45_v53 = vld [vmem:[%s2092_s0 + $0xf8] sm:$0xff] }
  0x1a   :  { %v373_v2 = vadd.f32 %v1252_v23, %v203_v54  ;;  %1000 = vst [vmem:[%s2093_s3 + $0x30] sm:$0xff] %v1132_v57  ;;  %v498_v5 = vmax.f32 %v370_v60, 0.0  ;;  %v205_v3 = vmul.f32 %v1264_v29, %v35_v55  ;;  %v206_v7 = vmul.f32 %v1284_v42, %v36_v56  ;;  %v47_v60 = vld [vmem:[%s2092_s0 + $0x108] sm:$0xff] }
  0x1b   :  { %v374_v6 = vadd.f32 %v1268_v32, %v204_v61  ;;  %v1133_v10 = vpack.c.bf16 %v497_v63, %v496_v58  ;;  %v499_v11 = vmax.f32 %v371_v0, 0.0  ;;  %v500_v12 = vmax.f32 %v372_v1, 0.0  ;;  %v46_v58 = vld [vmem:[%s2092_s0 + $0x100] sm:$0xff] }
  0x1c   :  { %v501_v13 = vmax.f32 %v373_v2, 0.0  ;;  %v375_v19 = vadd.f32 %v1270_v33, %v205_v3  ;;  %v207_v25 = vmul.f32 %v1286_v43, %v37_v4  ;;  %v376_v26 = vadd.f32 %v1304_v59, %v206_v7  ;;  %v48_v2 = vld [vmem:[%s2092_s0 + $0x110] sm:$0xff]  ;;  %v49_v4 = vld [vmem:[%s2092_s0 + $0x118] sm:$0xff] }
  0x1d   :  { %v502_v24 = vmax.f32 %v374_v6, 0.0  ;;  %1001 = vst [vmem:[%s2093_s3 + $0x38] sm:$0xff] %v1133_v10  ;;  %v1134_v31 = vpack.c.bf16 %v499_v11, %v498_v5  ;;  %v208_v35 = vmul.f32 %v1232_v14, %v38_v8  ;;  %v209_v36 = vmul.f32 %v1234_v15, %v39_v9 }
  0x1e   :  { %v1135_v34 = vpack.c.bf16 %v501_v13, %v500_v12  ;;  %v503_v38 = vmax.f32 %v375_v19, 0.0  ;;  %v377_v39 = vadd.f32 %v1309_v62, %v207_v25  ;;  %v504_v40 = vmax.f32 %v376_v26, 0.0  ;;  %v50_v12 = vld [vmem:[%s2092_s0 + $0x120] sm:$0xff]  ;;  %v51_v25 = vld [vmem:[%s2092_s0 + $0x128] sm:$0xff]  ;;  %v52_v26 = vld [vmem:[%s2092_s0 + $0x130] sm:$0xff] }
  0x1f   :  { %v210_v41 = vmul.f32 %v1246_v20, %v40_v18  ;;  %1002 = vst [vmem:[%s2093_s3 + $0x40] sm:$0xff] %v1134_v31  ;;  %v378_v44 = vadd.f32 %v1236_v16, %v208_v35  ;;  %v379_v45 = vadd.f32 %v1238_v17, %v209_v36  ;;  %v211_v46 = vmul.f32 %v1248_v21, %v41_v27 }
  0x20   :  { %1003 = vst [vmem:[%s2093_s3 + $0x48] sm:$0xff] %v1135_v34  ;;  %v212_v47 = vmul.f32 %v1262_v28, %v42_v30  ;;  %v1136_v49 = vpack.c.bf16 %v503_v38, %v502_v24  ;;  %v505_v50 = vmax.f32 %v377_v39, 0.0  ;;  %v213_v52 = vmul.f32 %v1264_v29, %v43_v37  ;;  %v53_v39 = vld [vmem:[%s2092_s0 + $0x138] sm:$0xff] }
  0x21   :  { %v380_v51 = vadd.f32 %v1250_v22, %v210_v41  ;;  %v506_v54 = vmax.f32 %v378_v44, 0.0  ;;  %v507_v55 = vmax.f32 %v379_v45, 0.0  ;;  %v381_v56 = vadd.f32 %v1252_v23, %v211_v46  ;;  %v54_v46 = vld [vmem:[%s2092_s0 + $0x140] sm:$0xff] }
  0x22   :  { %v382_v57 = vadd.f32 %v1268_v32, %v212_v47  ;;  %1004 = vst [vmem:[%s2093_s3 + $0x50] sm:$0xff] %v1136_v49  ;;  %v1137_v61 = vpack.c.bf16 %v505_v50, %v504_v40  ;;  %v383_v0 = vadd.f32 %v1270_v33, %v213_v52  ;;  %v214_v1 = vmul.f32 %v1284_v42, %v44_v48  ;;  %v55_v47 = vld [vmem:[%s2092_s0 + $0x148] sm:$0xff]  ;;  %v56_v52 = vld [vmem:[%s2092_s0 + $0x150] sm:$0xff] }
  0x23   :  { %v508_v63 = vmax.f32 %v380_v51, 0.0  ;;  %v1138_v5 = vpack.c.bf16 %v507_v55, %v506_v54  ;;  %v509_v3 = vmax.f32 %v381_v56, 0.0  ;;  %v215_v7 = vmul.f32 %v1286_v43, %v45_v53 }
  0x24   :  { %v510_v6 = vmax.f32 %v382_v57, 0.0  ;;  %1005 = vst [vmem:[%s2093_s3 + $0x58] sm:$0xff] %v1137_v61  ;;  %v511_v8 = vmax.f32 %v383_v0, 0.0  ;;  %v384_v9 = vadd.f32 %v1304_v59, %v214_v1  ;;  %v216_v10 = vmul.f32 %v1232_v14, %v46_v58  ;;  %v57_v57 = vld [vmem:[%s2092_s0 + $0x158] sm:$0xff]  ;;  %v58_v58 = vld [vmem:[%s2092_s0 + $0x160] sm:$0xff]  ;;  %v59_v1 = vld [vmem:[%s2092_s0 + $0x168] sm:$0xff] }
  0x25   :  { %v217_v11 = vmul.f32 %v1234_v15, %v47_v60  ;;  %1006 = vst [vmem:[%s2093_s3 + $0x60] sm:$0xff] %v1138_v5  ;;  %v1139_v13 = vpack.c.bf16 %v509_v3, %v508_v63  ;;  %v385_v18 = vadd.f32 %v1309_v62, %v215_v7  ;;  %v218_v19 = vmul.f32 %v1246_v20, %v48_v2 }
  0x26   :  { %v219_v24 = vmul.f32 %v1248_v21, %v49_v4  ;;  %v1140_v27 = vpack.c.bf16 %v511_v8, %v510_v6  ;;  %v512_v30 = vmax.f32 %v384_v9, 0.0  ;;  %v386_v31 = vadd.f32 %v1236_v16, %v216_v10  ;;  %v60_v10 = vld [vmem:[%s2092_s0 + $0x170] sm:$0xff] }
  0x27   :  { %v387_v34 = vadd.f32 %v1238_v17, %v217_v11  ;;  %1007 = vst [vmem:[%s2093_s3 + $0x68] sm:$0xff] %v1139_v13  ;;  %v513_v35 = vmax.f32 %v385_v18, 0.0  ;;  %v388_v36 = vadd.f32 %v1250_v22, %v218_v19  ;;  %v220_v38 = vmul.f32 %v1262_v28, %v50_v12  ;;  %v61_v19 = vld [vmem:[%s2092_s0 + $0x178] sm:$0xff] }
  0x28   :  { %v389_v37 = vadd.f32 %v1252_v23, %v219_v24  ;;  %1008 = vst [vmem:[%s2093_s3 + $0x70] sm:$0xff] %v1140_v27  ;;  %v514_v40 = vmax.f32 %v386_v31, 0.0  ;;  %v221_v44 = vmul.f32 %v1264_v29, %v51_v25  ;;  %v222_v45 = vmul.f32 %v1284_v42, %v52_v26  ;;  %v63_v31 = vld [vmem:[%s2092_s0 + $0x188] sm:$0xff] }
  0x29   :  { %v515_v41 = vmax.f32 %v387_v34, 0.0  ;;  %v1141_v48 = vpack.c.bf16 %v513_v35, %v512_v30  ;;  %v516_v49 = vmax.f32 %v388_v36, 0.0  ;;  %v390_v51 = vadd.f32 %v1268_v32, %v220_v38  ;;  %v62_v30 = vld [vmem:[%s2092_s0 + $0x180] sm:$0xff]  ;;  %v64_v38 = vld [vmem:[%s2092_s0 + $0x190] sm:$0xff] }
  0x2a   :  { %v517_v50 = vmax.f32 %v389_v37, 0.0  ;;  %v391_v54 = vadd.f32 %v1270_v33, %v221_v44  ;;  %v223_v55 = vmul.f32 %v1286_v43, %v53_v39  ;;  %v392_v56 = vadd.f32 %v1304_v59, %v222_v45  ;;  %v65_v39 = vld [vmem:[%s2092_s0 + $0x198] sm:$0xff] }
  0x2b   :  { %v1142_v53 = vpack.c.bf16 %v515_v41, %v514_v40  ;;  %1009 = vst [vmem:[%s2093_s3 + $0x78] sm:$0xff] %v1141_v48  ;;  %v518_v61 = vmax.f32 %v390_v51, 0.0  ;;  %v224_v63 = vmul.f32 %v1232_v14, %v54_v46  ;;  %v225_v0 = vmul.f32 %v1234_v15, %v55_v47 }
  0x2c   :  { %v1143_v60 = vpack.c.bf16 %v517_v50, %v516_v49  ;;  %v519_v2 = vmax.f32 %v391_v54, 0.0  ;;  %v393_v4 = vadd.f32 %v1309_v62, %v223_v55  ;;  %v520_v5 = vmax.f32 %v392_v56, 0.0  ;;  %v66_v50 = vld [vmem:[%s2092_s0 + $0x1a0] sm:$0xff]  ;;  %v67_v55 = vld [vmem:[%s2092_s0 + $0x1a8] sm:$0xff]  ;;  %v68_v56 = vld [vmem:[%s2092_s0 + $0x1b0] sm:$0xff] }
  0x2d   :  { %1010 = vst [vmem:[%s2093_s3 + $0x80] sm:$0xff] %v1142_v53  ;;  %v226_v3 = vmul.f32 %v1246_v20, %v56_v52  ;;  %v394_v6 = vadd.f32 %v1236_v16, %v224_v63  ;;  %v395_v7 = vadd.f32 %v1238_v17, %v225_v0  ;;  %v227_v8 = vmul.f32 %v1248_v21, %v57_v57 }
  0x2e   :  { %1011 = vst [vmem:[%s2093_s3 + $0x88] sm:$0xff] %v1143_v60  ;;  %v228_v9 = vmul.f32 %v1262_v28, %v58_v58  ;;  %v1144_v11 = vpack.c.bf16 %v519_v2, %v518_v61  ;;  %v521_v12 = vmax.f32 %v393_v4, 0.0  ;;  %v229_v18 = vmul.f32 %v1264_v29, %v59_v1  ;;  %v69_v4 = vld [vmem:[%s2092_s0 + $0x1b8] sm:$0xff] }
  0x2f   :  { %v396_v13 = vadd.f32 %v1250_v22, %v226_v3  ;;  %v522_v24 = vmax.f32 %v394_v6, 0.0  ;;  %v523_v25 = vmax.f32 %v395_v7, 0.0  ;;  %v397_v26 = vadd.f32 %v1252_v23, %v227_v8  ;;  %v70_v8 = vld [vmem:[%s2092_s0 + $0x1c0] sm:$0xff] }
  0x30   :  { %v398_v27 = vadd.f32 %v1268_v32, %v228_v9  ;;  %1012 = vst [vmem:[%s2093_s3 + $0x90] sm:$0xff] %v1144_v11  ;;  %v1145_v34 = vpack.c.bf16 %v521_v12, %v520_v5  ;;  %v399_v36 = vadd.f32 %v1270_v33, %v229_v18  ;;  %v230_v37 = vmul.f32 %v1284_v42, %v60_v10  ;;  %v71_v9 = vld [vmem:[%s2092_s0 + $0x1c8] sm:$0xff]  ;;  %v72_v18 = vld [vmem:[%s2092_s0 + $0x1d0] sm:$0xff] }
  0x31   :  { %v524_v35 = vmax.f32 %v396_v13, 0.0  ;;  %v1146_v40 = vpack.c.bf16 %v523_v25, %v522_v24  ;;  %v525_v41 = vmax.f32 %v397_v26, 0.0  ;;  %v231_v45 = vmul.f32 %v1286_v43, %v61_v19 }
  0x32   :  { %v526_v44 = vmax.f32 %v398_v27, 0.0  ;;  %1013 = vst [vmem:[%s2093_s3 + $0x98] sm:$0xff] %v1145_v34  ;;  %v527_v46 = vmax.f32 %v399_v36, 0.0  ;;  %v400_v47 = vadd.f32 %v1304_v59, %v230_v37  ;;  %v232_v48 = vmul.f32 %v1232_v14, %v62_v30  ;;  %v73_v27 = vld [vmem:[%s2092_s0 + $0x1d8] sm:$0xff]  ;;  %v74_v30 = vld [vmem:[%s2092_s0 + $0x1e0] sm:$0xff]  ;;  %v75_v37 = vld [vmem:[%s2092_s0 + $0x1e8] sm:$0xff] }
  0x33   :  { %v233_v49 = vmul.f32 %v1234_v15, %v63_v31  ;;  %1014 = vst [vmem:[%s2093_s3 + $0xa0] sm:$0xff] %v1146_v40  ;;  %v1147_v51 = vpack.c.bf16 %v525_v41, %v524_v35  ;;  %v401_v52 = vadd.f32 %v1309_v62, %v231_v45  ;;  %v234_v53 = vmul.f32 %v1246_v20, %v64_v38 }
  0x34   :  { %v235_v54 = vmul.f32 %v1248_v21, %v65_v39  ;;  %v1148_v57 = vpack.c.bf16 %v527_v46, %v526_v44  ;;  %v528_v58 = vmax.f32 %v400_v47, 0.0  ;;  %v402_v60 = vadd.f32 %v1236_v16, %v232_v48  ;;  %v76_v48 = vld [vmem:[%s2092_s0 + $0x1f0] sm:$0xff] }
  0x35   :  { %v403_v61 = vadd.f32 %v1238_v17, %v233_v49  ;;  %1015 = vst [vmem:[%s2093_s3 + $0xa8] sm:$0xff] %v1147_v51  ;;  %v529_v63 = vmax.f32 %v401_v52, 0.0  ;;  %v404_v0 = vadd.f32 %v1250_v22, %v234_v53  ;;  %v236_v2 = vmul.f32 %v1262_v28, %v66_v50  ;;  %v77_v53 = vld [vmem:[%s2092_s0 + $0x1f8] sm:$0xff] }
  0x36   :  { %v405_v1 = vadd.f32 %v1252_v23, %v235_v54  ;;  %1016 = vst [vmem:[%s2093_s3 + $0xb0] sm:$0xff] %v1148_v57  ;;  %v530_v5 = vmax.f32 %v402_v60, 0.0  ;;  %v237_v6 = vmul.f32 %v1264_v29, %v67_v55  ;;  %v238_v7 = vmul.f32 %v1284_v42, %v68_v56  ;;  %v79_v60 = vld [vmem:[%s2092_s0 + $0x208] sm:$0xff] }
  0x37   :  { %v531_v3 = vmax.f32 %v403_v61, 0.0  ;;  %v1149_v10 = vpack.c.bf16 %v529_v63, %v528_v58  ;;  %v532_v11 = vmax.f32 %v404_v0, 0.0  ;;  %v406_v13 = vadd.f32 %v1268_v32, %v236_v2  ;;  %v78_v58 = vld [vmem:[%s2092_s0 + $0x200] sm:$0xff]  ;;  %v80_v2 = vld [vmem:[%s2092_s0 + $0x210] sm:$0xff] }
  0x38   :  { %v533_v12 = vmax.f32 %v405_v1, 0.0  ;;  %v407_v24 = vadd.f32 %v1270_v33, %v237_v6  ;;  %v239_v25 = vmul.f32 %v1286_v43, %v69_v4  ;;  %v408_v26 = vadd.f32 %v1304_v59, %v238_v7  ;;  %v81_v4 = vld [vmem:[%s2092_s0 + $0x218] sm:$0xff] }
  0x39   :  { %v1150_v19 = vpack.c.bf16 %v531_v3, %v530_v5  ;;  %1017 = vst [vmem:[%s2093_s3 + $0xb8] sm:$0xff] %v1149_v10  ;;  %v534_v34 = vmax.f32 %v406_v13, 0.0  ;;  %v240_v35 = vmul.f32 %v1232_v14, %v70_v8  ;;  %v241_v36 = vmul.f32 %v1234_v15, %v71_v9 }
  0x3a   :  { %v1151_v31 = vpack.c.bf16 %v533_v12, %v532_v11  ;;  %v535_v38 = vmax.f32 %v407_v24, 0.0  ;;  %v409_v39 = vadd.f32 %v1309_v62, %v239_v25  ;;  %v536_v40 = vmax.f32 %v408_v26, 0.0  ;;  %v82_v12 = vld [vmem:[%s2092_s0 + $0x220] sm:$0xff]  ;;  %v83_v25 = vld [vmem:[%s2092_s0 + $0x228] sm:$0xff]  ;;  %v84_v26 = vld [vmem:[%s2092_s0 + $0x230] sm:$0xff] }
  0x3b   :  { %1018 = vst [vmem:[%s2093_s3 + $0xc0] sm:$0xff] %v1150_v19  ;;  %v242_v41 = vmul.f32 %v1246_v20, %v72_v18  ;;  %v410_v44 = vadd.f32 %v1236_v16, %v240_v35  ;;  %v411_v45 = vadd.f32 %v1238_v17, %v241_v36  ;;  %v243_v46 = vmul.f32 %v1248_v21, %v73_v27 }
  0x3c   :  { %1019 = vst [vmem:[%s2093_s3 + $0xc8] sm:$0xff] %v1151_v31  ;;  %v244_v47 = vmul.f32 %v1262_v28, %v74_v30  ;;  %v1152_v49 = vpack.c.bf16 %v535_v38, %v534_v34  ;;  %v537_v50 = vmax.f32 %v409_v39, 0.0  ;;  %v245_v52 = vmul.f32 %v1264_v29, %v75_v37  ;;  %v85_v39 = vld [vmem:[%s2092_s0 + $0x238] sm:$0xff] }
  0x3d   :  { %v412_v51 = vadd.f32 %v1250_v22, %v242_v41  ;;  %v538_v54 = vmax.f32 %v410_v44, 0.0  ;;  %v539_v55 = vmax.f32 %v411_v45, 0.0  ;;  %v413_v56 = vadd.f32 %v1252_v23, %v243_v46  ;;  %v86_v46 = vld [vmem:[%s2092_s0 + $0x240] sm:$0xff] }
  0x3e   :  { %v414_v57 = vadd.f32 %v1268_v32, %v244_v47  ;;  %1020 = vst [vmem:[%s2093_s3 + $0xd0] sm:$0xff] %v1152_v49  ;;  %v1153_v61 = vpack.c.bf16 %v537_v50, %v536_v40  ;;  %v415_v0 = vadd.f32 %v1270_v33, %v245_v52  ;;  %v246_v1 = vmul.f32 %v1284_v42, %v76_v48  ;;  %v87_v47 = vld [vmem:[%s2092_s0 + $0x248] sm:$0xff]  ;;  %v88_v52 = vld [vmem:[%s2092_s0 + $0x250] sm:$0xff] }
  0x3f   :  { %v540_v63 = vmax.f32 %v412_v51, 0.0  ;;  %v1154_v5 = vpack.c.bf16 %v539_v55, %v538_v54  ;;  %v541_v3 = vmax.f32 %v413_v56, 0.0  ;;  %v247_v7 = vmul.f32 %v1286_v43, %v77_v53 }
  0x40   :  { %v542_v6 = vmax.f32 %v414_v57, 0.0  ;;  %1021 = vst [vmem:[%s2093_s3 + $0xd8] sm:$0xff] %v1153_v61  ;;  %v543_v8 = vmax.f32 %v415_v0, 0.0  ;;  %v416_v9 = vadd.f32 %v1304_v59, %v246_v1  ;;  %v248_v10 = vmul.f32 %v1232_v14, %v78_v58  ;;  %v89_v57 = vld [vmem:[%s2092_s0 + $0x258] sm:$0xff]  ;;  %v90_v58 = vld [vmem:[%s2092_s0 + $0x260] sm:$0xff]  ;;  %v91_v1 = vld [vmem:[%s2092_s0 + $0x268] sm:$0xff] }
  0x41   :  { %v249_v11 = vmul.f32 %v1234_v15, %v79_v60  ;;  %1022 = vst [vmem:[%s2093_s3 + $0xe0] sm:$0xff] %v1154_v5  ;;  %v1155_v13 = vpack.c.bf16 %v541_v3, %v540_v63  ;;  %v417_v18 = vadd.f32 %v1309_v62, %v247_v7  ;;  %v250_v19 = vmul.f32 %v1246_v20, %v80_v2 }
  0x42   :  { %v251_v24 = vmul.f32 %v1248_v21, %v81_v4  ;;  %v1156_v27 = vpack.c.bf16 %v543_v8, %v542_v6  ;;  %v544_v30 = vmax.f32 %v416_v9, 0.0  ;;  %v418_v31 = vadd.f32 %v1236_v16, %v248_v10  ;;  %v92_v10 = vld [vmem:[%s2092_s0 + $0x270] sm:$0xff] }
  0x43   :  { %v419_v34 = vadd.f32 %v1238_v17, %v249_v11  ;;  %1023 = vst [vmem:[%s2093_s3 + $0xe8] sm:$0xff] %v1155_v13  ;;  %v545_v35 = vmax.f32 %v417_v18, 0.0  ;;  %v420_v36 = vadd.f32 %v1250_v22, %v250_v19  ;;  %v252_v38 = vmul.f32 %v1262_v28, %v82_v12  ;;  %v93_v19 = vld [vmem:[%s2092_s0 + $0x278] sm:$0xff] }
  0x44   :  { %v421_v37 = vadd.f32 %v1252_v23, %v251_v24  ;;  %1024 = vst [vmem:[%s2093_s3 + $0xf0] sm:$0xff] %v1156_v27  ;;  %v546_v40 = vmax.f32 %v418_v31, 0.0  ;;  %v253_v44 = vmul.f32 %v1264_v29, %v83_v25  ;;  %v254_v45 = vmul.f32 %v1284_v42, %v84_v26  ;;  %v95_v31 = vld [vmem:[%s2092_s0 + $0x288] sm:$0xff] }
  0x45   :  { %v547_v41 = vmax.f32 %v419_v34, 0.0  ;;  %v1157_v48 = vpack.c.bf16 %v545_v35, %v544_v30  ;;  %v548_v49 = vmax.f32 %v420_v36, 0.0  ;;  %v422_v51 = vadd.f32 %v1268_v32, %v252_v38  ;;  %v94_v30 = vld [vmem:[%s2092_s0 + $0x280] sm:$0xff]  ;;  %v96_v38 = vld [vmem:[%s2092_s0 + $0x290] sm:$0xff] }
  0x46   :  { %v549_v50 = vmax.f32 %v421_v37, 0.0  ;;  %v423_v54 = vadd.f32 %v1270_v33, %v253_v44  ;;  %v255_v55 = vmul.f32 %v1286_v43, %v85_v39  ;;  %v424_v56 = vadd.f32 %v1304_v59, %v254_v45  ;;  %v97_v39 = vld [vmem:[%s2092_s0 + $0x298] sm:$0xff] }
  0x47   :  { %v1158_v53 = vpack.c.bf16 %v547_v41, %v546_v40  ;;  %1025 = vst [vmem:[%s2093_s3 + $0xf8] sm:$0xff] %v1157_v48  ;;  %v550_v61 = vmax.f32 %v422_v51, 0.0  ;;  %v256_v63 = vmul.f32 %v1232_v14, %v86_v46  ;;  %v257_v0 = vmul.f32 %v1234_v15, %v87_v47 }
  0x48   :  { %v1159_v60 = vpack.c.bf16 %v549_v50, %v548_v49  ;;  %v551_v2 = vmax.f32 %v423_v54, 0.0  ;;  %v425_v4 = vadd.f32 %v1309_v62, %v255_v55  ;;  %v552_v5 = vmax.f32 %v424_v56, 0.0  ;;  %v98_v50 = vld [vmem:[%s2092_s0 + $0x2a0] sm:$0xff]  ;;  %v99_v55 = vld [vmem:[%s2092_s0 + $0x2a8] sm:$0xff]  ;;  %v100_v56 = vld [vmem:[%s2092_s0 + $0x2b0] sm:$0xff] }
  0x49   :  { %1026 = vst [vmem:[%s2093_s3 + $0x100] sm:$0xff] %v1158_v53  ;;  %v258_v3 = vmul.f32 %v1246_v20, %v88_v52  ;;  %v426_v6 = vadd.f32 %v1236_v16, %v256_v63  ;;  %v427_v7 = vadd.f32 %v1238_v17, %v257_v0  ;;  %v259_v8 = vmul.f32 %v1248_v21, %v89_v57 }
  0x4a   :  { %1027 = vst [vmem:[%s2093_s3 + $0x108] sm:$0xff] %v1159_v60  ;;  %v260_v9 = vmul.f32 %v1262_v28, %v90_v58  ;;  %v1160_v11 = vpack.c.bf16 %v551_v2, %v550_v61  ;;  %v553_v12 = vmax.f32 %v425_v4, 0.0  ;;  %v261_v18 = vmul.f32 %v1264_v29, %v91_v1  ;;  %v101_v4 = vld [vmem:[%s2092_s0 + $0x2b8] sm:$0xff] }
  0x4b   :  { %v428_v13 = vadd.f32 %v1250_v22, %v258_v3  ;;  %v554_v24 = vmax.f32 %v426_v6, 0.0  ;;  %v555_v25 = vmax.f32 %v427_v7, 0.0  ;;  %v429_v26 = vadd.f32 %v1252_v23, %v259_v8  ;;  %v102_v8 = vld [vmem:[%s2092_s0 + $0x2c0] sm:$0xff] }
  0x4c   :  { %v430_v27 = vadd.f32 %v1268_v32, %v260_v9  ;;  %1028 = vst [vmem:[%s2093_s3 + $0x110] sm:$0xff] %v1160_v11  ;;  %v1161_v34 = vpack.c.bf16 %v553_v12, %v552_v5  ;;  %v431_v36 = vadd.f32 %v1270_v33, %v261_v18  ;;  %v262_v37 = vmul.f32 %v1284_v42, %v92_v10  ;;  %v103_v9 = vld [vmem:[%s2092_s0 + $0x2c8] sm:$0xff]  ;;  %v104_v18 = vld [vmem:[%s2092_s0 + $0x2d0] sm:$0xff] }
  0x4d   :  { %v556_v35 = vmax.f32 %v428_v13, 0.0  ;;  %v1162_v40 = vpack.c.bf16 %v555_v25, %v554_v24  ;;  %v557_v41 = vmax.f32 %v429_v26, 0.0  ;;  %v263_v45 = vmul.f32 %v1286_v43, %v93_v19 }
  0x4e   :  { %v558_v44 = vmax.f32 %v430_v27, 0.0  ;;  %1029 = vst [vmem:[%s2093_s3 + $0x118] sm:$0xff] %v1161_v34  ;;  %v559_v46 = vmax.f32 %v431_v36, 0.0  ;;  %v432_v47 = vadd.f32 %v1304_v59, %v262_v37  ;;  %v264_v48 = vmul.f32 %v1232_v14, %v94_v30  ;;  %v105_v27 = vld [vmem:[%s2092_s0 + $0x2d8] sm:$0xff]  ;;  %v106_v30 = vld [vmem:[%s2092_s0 + $0x2e0] sm:$0xff]  ;;  %v107_v37 = vld [vmem:[%s2092_s0 + $0x2e8] sm:$0xff] }
  0x4f   :  { %v265_v49 = vmul.f32 %v1234_v15, %v95_v31  ;;  %1030 = vst [vmem:[%s2093_s3 + $0x120] sm:$0xff] %v1162_v40  ;;  %v1163_v51 = vpack.c.bf16 %v557_v41, %v556_v35  ;;  %v433_v52 = vadd.f32 %v1309_v62, %v263_v45  ;;  %v266_v53 = vmul.f32 %v1246_v20, %v96_v38 }
  0x50   :  { %v267_v54 = vmul.f32 %v1248_v21, %v97_v39  ;;  %v1164_v57 = vpack.c.bf16 %v559_v46, %v558_v44  ;;  %v560_v58 = vmax.f32 %v432_v47, 0.0  ;;  %v434_v60 = vadd.f32 %v1236_v16, %v264_v48  ;;  %v108_v48 = vld [vmem:[%s2092_s0 + $0x2f0] sm:$0xff] }
  0x51   :  { %v435_v61 = vadd.f32 %v1238_v17, %v265_v49  ;;  %1031 = vst [vmem:[%s2093_s3 + $0x128] sm:$0xff] %v1163_v51  ;;  %v561_v63 = vmax.f32 %v433_v52, 0.0  ;;  %v436_v0 = vadd.f32 %v1250_v22, %v266_v53  ;;  %v268_v2 = vmul.f32 %v1262_v28, %v98_v50  ;;  %v109_v53 = vld [vmem:[%s2092_s0 + $0x2f8] sm:$0xff] }
  0x52   :  { %v437_v1 = vadd.f32 %v1252_v23, %v267_v54  ;;  %1032 = vst [vmem:[%s2093_s3 + $0x130] sm:$0xff] %v1164_v57  ;;  %v562_v5 = vmax.f32 %v434_v60, 0.0  ;;  %v269_v6 = vmul.f32 %v1264_v29, %v99_v55  ;;  %v270_v7 = vmul.f32 %v1284_v42, %v100_v56  ;;  %v111_v60 = vld [vmem:[%s2092_s0 + $0x308] sm:$0xff] }
  0x53   :  { %v563_v3 = vmax.f32 %v435_v61, 0.0  ;;  %v1165_v10 = vpack.c.bf16 %v561_v63, %v560_v58  ;;  %v564_v11 = vmax.f32 %v436_v0, 0.0  ;;  %v438_v13 = vadd.f32 %v1268_v32, %v268_v2  ;;  %v110_v58 = vld [vmem:[%s2092_s0 + $0x300] sm:$0xff]  ;;  %v112_v2 = vld [vmem:[%s2092_s0 + $0x310] sm:$0xff] }
  0x54   :  { %v565_v12 = vmax.f32 %v437_v1, 0.0  ;;  %v439_v24 = vadd.f32 %v1270_v33, %v269_v6  ;;  %v271_v25 = vmul.f32 %v1286_v43, %v101_v4  ;;  %v440_v26 = vadd.f32 %v1304_v59, %v270_v7  ;;  %v113_v4 = vld [vmem:[%s2092_s0 + $0x318] sm:$0xff] }
  0x55   :  { %v1166_v19 = vpack.c.bf16 %v563_v3, %v562_v5  ;;  %1033 = vst [vmem:[%s2093_s3 + $0x138] sm:$0xff] %v1165_v10  ;;  %v566_v34 = vmax.f32 %v438_v13, 0.0  ;;  %v272_v35 = vmul.f32 %v1232_v14, %v102_v8  ;;  %v273_v36 = vmul.f32 %v1234_v15, %v103_v9 }
  0x56   :  { %v1167_v31 = vpack.c.bf16 %v565_v12, %v564_v11  ;;  %v567_v38 = vmax.f32 %v439_v24, 0.0  ;;  %v441_v39 = vadd.f32 %v1309_v62, %v271_v25  ;;  %v568_v40 = vmax.f32 %v440_v26, 0.0  ;;  %v114_v12 = vld [vmem:[%s2092_s0 + $0x320] sm:$0xff]  ;;  %v115_v25 = vld [vmem:[%s2092_s0 + $0x328] sm:$0xff]  ;;  %v116_v26 = vld [vmem:[%s2092_s0 + $0x330] sm:$0xff] }
  0x57   :  { %1034 = vst [vmem:[%s2093_s3 + $0x140] sm:$0xff] %v1166_v19  ;;  %v274_v41 = vmul.f32 %v1246_v20, %v104_v18  ;;  %v442_v44 = vadd.f32 %v1236_v16, %v272_v35  ;;  %v443_v45 = vadd.f32 %v1238_v17, %v273_v36  ;;  %v275_v46 = vmul.f32 %v1248_v21, %v105_v27 }
  0x58   :  { %1035 = vst [vmem:[%s2093_s3 + $0x148] sm:$0xff] %v1167_v31  ;;  %v276_v47 = vmul.f32 %v1262_v28, %v106_v30  ;;  %v1168_v49 = vpack.c.bf16 %v567_v38, %v566_v34  ;;  %v569_v50 = vmax.f32 %v441_v39, 0.0  ;;  %v277_v52 = vmul.f32 %v1264_v29, %v107_v37  ;;  %v117_v39 = vld [vmem:[%s2092_s0 + $0x338] sm:$0xff] }
  0x59   :  { %v444_v51 = vadd.f32 %v1250_v22, %v274_v41  ;;  %v570_v54 = vmax.f32 %v442_v44, 0.0  ;;  %v571_v55 = vmax.f32 %v443_v45, 0.0  ;;  %v445_v56 = vadd.f32 %v1252_v23, %v275_v46  ;;  %v118_v46 = vld [vmem:[%s2092_s0 + $0x340] sm:$0xff] }
  0x5a   :  { %v446_v57 = vadd.f32 %v1268_v32, %v276_v47  ;;  %1036 = vst [vmem:[%s2093_s3 + $0x150] sm:$0xff] %v1168_v49  ;;  %v1169_v61 = vpack.c.bf16 %v569_v50, %v568_v40  ;;  %v447_v0 = vadd.f32 %v1270_v33, %v277_v52  ;;  %v278_v1 = vmul.f32 %v1284_v42, %v108_v48  ;;  %v119_v47 = vld [vmem:[%s2092_s0 + $0x348] sm:$0xff]  ;;  %v120_v52 = vld [vmem:[%s2092_s0 + $0x350] sm:$0xff] }
  0x5b   :  { %v572_v63 = vmax.f32 %v444_v51, 0.0  ;;  %v1170_v5 = vpack.c.bf16 %v571_v55, %v570_v54  ;;  %v573_v3 = vmax.f32 %v445_v56, 0.0  ;;  %v279_v7 = vmul.f32 %v1286_v43, %v109_v53 }
  0x5c   :  { %v574_v6 = vmax.f32 %v446_v57, 0.0  ;;  %1037 = vst [vmem:[%s2093_s3 + $0x158] sm:$0xff] %v1169_v61  ;;  %v575_v8 = vmax.f32 %v447_v0, 0.0  ;;  %v448_v9 = vadd.f32 %v1304_v59, %v278_v1  ;;  %v280_v10 = vmul.f32 %v1232_v14, %v110_v58  ;;  %v121_v57 = vld [vmem:[%s2092_s0 + $0x358] sm:$0xff]  ;;  %v122_v58 = vld [vmem:[%s2092_s0 + $0x360] sm:$0xff]  ;;  %v123_v1 = vld [vmem:[%s2092_s0 + $0x368] sm:$0xff] }
  0x5d   :  { %v281_v11 = vmul.f32 %v1234_v15, %v111_v60  ;;  %1038 = vst [vmem:[%s2093_s3 + $0x160] sm:$0xff] %v1170_v5  ;;  %v1171_v13 = vpack.c.bf16 %v573_v3, %v572_v63  ;;  %v449_v18 = vadd.f32 %v1309_v62, %v279_v7  ;;  %v282_v19 = vmul.f32 %v1246_v20, %v112_v2 }
  0x5e   :  { %v283_v24 = vmul.f32 %v1248_v21, %v113_v4  ;;  %v1172_v27 = vpack.c.bf16 %v575_v8, %v574_v6  ;;  %v576_v30 = vmax.f32 %v448_v9, 0.0  ;;  %v450_v31 = vadd.f32 %v1236_v16, %v280_v10  ;;  %v124_v10 = vld [vmem:[%s2092_s0 + $0x370] sm:$0xff] }
  0x5f   :  { %v451_v34 = vadd.f32 %v1238_v17, %v281_v11  ;;  %1039 = vst [vmem:[%s2093_s3 + $0x168] sm:$0xff] %v1171_v13  ;;  %v577_v35 = vmax.f32 %v449_v18, 0.0  ;;  %v452_v36 = vadd.f32 %v1250_v22, %v282_v19  ;;  %v284_v38 = vmul.f32 %v1262_v28, %v114_v12  ;;  %v125_v19 = vld [vmem:[%s2092_s0 + $0x378] sm:$0xff] }
  0x60   :  { %v453_v37 = vadd.f32 %v1252_v23, %v283_v24  ;;  %1040 = vst [vmem:[%s2093_s3 + $0x170] sm:$0xff] %v1172_v27  ;;  %v578_v40 = vmax.f32 %v450_v31, 0.0  ;;  %v285_v44 = vmul.f32 %v1264_v29, %v115_v25  ;;  %v286_v45 = vmul.f32 %v1284_v42, %v116_v26  ;;  %v127_v31 = vld [vmem:[%s2092_s0 + $0x388] sm:$0xff] }
  0x61   :  { %v579_v41 = vmax.f32 %v451_v34, 0.0  ;;  %v1173_v48 = vpack.c.bf16 %v577_v35, %v576_v30  ;;  %v580_v49 = vmax.f32 %v452_v36, 0.0  ;;  %v454_v51 = vadd.f32 %v1268_v32, %v284_v38  ;;  %v126_v30 = vld [vmem:[%s2092_s0 + $0x380] sm:$0xff]  ;;  %v128_v38 = vld [vmem:[%s2092_s0 + $0x390] sm:$0xff] }
  0x62   :  { %v581_v50 = vmax.f32 %v453_v37, 0.0  ;;  %v455_v54 = vadd.f32 %v1270_v33, %v285_v44  ;;  %v287_v55 = vmul.f32 %v1286_v43, %v117_v39  ;;  %v456_v56 = vadd.f32 %v1304_v59, %v286_v45  ;;  %v129_v39 = vld [vmem:[%s2092_s0 + $0x398] sm:$0xff] }
  0x63   :  { %v1174_v53 = vpack.c.bf16 %v579_v41, %v578_v40  ;;  %1041 = vst [vmem:[%s2093_s3 + $0x178] sm:$0xff] %v1173_v48  ;;  %v582_v61 = vmax.f32 %v454_v51, 0.0  ;;  %v288_v63 = vmul.f32 %v1232_v14, %v118_v46  ;;  %v289_v0 = vmul.f32 %v1234_v15, %v119_v47 }
  0x64   :  { %v1175_v60 = vpack.c.bf16 %v581_v50, %v580_v49  ;;  %v583_v2 = vmax.f32 %v455_v54, 0.0  ;;  %v457_v4 = vadd.f32 %v1309_v62, %v287_v55  ;;  %v584_v5 = vmax.f32 %v456_v56, 0.0  ;;  %v130_v50 = vld [vmem:[%s2092_s0 + $0x3a0] sm:$0xff]  ;;  %v131_v55 = vld [vmem:[%s2092_s0 + $0x3a8] sm:$0xff]  ;;  %v132_v56 = vld [vmem:[%s2092_s0 + $0x3b0] sm:$0xff] }
  0x65   :  { %1042 = vst [vmem:[%s2093_s3 + $0x180] sm:$0xff] %v1174_v53  ;;  %v290_v3 = vmul.f32 %v1246_v20, %v120_v52  ;;  %v458_v6 = vadd.f32 %v1236_v16, %v288_v63  ;;  %v459_v7 = vadd.f32 %v1238_v17, %v289_v0  ;;  %v291_v8 = vmul.f32 %v1248_v21, %v121_v57 }
  0x66   :  { %1043 = vst [vmem:[%s2093_s3 + $0x188] sm:$0xff] %v1175_v60  ;;  %v292_v9 = vmul.f32 %v1262_v28, %v122_v58  ;;  %v1176_v11 = vpack.c.bf16 %v583_v2, %v582_v61  ;;  %v585_v12 = vmax.f32 %v457_v4, 0.0  ;;  %v293_v18 = vmul.f32 %v1264_v29, %v123_v1  ;;  %v133_v4 = vld [vmem:[%s2092_s0 + $0x3b8] sm:$0xff] }
  0x67   :  { %v460_v13 = vadd.f32 %v1250_v22, %v290_v3  ;;  %v586_v24 = vmax.f32 %v458_v6, 0.0  ;;  %v587_v25 = vmax.f32 %v459_v7, 0.0  ;;  %v461_v26 = vadd.f32 %v1252_v23, %v291_v8  ;;  %v134_v8 = vld [vmem:[%s2092_s0 + $0x3c0] sm:$0xff] }
  0x68   :  { %v462_v27 = vadd.f32 %v1268_v32, %v292_v9  ;;  %1044 = vst [vmem:[%s2093_s3 + $0x190] sm:$0xff] %v1176_v11  ;;  %v1177_v34 = vpack.c.bf16 %v585_v12, %v584_v5  ;;  %v463_v36 = vadd.f32 %v1270_v33, %v293_v18  ;;  %v294_v37 = vmul.f32 %v1284_v42, %v124_v10  ;;  %v135_v9 = vld [vmem:[%s2092_s0 + $0x3c8] sm:$0xff]  ;;  %v136_v18 = vld [vmem:[%s2092_s0 + $0x3d0] sm:$0xff] }
  0x69   :  { %v588_v35 = vmax.f32 %v460_v13, 0.0  ;;  %v1178_v40 = vpack.c.bf16 %v587_v25, %v586_v24  ;;  %v589_v41 = vmax.f32 %v461_v26, 0.0  ;;  %v295_v45 = vmul.f32 %v1286_v43, %v125_v19 }
  0x6a   :  { %v590_v44 = vmax.f32 %v462_v27, 0.0  ;;  %1045 = vst [vmem:[%s2093_s3 + $0x198] sm:$0xff] %v1177_v34  ;;  %v591_v46 = vmax.f32 %v463_v36, 0.0  ;;  %v464_v47 = vadd.f32 %v1304_v59, %v294_v37  ;;  %v296_v48 = vmul.f32 %v1232_v14, %v126_v30  ;;  %v137_v27 = vld [vmem:[%s2092_s0 + $0x3d8] sm:$0xff]  ;;  %v138_v30 = vld [vmem:[%s2092_s0 + $0x3e0] sm:$0xff]  ;;  %v139_v37 = vld [vmem:[%s2092_s0 + $0x3e8] sm:$0xff] }
  0x6b   :  { %v297_v49 = vmul.f32 %v1234_v15, %v127_v31  ;;  %1046 = vst [vmem:[%s2093_s3 + $0x1a0] sm:$0xff] %v1178_v40  ;;  %v1179_v51 = vpack.c.bf16 %v589_v41, %v588_v35  ;;  %v465_v52 = vadd.f32 %v1309_v62, %v295_v45  ;;  %v298_v53 = vmul.f32 %v1246_v20, %v128_v38 }
  0x6c   :  { %v299_v54 = vmul.f32 %v1248_v21, %v129_v39  ;;  %v1180_v57 = vpack.c.bf16 %v591_v46, %v590_v44  ;;  %v592_v58 = vmax.f32 %v464_v47, 0.0  ;;  %v466_v60 = vadd.f32 %v1236_v16, %v296_v48  ;;  %v140_v46 = vld [vmem:[%s2092_s0 + $0x3f0] sm:$0xff] }
  0x6d   :  { %v467_v61 = vadd.f32 %v1238_v17, %v297_v49  ;;  %1047 = vst [vmem:[%s2093_s3 + $0x1a8] sm:$0xff] %v1179_v51  ;;  %v593_v63 = vmax.f32 %v465_v52, 0.0  ;;  %v468_v0 = vadd.f32 %v1250_v22, %v298_v53  ;;  %v300_v2 = vmul.f32 %v1262_v28, %v130_v50 }
  0x6e   :  { %v469_v1 = vadd.f32 %v1252_v23, %v299_v54  ;;  %1048 = vst [vmem:[%s2093_s3 + $0x1b0] sm:$0xff] %v1180_v57  ;;  %v594_v5 = vmax.f32 %v466_v60, 0.0  ;;  %v301_v6 = vmul.f32 %v1264_v29, %v131_v55  ;;  %v302_v7 = vmul.f32 %v1284_v42, %v132_v56 }
  0x6f   :  { %v595_v3 = vmax.f32 %v467_v61, 0.0  ;;  %v1181_v10 = vpack.c.bf16 %v593_v63, %v592_v58  ;;  %v596_v11 = vmax.f32 %v468_v0, 0.0  ;;  %v470_v13 = vadd.f32 %v1268_v32, %v300_v2 }
  0x70   :  { %v597_v12 = vmax.f32 %v469_v1, 0.0  ;;  %v471_v24 = vadd.f32 %v1270_v33, %v301_v6  ;;  %v303_v25 = vmul.f32 %v1286_v43, %v133_v4  ;;  %v472_v26 = vadd.f32 %v1304_v59, %v302_v7 }
  0x71   :  { %v1182_v19 = vpack.c.bf16 %v595_v3, %v594_v5  ;;  %1049 = vst [vmem:[%s2093_s3 + $0x1b8] sm:$0xff] %v1181_v10  ;;  %v598_v34 = vmax.f32 %v470_v13, 0.0  ;;  %v304_v35 = vmul.f32 %v1232_v14, %v134_v8  ;;  %v305_v36 = vmul.f32 %v1234_v15, %v135_v9 }
  0x72   :  { %v1183_v31 = vpack.c.bf16 %v597_v12, %v596_v11  ;;  %v599_v38 = vmax.f32 %v471_v24, 0.0  ;;  %v473_v39 = vadd.f32 %v1309_v62, %v303_v25  ;;  %v600_v40 = vmax.f32 %v472_v26, 0.0 }
  0x73   :  { %1050 = vst [vmem:[%s2093_s3 + $0x1c0] sm:$0xff] %v1182_v19  ;;  %v306_v41 = vmul.f32 %v1246_v20, %v136_v18  ;;  %v474_v14 = vadd.f32 %v1236_v16, %v304_v35  ;;  %v475_v15 = vadd.f32 %v1238_v17, %v305_v36  ;;  %v307_v44 = vmul.f32 %v1248_v21, %v137_v27  ;;  %v141_v16 = vld [vmem:[%s2092_s0 + $0x3f8] sm:$0xff] }
  0x74   :  { %1051 = vst [vmem:[%s2093_s3 + $0x1c8] sm:$0xff] %v1183_v31  ;;  %v308_v45 = vmul.f32 %v1262_v28, %v138_v30  ;;  %v1184_v47 = vpack.c.bf16 %v599_v38, %v598_v34  ;;  %v601_v48 = vmax.f32 %v473_v39, 0.0  ;;  %v309_v49 = vmul.f32 %v1264_v29, %v139_v37 }
  0x75   :  { %v476_v20 = vadd.f32 %v1250_v22, %v306_v41  ;;  %v602_v50 = vmax.f32 %v474_v14, 0.0  ;;  %v603_v17 = vmax.f32 %v475_v15, 0.0  ;;  %v477_v21 = vadd.f32 %v1252_v23, %v307_v44 }
  0x76   :  { %v478_v28 = vadd.f32 %v1268_v32, %v308_v45  ;;  %1052 = vst [vmem:[%s2093_s3 + $0x1d0] sm:$0xff] %v1184_v47  ;;  %v1185_v51 = vpack.c.bf16 %v601_v48, %v600_v40  ;;  %v479_v22 = vadd.f32 %v1270_v33, %v309_v49  ;;  %v310_v29 = vmul.f32 %v1284_v42, %v140_v46 }
  0x77   :  { %v604_v52 = vmax.f32 %v476_v20, 0.0  ;;  %v1186_v53 = vpack.c.bf16 %v603_v17, %v602_v50  ;;  %v605_v54 = vmax.f32 %v477_v21, 0.0  ;;  %v311_v56 = vmul.f32 %v1286_v43, %v141_v16 }
  0x78   :  { %v606_v55 = vmax.f32 %v478_v28, 0.0  ;;  %1053 = vst [vmem:[%s2093_s3 + $0x1d8] sm:$0xff] %v1185_v51  ;;  %v607_v23 = vmax.f32 %v479_v22, 0.0  ;;  %v480_v32 = vadd.f32 %v1304_v59, %v310_v29 }
  0x79   :  { %1054 = vst [vmem:[%s2093_s3 + $0x1e0] sm:$0xff] %v1186_v53  ;;  %v1187_v57 = vpack.c.bf16 %v605_v54, %v604_v52  ;;  %v481_v33 = vadd.f32 %v1309_v62, %v311_v56 }
  0x7a   :  { %v1188_v42 = vpack.c.bf16 %v607_v23, %v606_v55  ;;  %v608_v58 = vmax.f32 %v480_v32, 0.0 }
  0x7b   :  { %1055 = vst [vmem:[%s2093_s3 + $0x1e8] sm:$0xff] %v1187_v57  ;;  %v609_v43 = vmax.f32 %v481_v33, 0.0 }
  0x7c   :  { %1056 = vst [vmem:[%s2093_s3 + $0x1f0] sm:$0xff] %v1188_v42 }
  0x7d   :  { %v1189_v60 = vpack.c.bf16 %v609_v43, %v608_v58 }
  0x7f   :  { %1057 = vst [vmem:[%s2093_s3 + $0x1f8] sm:$0xff] %v1189_v60 }

// kernel: generator_forward.15
= control target key start
LH: loop header
LB: loop body
LE: loop exit
PB: predicated region body
PF: predicated region fallthrough
CT: control target
= control target key end

     0   :  { %s1533_s9 = smov 0   ;;  %s1535_s10 = smov 0   ;;  %s1676_s0 = inlined_call_operand.vmem [shape: bf16[4,2048,256], index: 0, kind: input, shape index: {}]   ;;  %s1677_s1 = inlined_call_operand.vmem [shape: bf16[4,256,128], index: 1, kind: input, shape index: {}]   ;;  %s1678_s2 = inlined_call_operand.vmem [shape: f32[4,2048,128], index: 2, kind: output, shape index: {}]  }
   0x1   :  { %s1537_s11 = smov 0   ;;  %s1539_s12 = smov 0  }
   0x2   :  { %s1541_s13 = smov 0  }
   0x3 LB: > { %s34_s14 = sadd.s32 1, %s1508_s11  ;;  %s38_s15 = sadd.s32 1, %s1512_s12  ;;  %s1516_s13 = sphi %s1541_s13, %s12_s13   ;;  %s1512_s12 = sphi %s1539_s12, %s1682_s12   ;;  %s1508_s11 = sphi %s1537_s11, %s1681_s11   ;;  %s1504_s10 = sphi %s1535_s10, %s1680_s10   ;;  %s1500_s9 = sphi %s1533_s9, %s1679_s9  }
   0x4   : > { %p36_p0 = scmp.ge.s32.totalorder %s34_s14, 8  ;;  %p1121_p1 = scmp.ge.s32.totalorder %s1516_s13, 1 }
   0x5   : > { %p179_p2 = scmp.lt.s32.totalorder %s1516_s13, 33 }
   0x6   : > { %s1684_s14 = smov (%p36_p0, %s34_s14), 0  ;;  %s1686_s15 = smov (!%p36_p0, %s38_s15), %s1512_s12 }
   0x7   : > { %p180_p3 = pnand %p1121_p1, %p179_p2  ;;  %p40_p4 = scmp.ge.s32.totalorder %s1686_s15, 4 }
   0x8   : > { %p231_p5 = scmp.lt.s32.totalorder (!%p180_p3), %s1504_s10, 3  ;;  %s1122_s16 = sshll.u32 (!%p180_p3), %s1500_s9, 5 }
   0x9   : > { %s1688_s15 = smov (%p40_p4, %s1686_s15), 0  ;;  %183 = sbr.rel (%p180_p3) target bundleno = 339 (0x153), region = 28 }
   0xa   : > { %p233_p6 = scmp.lt.s32.totalorder (!%p180_p3), %s1122_s16, 255 }
  0x10   : > { %s1690_s10 = smov (!%p231_p5, %s1504_s10), 3  ;;  %s1692_s16 = smov (!%p233_p6, %s1122_s16), 255 }
  0x11   : > { %s1181_s17 = sshll.u32 %s1690_s10, 7  ;;  %s1129_s21 = sshll.u32 %s1690_s10, 8 }
  0x12   : > { %s1566_s20 = scalar_lea.vmem %s1677_s1, %s1181_s17  ;;  %s1570_s22 = sadd.s32 %s1129_s21, %s1692_s16 }
  0x13   : > { %v1350_v0 = vld [vmem:[%s1566_s20 + $0x40] sm:$0xff]   ;;  %v1352_v2 = vld [vmem:[%s1566_s20 + $0x48] sm:$0xff]   ;;  %v1354_v4 = vld [vmem:[%s1566_s20 + $0x50] sm:$0xff]   ;;  %s1123_s23 = sshll.u32 %s1692_s16, 1  ;;  %s1124_s24 = sshll.u32 %s1690_s10, 9 }
  0x14   : > { %v1351_v1 = vld [vmem:[%s1566_s20] sm:$0xff]   ;;  %1182 = vmatprep.subr.bf16.mxu0 %v1350_v0  ;;  %1294 = vmatprep.subr.bf16.mxu1 %v1350_v0  ;;  %v1353_v3 = vld [vmem:[%s1566_s20 + $0x8] sm:$0xff]   ;;  %v1355_v5 = vld [vmem:[%s1566_s20 + $0x10] sm:$0xff]   ;;  %s240_s25 = sadd.s32 %s1124_s24, %s1123_s23  ;;  %s1130_s30 = sshll.u32 %s1570_s22, 3 }
  0x15   : > { %1183 = vmatpush3.bf16.msra.mxu0 %v1351_v1  ;;  %1302 = vmatpush3.bf16.msra.mxu1 %v1351_v1  ;;  %v1356_v6 = vld [vmem:[%s1566_s20 + $0x58] sm:$0xff]   ;;  %s1125_s26 = sshll.u32 %s240_s25, 2  ;;  %v1358_v8 = vld [vmem:[%s1566_s20 + $0x60] sm:$0xff]   ;;  %v1360_v10 = vld [vmem:[%s1566_s20 + $0x68] sm:$0xff]   ;;  %s1627_s5 = scalar_lea.vmem %s1678_s2, %s1130_s30 }
  0x16   : > { %1184 = vmatprep.subr.bf16.mxu0 %v1352_v2  ;;  %1295 = vmatprep.subr.bf16.mxu1 %v1352_v2  ;;  %v1357_v7 = vld [vmem:[%s1566_s20 + $0x18] sm:$0xff]   ;;  %s1582_s29 = scalar_lea.vmem %s1676_s0, %s1125_s26  ;;  %v1359_v9 = vld [vmem:[%s1566_s20 + $0x20] sm:$0xff]   ;;  %v1361_v13 = vld [vmem:[%s1566_s20 + $0x28] sm:$0xff]  }
  0x17   : > { %v1368_v11 = vld [vmem:[%s1582_s29 + $0x4] ss:$8 sps:$4 sm:$0xff]   ;;  %v1362_v14 = vld [vmem:[%s1566_s20 + $0x70] sm:$0xff]   ;;  %v1364_v16 = vld [vmem:[%s1566_s20 + $0x78] sm:$0xff]  }
  0x18   : > { %v1371_v12 = vld [vmem:[%s1582_s29 + $0x84] ss:$8 sps:$4 sm:$0xff]   ;;  %692 = vmatprep.mubr.bf16.mxu0 %v1368_v11  ;;  %v1363_v15 = vld [vmem:[%s1566_s20 + $0x30] sm:$0xff]   ;;  %v1365_v17 = vld [vmem:[%s1566_s20 + $0x38] sm:$0xff]  }
  0x19   : > { %1185 = vmatpush3.bf16.msra.mxu0 %v1353_v3  ;;  %1303 = vmatpush3.bf16.msra.mxu1 %v1353_v3  ;;  %v1366_v18 = vld [vmem:[%s1582_s29] ss:$8 sps:$4 sm:$0xff]   ;;  %v1372_v20 = vld [vmem:[%s1582_s29 + $0x14] ss:$8 sps:$4 sm:$0xff]   ;;  %v1376_v22 = vld [vmem:[%s1582_s29 + $0x10] ss:$8 sps:$4 sm:$0xff]  }
  0x1a   : > { %1186 = vmatprep.subr.bf16.mxu0 %v1354_v4  ;;  %1296 = vmatprep.subr.bf16.mxu1 %v1354_v4  ;;  %v1369_v19 = vld [vmem:[%s1582_s29 + $0x80] ss:$8 sps:$4 sm:$0xff]   ;;  %v1374_v21 = vld [vmem:[%s1582_s29 + $0x94] ss:$8 sps:$4 sm:$0xff]   ;;  %v1377_v23 = vld [vmem:[%s1582_s29 + $0x90] ss:$8 sps:$4 sm:$0xff]  }
  0x1b   : > { %756 = vmatprep.mubr.bf16.mxu1 %v1371_v12  ;;  %v1378_v24 = vld [vmem:[%s1582_s29 + $0x24] ss:$8 sps:$4 sm:$0xff]   ;;  %v1382_v26 = vld [vmem:[%s1582_s29 + $0x20] ss:$8 sps:$4 sm:$0xff]   ;;  %v1384_v28 = vld [vmem:[%s1582_s29 + $0x34] ss:$8 sps:$4 sm:$0xff]  }
  0x1c   : > { %v1380_v25 = vld [vmem:[%s1582_s29 + $0xa4] ss:$8 sps:$4 sm:$0xff]   ;;  %v1383_v27 = vld [vmem:[%s1582_s29 + $0xa0] ss:$8 sps:$4 sm:$0xff]   ;;  %v1386_v29 = vld [vmem:[%s1582_s29 + $0xb4] ss:$8 sps:$4 sm:$0xff]  }
  0x1d   : > { %1187 = vmatpush3.bf16.msra.mxu0 %v1355_v5  ;;  %1304 = vmatpush3.bf16.msra.mxu1 %v1355_v5  ;;  %v1388_v30 = vld [vmem:[%s1582_s29 + $0x30] ss:$8 sps:$4 sm:$0xff]   ;;  %v1390_v32 = vld [vmem:[%s1582_s29 + $0x44] ss:$8 sps:$4 sm:$0xff]   ;;  %v1394_v34 = vld [vmem:[%s1582_s29 + $0x40] ss:$8 sps:$4 sm:$0xff]  }
  0x1e   : > { %1188 = vmatprep.subr.bf16.mxu0 %v1356_v6  ;;  %1297 = vmatprep.subr.bf16.mxu1 %v1356_v6  ;;  %v1389_v31 = vld [vmem:[%s1582_s29 + $0xb0] ss:$8 sps:$4 sm:$0xff]   ;;  %v1392_v33 = vld [vmem:[%s1582_s29 + $0xc4] ss:$8 sps:$4 sm:$0xff]   ;;  %v1395_v35 = vld [vmem:[%s1582_s29 + $0xc0] ss:$8 sps:$4 sm:$0xff]  }
  0x1f   : > { %v1396_v36 = vld [vmem:[%s1582_s29 + $0x54] ss:$8 sps:$4 sm:$0xff]   ;;  %v1400_v38 = vld [vmem:[%s1582_s29 + $0x50] ss:$8 sps:$4 sm:$0xff]   ;;  %v1402_v40 = vld [vmem:[%s1582_s29 + $0x64] ss:$8 sps:$4 sm:$0xff]  }
  0x20   : > { %v1398_v37 = vld [vmem:[%s1582_s29 + $0xd4] ss:$8 sps:$4 sm:$0xff]   ;;  %v1401_v39 = vld [vmem:[%s1582_s29 + $0xd0] ss:$8 sps:$4 sm:$0xff]   ;;  %v1404_v41 = vld [vmem:[%s1582_s29 + $0xe4] ss:$8 sps:$4 sm:$0xff]  }
  0x21   : > { %1189 = vmatpush3.bf16.msra.mxu0 %v1357_v7  ;;  %1305 = vmatpush3.bf16.msra.mxu1 %v1357_v7  ;;  %v1406_v42 = vld [vmem:[%s1582_s29 + $0x60] ss:$8 sps:$4 sm:$0xff]   ;;  %v1408_v44 = vld [vmem:[%s1582_s29 + $0x74] ss:$8 sps:$4 sm:$0xff]   ;;  %v1412_v46 = vld [vmem:[%s1582_s29 + $0x70] ss:$8 sps:$4 sm:$0xff]  }
  0x22   : > { %1190 = vmatprep.subr.bf16.mxu0 %v1358_v8  ;;  %1298 = vmatprep.subr.bf16.mxu1 %v1358_v8  ;;  %v1407_v43 = vld [vmem:[%s1582_s29 + $0xe0] ss:$8 sps:$4 sm:$0xff]   ;;  %v1410_v45 = vld [vmem:[%s1582_s29 + $0xf4] ss:$8 sps:$4 sm:$0xff]   ;;  %v1413_v47 = vld [vmem:[%s1582_s29 + $0xf0] ss:$8 sps:$4 sm:$0xff]  }
  0x25   : > { %1191 = vmatpush3.bf16.msra.mxu0 %v1359_v9  ;;  %1306 = vmatpush3.bf16.msra.mxu1 %v1359_v9 }
  0x26   : > { %1192 = vmatprep.subr.bf16.mxu0 %v1360_v10  ;;  %1299 = vmatprep.subr.bf16.mxu1 %v1360_v10 }
  0x29   : > { %1193 = vmatpush3.bf16.msra.mxu0 %v1361_v13  ;;  %1307 = vmatpush3.bf16.msra.mxu1 %v1361_v13 }
  0x2a   : > { %1194 = vmatprep.subr.bf16.mxu0 %v1362_v14  ;;  %1300 = vmatprep.subr.bf16.mxu1 %v1362_v14 }
  0x2d   : > { %1195 = vmatpush3.bf16.msra.mxu0 %v1363_v15  ;;  %1308 = vmatpush3.bf16.msra.mxu1 %v1363_v15 }
  0x2e   : > { %1196 = vmatprep.subr.bf16.mxu0 %v1364_v16  ;;  %1301 = vmatprep.subr.bf16.mxu1 %v1364_v16 }
  0x31   : > { %1197 = vmatpush3.bf16.msra.mxu0 %v1365_v17  ;;  %1309 = vmatpush3.bf16.msra.mxu1 %v1365_v17 }
  0x34   : > { %693 = vmatmul.mubr.bf16.vlgmr.msra.gmra.mrb[0].mxu0 %v1366_v18  ;;  %757 = vmatmul.mubr.bf16.vlgmr.msra.gmra.mrb[0].mxu1 %v1369_v19 }
  0x35   : > { %700 = vmatprep.mubr.bf16.mxu0 %v1372_v20  ;;  %764 = vmatprep.mubr.bf16.mxu1 %v1374_v21 }
  0x3c   : > { %701 = vmatmul.mubr.bf16.gmra.mrb[4].mxu0 %v1376_v22  ;;  %765 = vmatmul.mubr.bf16.gmra.mrb[4].mxu1 %v1377_v23 }
  0x3d   : > { %708 = vmatprep.mubr.bf16.mxu0 %v1378_v24  ;;  %772 = vmatprep.mubr.bf16.mxu1 %v1380_v25 }
  0x44   : > { %709 = vmatmul.mubr.bf16.gmra.mrb[8].mxu0 %v1382_v26  ;;  %773 = vmatmul.mubr.bf16.gmra.mrb[8].mxu1 %v1383_v27 }
  0x45   : > { %716 = vmatprep.mubr.bf16.mxu0 %v1384_v28  ;;  %780 = vmatprep.mubr.bf16.mxu1 %v1386_v29 }
  0x4c   : > { %717 = vmatmul.mubr.bf16.gmra.mrb[12].mxu0 %v1388_v30  ;;  %781 = vmatmul.mubr.bf16.gmra.mrb[12].mxu1 %v1389_v31 }
  0x4d   : > { %724 = vmatprep.mubr.bf16.mxu0 %v1390_v32  ;;  %788 = vmatprep.mubr.bf16.mxu1 %v1392_v33 }
  0x54   : > { %725 = vmatmul.mubr.bf16.gmra.mrb[16].mxu0 %v1394_v34  ;;  %789 = vmatmul.mubr.bf16.gmra.mrb[16].mxu1 %v1395_v35 }
  0x55   : > { %732 = vmatprep.mubr.bf16.mxu0 %v1396_v36  ;;  %796 = vmatprep.mubr.bf16.mxu1 %v1398_v37 }
  0x5c   : > { %733 = vmatmul.mubr.bf16.gmra.mrb[20].mxu0 %v1400_v38  ;;  %797 = vmatmul.mubr.bf16.gmra.mrb[20].mxu1 %v1401_v39 }
  0x5d   : > { %740 = vmatprep.mubr.bf16.mxu0 %v1402_v40  ;;  %804 = vmatprep.mubr.bf16.mxu1 %v1404_v41 }
  0x64   : > { %741 = vmatmul.mubr.bf16.gmra.mrb[24].mxu0 %v1406_v42  ;;  %805 = vmatmul.mubr.bf16.gmra.mrb[24].mxu1 %v1407_v43 }
  0x65   : > { %748 = vmatprep.mubr.bf16.mxu0 %v1408_v44  ;;  %812 = vmatprep.mubr.bf16.mxu1 %v1410_v45 }
  0x6c   : > { %749 = vmatmul.mubr.bf16.gmra.mrb[28].mxu0 %v1412_v46  ;;  %813 = vmatmul.mubr.bf16.gmra.mrb[28].mxu1 %v1413_v47 }
 0x107   : > { %v1198_v48 = vpop.f32.mrb[0].mxu0  ;;  %v1246_v49 = vpop.f32.mrb[0].mxu1 }
 0x108   : > { %v1199_v50 = vpop.f32.mrb[1].mxu0  ;;  %v1247_v51 = vpop.f32.mrb[1].mxu1 }
 0x109   : > { %v1200_v52 = vadd.f32 %v1199_v50, %v1198_v48  ;;  %v1248_v53 = vadd.f32 %v1247_v51, %v1246_v49  ;;  %v1201_v54 = vpop.f32.mrb[2].mxu0  ;;  %v1249_v55 = vpop.f32.mrb[2].mxu1 }
 0x10a   : > { %v1202_v56 = vpop.f32.mrb[3].mxu0  ;;  %v1250_v57 = vpop.f32.mrb[3].mxu1 }
 0x10b   : > { %1414 = vtanh.f32 %v1200_v52  ;;  %v1203_v58 = vadd.f32 %v1202_v56, %v1201_v54  ;;  %v1251_v59 = vadd.f32 %v1250_v57, %v1249_v55 }
 0x10c   : > { %1416 = vtanh.f32 %v1248_v53 }
 0x10d   : > { %1418 = vtanh.f32 %v1203_v58 }
 0x10e   : > { %1420 = vtanh.f32 %v1251_v59 }
 0x10f   : > { %v1204_v60 = vpop.f32.mrb[4].mxu0  ;;  %v1252_v61 = vpop.f32.mrb[4].mxu1 }
 0x110   : > { %v1205_v62 = vpop.f32.mrb[5].mxu0  ;;  %v1253_v63 = vpop.f32.mrb[5].mxu1 }
 0x111   : > { %v1206_v0 = vadd.f32 %v1205_v62, %v1204_v60  ;;  %v1254_v1 = vadd.f32 %v1253_v63, %v1252_v61  ;;  %v1207_v2 = vpop.f32.mrb[6].mxu0  ;;  %v1255_v3 = vpop.f32.mrb[6].mxu1 }
 0x112   : > { %v1208_v4 = vpop.f32.mrb[7].mxu0  ;;  %v1256_v5 = vpop.f32.mrb[7].mxu1 }
 0x113   : > { %1422 = vtanh.f32 %v1206_v0  ;;  %v1209_v6 = vadd.f32 %v1208_v4, %v1207_v2  ;;  %v1257_v7 = vadd.f32 %v1256_v5, %v1255_v3 }
 0x114   : > { %1424 = vtanh.f32 %v1254_v1 }
 0x115   : > { %v1415_v8 = vpop.eup %1414  ;;  %1426 = vtanh.f32 %v1209_v6 }
 0x116   : > { %v1417_v9 = vpop.eup %1416  ;;  %952 = vst [vmem:[%s1627_s5] sm:$0xff] %v1415_v8  ;;  %1428 = vtanh.f32 %v1257_v7 }
 0x117   : > { %v1419_v10 = vpop.eup %1418  ;;  %968 = vst [vmem:[%s1627_s5 + $0x80] sm:$0xff] %v1417_v9  ;;  %v1210_v11 = vpop.f32.mrb[8].mxu0 }
 0x118   : > { %v1258_v12 = vpop.f32.mrb[8].mxu1  ;;  %v1421_v13 = vpop.eup %1420  ;;  %953 = vst [vmem:[%s1627_s5 + $0x8] sm:$0xff] %v1419_v10 }
 0x119   : > { %v1211_v14 = vpop.f32.mrb[9].mxu0  ;;  %v1259_v15 = vpop.f32.mrb[9].mxu1  ;;  %969 = vst [vmem:[%s1627_s5 + $0x88] sm:$0xff] %v1421_v13 }
 0x11a   : > { %v1212_v16 = vadd.f32 %v1211_v14, %v1210_v11  ;;  %v1260_v17 = vadd.f32 %v1259_v15, %v1258_v12  ;;  %v1213_v18 = vpop.f32.mrb[10].mxu0  ;;  %v1261_v19 = vpop.f32.mrb[10].mxu1 }
 0x11b   : > { %v1214_v20 = vpop.f32.mrb[11].mxu0  ;;  %v1262_v21 = vpop.f32.mrb[11].mxu1 }
 0x11c   : > { %1430 = vtanh.f32 %v1212_v16  ;;  %v1215_v22 = vadd.f32 %v1214_v20, %v1213_v18  ;;  %v1263_v23 = vadd.f32 %v1262_v21, %v1261_v19 }
 0x11d   : > { %1432 = vtanh.f32 %v1260_v17  ;;  %v1423_v24 = vpop.eup %1422 }
 0x11e   : > { %1434 = vtanh.f32 %v1215_v22  ;;  %v1425_v25 = vpop.eup %1424  ;;  %954 = vst [vmem:[%s1627_s5 + $0x10] sm:$0xff] %v1423_v24 }
 0x11f   : > { %1436 = vtanh.f32 %v1263_v23  ;;  %v1427_v26 = vpop.eup %1426  ;;  %970 = vst [vmem:[%s1627_s5 + $0x90] sm:$0xff] %v1425_v25  ;;  %v1216_v27 = vpop.f32.mrb[12].mxu0 }
 0x120   : > { %v1264_v28 = vpop.f32.mrb[12].mxu1  ;;  %v1429_v29 = vpop.eup %1428  ;;  %955 = vst [vmem:[%s1627_s5 + $0x18] sm:$0xff] %v1427_v26 }
 0x121   : > { %v1217_v30 = vpop.f32.mrb[13].mxu0  ;;  %v1265_v31 = vpop.f32.mrb[13].mxu1  ;;  %971 = vst [vmem:[%s1627_s5 + $0x98] sm:$0xff] %v1429_v29 }
 0x122   : > { %v1218_v32 = vadd.f32 %v1217_v30, %v1216_v27  ;;  %v1266_v33 = vadd.f32 %v1265_v31, %v1264_v28  ;;  %v1219_v34 = vpop.f32.mrb[14].mxu0  ;;  %v1267_v35 = vpop.f32.mrb[14].mxu1 }
 0x123   : > { %v1220_v36 = vpop.f32.mrb[15].mxu0  ;;  %v1268_v37 = vpop.f32.mrb[15].mxu1 }
 0x124   : > { %1438 = vtanh.f32 %v1218_v32  ;;  %v1221_v38 = vadd.f32 %v1220_v36, %v1219_v34  ;;  %v1269_v39 = vadd.f32 %v1268_v37, %v1267_v35 }
 0x125   : > { %1440 = vtanh.f32 %v1266_v33 }
 0x126   : > { %v1431_v40 = vpop.eup %1430  ;;  %1442 = vtanh.f32 %v1221_v38 }
 0x127   : > { %v1433_v41 = vpop.eup %1432  ;;  %956 = vst [vmem:[%s1627_s5 + $0x20] sm:$0xff] %v1431_v40  ;;  %1444 = vtanh.f32 %v1269_v39  ;;  %v1222_v43 = vpop.f32.mrb[16].mxu0 }
 0x128   : > { %v1435_v42 = vpop.eup %1434  ;;  %972 = vst [vmem:[%s1627_s5 + $0xa0] sm:$0xff] %v1433_v41  ;;  %v1270_v44 = vpop.f32.mrb[16].mxu1 }
 0x129   : > { %v1437_v45 = vpop.eup %1436  ;;  %957 = vst [vmem:[%s1627_s5 + $0x28] sm:$0xff] %v1435_v42  ;;  %v1223_v46 = vpop.f32.mrb[17].mxu0 }
 0x12a   : > { %v1271_v47 = vpop.f32.mrb[17].mxu1  ;;  %973 = vst [vmem:[%s1627_s5 + $0xa8] sm:$0xff] %v1437_v45  ;;  %v1224_v48 = vadd.f32 %v1223_v46, %v1222_v43  ;;  %v1225_v50 = vpop.f32.mrb[18].mxu0 }
 0x12b   : > { %v1272_v49 = vadd.f32 %v1271_v47, %v1270_v44  ;;  %v1273_v51 = vpop.f32.mrb[18].mxu1  ;;  %v1226_v52 = vpop.f32.mrb[19].mxu0 }
 0x12c   : > { %v1274_v53 = vpop.f32.mrb[19].mxu1  ;;  %1446 = vtanh.f32 %v1224_v48  ;;  %v1227_v54 = vadd.f32 %v1226_v52, %v1225_v50 }
 0x12d   : > { %v1275_v55 = vadd.f32 %v1274_v53, %v1273_v51  ;;  %1448 = vtanh.f32 %v1272_v49 }
 0x12e   : > { %v1439_v56 = vpop.eup %1438  ;;  %1450 = vtanh.f32 %v1227_v54 }
 0x12f   : > { %v1441_v57 = vpop.eup %1440  ;;  %958 = vst [vmem:[%s1627_s5 + $0x30] sm:$0xff] %v1439_v56  ;;  %1452 = vtanh.f32 %v1275_v55  ;;  %v1228_v59 = vpop.f32.mrb[20].mxu0 }
 0x130   : > { %v1443_v58 = vpop.eup %1442  ;;  %974 = vst [vmem:[%s1627_s5 + $0xb0] sm:$0xff] %v1441_v57  ;;  %v1276_v60 = vpop.f32.mrb[20].mxu1 }
 0x131   : > { %v1445_v61 = vpop.eup %1444  ;;  %959 = vst [vmem:[%s1627_s5 + $0x38] sm:$0xff] %v1443_v58  ;;  %v1229_v62 = vpop.f32.mrb[21].mxu0 }
 0x132   : > { %v1277_v63 = vpop.f32.mrb[21].mxu1  ;;  %975 = vst [vmem:[%s1627_s5 + $0xb8] sm:$0xff] %v1445_v61  ;;  %v1230_v0 = vadd.f32 %v1229_v62, %v1228_v59  ;;  %v1231_v2 = vpop.f32.mrb[22].mxu0 }
 0x133   : > { %v1278_v1 = vadd.f32 %v1277_v63, %v1276_v60  ;;  %v1279_v3 = vpop.f32.mrb[22].mxu1  ;;  %v1232_v4 = vpop.f32.mrb[23].mxu0 }
 0x134   : > { %v1280_v5 = vpop.f32.mrb[23].mxu1  ;;  %1454 = vtanh.f32 %v1230_v0  ;;  %v1233_v6 = vadd.f32 %v1232_v4, %v1231_v2 }
 0x135   : > { %v1281_v7 = vadd.f32 %v1280_v5, %v1279_v3  ;;  %1456 = vtanh.f32 %v1278_v1 }
 0x136   : > { %v1447_v8 = vpop.eup %1446  ;;  %1458 = vtanh.f32 %v1233_v6 }
 0x137   : > { %v1449_v9 = vpop.eup %1448  ;;  %960 = vst [vmem:[%s1627_s5 + $0x40] sm:$0xff] %v1447_v8  ;;  %1460 = vtanh.f32 %v1281_v7  ;;  %v1234_v11 = vpop.f32.mrb[24].mxu0 }
 0x138   : > { %v1451_v10 = vpop.eup %1450  ;;  %976 = vst [vmem:[%s1627_s5 + $0xc0] sm:$0xff] %v1449_v9  ;;  %v1282_v12 = vpop.f32.mrb[24].mxu1 }
 0x139   : > { %v1453_v13 = vpop.eup %1452  ;;  %961 = vst [vmem:[%s1627_s5 + $0x48] sm:$0xff] %v1451_v10  ;;  %v1235_v14 = vpop.f32.mrb[25].mxu0 }
 0x13a   : > { %v1283_v15 = vpop.f32.mrb[25].mxu1  ;;  %977 = vst [vmem:[%s1627_s5 + $0xc8] sm:$0xff] %v1453_v13  ;;  %v1236_v16 = vadd.f32 %v1235_v14, %v1234_v11  ;;  %v1237_v18 = vpop.f32.mrb[26].mxu0 }
 0x13b   : > { %v1284_v17 = vadd.f32 %v1283_v15, %v1282_v12  ;;  %v1285_v19 = vpop.f32.mrb[26].mxu1  ;;  %v1238_v20 = vpop.f32.mrb[27].mxu0 }
 0x13c   : > { %v1286_v21 = vpop.f32.mrb[27].mxu1  ;;  %1462 = vtanh.f32 %v1236_v16  ;;  %v1239_v22 = vadd.f32 %v1238_v20, %v1237_v18 }
 0x13d   : > { %v1287_v23 = vadd.f32 %v1286_v21, %v1285_v19  ;;  %1464 = vtanh.f32 %v1284_v17 }
 0x13e   : > { %v1455_v24 = vpop.eup %1454  ;;  %1466 = vtanh.f32 %v1239_v22 }
 0x13f   : > { %v1457_v25 = vpop.eup %1456  ;;  %962 = vst [vmem:[%s1627_s5 + $0x50] sm:$0xff] %v1455_v24  ;;  %1468 = vtanh.f32 %v1287_v23  ;;  %v1240_v27 = vpop.f32.mrb[28].mxu0 }
 0x140   : > { %v1459_v26 = vpop.eup %1458  ;;  %978 = vst [vmem:[%s1627_s5 + $0xd0] sm:$0xff] %v1457_v25  ;;  %v1288_v28 = vpop.f32.mrb[28].mxu1 }
 0x141   : > { %v1461_v29 = vpop.eup %1460  ;;  %963 = vst [vmem:[%s1627_s5 + $0x58] sm:$0xff] %v1459_v26  ;;  %v1241_v30 = vpop.f32.mrb[29].mxu0 }
 0x142   : > { %v1289_v31 = vpop.f32.mrb[29].mxu1  ;;  %979 = vst [vmem:[%s1627_s5 + $0xd8] sm:$0xff] %v1461_v29  ;;  %v1242_v32 = vadd.f32 %v1241_v30, %v1240_v27  ;;  %v1243_v34 = vpop.f32.mrb[30].mxu0 }
 0x143   : > { %v1290_v33 = vadd.f32 %v1289_v31, %v1288_v28  ;;  %v1291_v35 = vpop.f32.mrb[30].mxu1  ;;  %v1244_v36 = vpop.f32.mrb[31].mxu0 }
 0x144   : > { %v1292_v37 = vpop.f32.mrb[31].mxu1  ;;  %1470 = vtanh.f32 %v1242_v32  ;;  %v1245_v38 = vadd.f32 %v1244_v36, %v1243_v34 }
 0x145   : > { %v1293_v39 = vadd.f32 %v1292_v37, %v1291_v35  ;;  %1472 = vtanh.f32 %v1290_v33 }
 0x146   : > { %v1463_v40 = vpop.eup %1462  ;;  %1474 = vtanh.f32 %v1245_v38 }
 0x147   : > { %v1465_v41 = vpop.eup %1464  ;;  %964 = vst [vmem:[%s1627_s5 + $0x60] sm:$0xff] %v1463_v40  ;;  %1476 = vtanh.f32 %v1293_v39 }
 0x148   : > { %v1467_v42 = vpop.eup %1466  ;;  %980 = vst [vmem:[%s1627_s5 + $0xe0] sm:$0xff] %v1465_v41 }
 0x149   : > { %v1469_v43 = vpop.eup %1468  ;;  %965 = vst [vmem:[%s1627_s5 + $0x68] sm:$0xff] %v1467_v42 }
 0x14a   : > { %981 = vst [vmem:[%s1627_s5 + $0xe8] sm:$0xff] %v1469_v43 }
 0x14e   : > { %v1471_v44 = vpop.eup %1470 }
 0x14f   : > { %v1473_v45 = vpop.eup %1472  ;;  %966 = vst [vmem:[%s1627_s5 + $0x70] sm:$0xff] %v1471_v44 }
 0x150   : > { %v1475_v46 = vpop.eup %1474  ;;  %982 = vst [vmem:[%s1627_s5 + $0xf0] sm:$0xff] %v1473_v45 }
 0x151   : > { %v1477_v47 = vpop.eup %1476  ;;  %967 = vst [vmem:[%s1627_s5 + $0x78] sm:$0xff] %v1475_v46 }
 0x152   : > { %983 = vst [vmem:[%s1627_s5 + $0xf8] sm:$0xff] %v1477_v47 }
 0x153 PF: > { %s12_s13 = sadd.s32 1, %s1516_s13   ;;  %s1679_s9 = smov %s1508_s11 }
 0x154   : > { %p9_p7 = scmp.ge.s32.totalorder %s12_s13, 34   ;;  %s1680_s10 = smov %s1512_s12 }
 0x155   : > { %s1681_s11 = smov %s1684_s14  ;;  %s1682_s12 = smov %s1688_s15 }
 0x156   :  { %11 = sbr.rel (!%p9_p7) target bundleno = 3 (0x3), region = 69 }

</bundles_post_ra>
